<compile_context>
chip_gen: v5e
topology: v5e:2x2
jax: 0.10.0
libtpu: 0.0.40
codegen_flags: <defaults>
</compile_context>

<pallas_src>
import functools
import math

import jax
import jax.numpy as jnp
from jax import lax
from jax.experimental import pallas as pl
from jax.experimental.pallas import tpu as pltpu

# ---- GammaRad_loss default hyper-parameters (module __init__) ----
LAMDA = 1.0
RAD_PHASE_FAC = 0.0
GEO_WEIGHT = 0.0
EUC_WEIGHT = 0.01
HUBER_DELTA = 1.0          # nn.HuberLoss() default
_LN10 = math.log(10.0)


def _huber(d, delta):
    ad = jnp.abs(d)
    return jnp.where(ad < delta, 0.5 * d * d, delta * (ad - 0.5 * delta))


def _pack_row0(vals):
    """Pack scalars into lanes [0..len(vals)) of row 0 of an (8,128) f32 tile (lane-dense store)."""
    sub = lax.broadcasted_iota(jnp.int32, (8, 128), 0)
    lane = lax.broadcasted_iota(jnp.int32, (8, 128), 1)
    tile = jnp.zeros((8, 128), jnp.float32)
    for i, v in enumerate(vals):
        tile = jnp.where((sub == 0) & (lane == i), v, tile)
    return tile


# ------------------------------ fused Pallas kernel ------------------------------

def _fused_loss_kernel(gpm_ref, gpp_ref, gtm_ref, gtp_ref, ant_ref,
                       rp_ref, rt_ref, out_ref, *, C):
    b = pl.program_id(0)

    # ---------------- radiation partial sums (TB batch elements per grid step) ----------------
    rp = rp_ref[...]                 # (TB, 2C, H, W), single whole-block load
    rt = rt_ref[...]
    pm, pp = rp[:, :C], rp[:, C:]    # predicted magnitude (dB) / phase
    tm, tp = rt[:, :C], rt[:, C:]

    # radiation_loss_dB (mag_loss='huber'): Huber(pred_mag, target_mag)
    rad_huber = jnp.sum(_huber(pm - tm, HUBER_DELTA))

    # sin/cos reused for both the circular and Euclidean terms (one fewer cos per element).
    cpp = jnp.cos(pp)
    spp = jnp.sin(pp)
    ctp = jnp.cos(tp)
    stp = jnp.sin(tp)
    # CircularLoss: 1 - cos(pp - tp) == 1 - (cpp*ctp + spp*stp)
    rad_circ = jnp.sum(1.0 - (cpp * ctp + spp * stp))

    # Euclidean_Radiation_Loss: both mags linearized with 10^(x/10) == exp(x*ln10/10)
    p_lin = jnp.exp(pm * (_LN10 / 10.0))
    t_lin = jnp.exp(tm * (_LN10 / 10.0))
    dx = p_lin * cpp - t_lin * ctp
    dy = p_lin * spp - t_lin * stp
    rad_euc = jnp.sum(jnp.sqrt(dx * dx + dy * dy))

    # ------------- gamma + geometry: tiny resident blocks, counted once (block 0) -------------
    @pl.when(b == 0)
    def _():
        g_pm = gpm_ref[...]              # predicted magnitude (linear)
        g_pp = gpp_ref[...]              # predicted phase
        g_tm = gtm_ref[...]              # target magnitude (dB)
        g_tp = gtp_ref[...]              # target phase

        # gamma_loss_dB: Huber(20*log10(pred_mag), target_mag); 20*log10(x) == (20/ln10)*ln(x)
        g_pm_db = (20.0 / _LN10) * jnp.log(g_pm)
        gamma_huber = jnp.sum(_huber(g_pm_db - g_tm, HUBER_DELTA))

        cgp = jnp.cos(g_pp)
        sgp = jnp.sin(g_pp)
        cgt = jnp.cos(g_tp)
        sgt = jnp.sin(g_tp)
        gamma_circ = jnp.sum(1.0 - (cgp * cgt + sgp * sgt))

        # Euclidean_Gamma_Loss: target mag linearized with 10^(x/20) == exp(x*ln10/20)
        g_tl = jnp.exp(g_tm * (_LN10 / 20.0))
        gdx = g_pm * cgp - g_tl * cgt
        gdy = g_pm * sgp - g_tl * sgt
        gamma_euc = jnp.sum(jnp.sqrt(gdx * gdx + gdy * gdy))

        # geometry_loss numerator: sum |ant|
        ant_sum = jnp.sum(jnp.abs(ant_ref[...]))

        out_ref[...] = _pack_row0([
            rad_huber, rad_circ, rad_euc,
            gamma_huber, gamma_circ, gamma_euc, ant_sum,
        ])[None]

    @pl.when(b != 0)
    def _():
        out_ref[...] = _pack_row0([rad_huber, rad_circ, rad_euc])[None]


# ------------------------------- glue / wrapper -------------------------------

def gamma_rad_loss(gamma_pred, gamma_target, radiation_pred, radiation_target, ant_pred):
    gamma_pred = gamma_pred.astype(jnp.float32)
    gamma_target = gamma_target.astype(jnp.float32)
    radiation_pred = radiation_pred.astype(jnp.float32)
    radiation_target = radiation_target.astype(jnp.float32)

    B, twoF = gamma_pred.shape
    F = twoF // 2
    Br, twoC, H, W = radiation_pred.shape
    C = twoC // 2

    # Tiny gamma halves: wrapper-side split (a few hundred bytes -> negligible; the dominant
    # radiation tensors are passed un-copied and split inside the kernel).
    g_pm, g_pp = gamma_pred[:, :F], gamma_pred[:, F:]
    g_tm, g_tp = gamma_target[:, :F], gamma_target[:, F:]
    # ant: collapse trailing contiguous dims.
    ant2d = ant_pred.astype(jnp.float32).reshape(ant_pred.shape[0], -1)
    A = ant2d.shape[1]

    # Batch tile: largest divisor of Br whose double-buffered radiation tiles (pred + target)
    # stay within a modest VMEM budget; amortizes per-grid-step overhead.
    per_elem_bytes = 2 * twoC * H * W * 4              # both radiation tensors, f32
    tb = max(1, min(Br, (8 << 20) // max(2 * per_elem_bytes, 1)))
    while Br % tb:
        tb -= 1
    n_blocks = Br // tb

    kernel = functools.partial(_fused_loss_kernel, C=C)

    def resident2d(shape):
        return pl.BlockSpec(shape, lambda b: (0, 0))

    partials = pl.pallas_call(
        kernel,
        grid=(n_blocks,),
        in_specs=[
            resident2d((B, F)), resident2d((B, F)),
            resident2d((B, F)), resident2d((B, F)),
            resident2d((ant2d.shape[0], A)),
            pl.BlockSpec((tb, twoC, H, W), lambda b: (b, 0, 0, 0)),
            pl.BlockSpec((tb, twoC, H, W), lambda b: (b, 0, 0, 0)),
        ],
        out_specs=pl.BlockSpec((1, 8, 128), lambda b: (b, 0, 0)),
        out_shape=jax.ShapeDtypeStruct((n_blocks, 8, 128), jnp.float32),
        compiler_params=pltpu.CompilerParams(
            dimension_semantics=("parallel",),
        ),
    )(g_pm, g_pp, g_tm, g_tp, ant2d, radiation_pred, radiation_target)

    # Tiny final reduction over per-block partials (also improves f32 accumulation order).
    sums = jnp.sum(partials[:, 0, :8], axis=0)

    n_r = Br * C * H * W
    n_g = B * F
    n_a = ant2d.size

    rad_huber = sums[0] / n_r
    rad_circ = sums[1] / n_r
    rad_euc = sums[2] / n_r
    gamma_huber = sums[3] / n_g
    gamma_circ = sums[4] / n_g
    gamma_euc = sums[5] / n_g
    ant_loss = sums[6] / n_a

    gamma_total = gamma_huber + gamma_circ            # gamma_loss_dB (smooth terms = 0)
    rad_total = rad_huber + RAD_PHASE_FAC * rad_circ  # radiation_loss_dB('huber')

    loss = ((1.0 - LAMDA) * (gamma_total + EUC_WEIGHT * gamma_euc)
            + LAMDA * (rad_total + EUC_WEIGHT * rad_euc)
            + GEO_WEIGHT * ant_loss)
    return loss, ant_loss


# ------------------------------ pure-JAX reference ------------------------------

def ref_loss(gamma_pred, gamma_target, radiation_pred, radiation_target, ant_pred):
    F = gamma_pred.shape[1] // 2
    g_pm, g_pp = gamma_pred[:, :F], gamma_pred[:, F:]
    g_tm, g_tp = gamma_target[:, :F], gamma_target[:, F:]
    gamma_huber = jnp.mean(_huber(20.0 * jnp.log10(g_pm) - g_tm, HUBER_DELTA))
    gamma_circ = jnp.mean(1.0 - jnp.cos(g_pp - g_tp))
    tl = 10.0 ** (g_tm / 20.0)
    gamma_euc = jnp.mean(jnp.sqrt((g_pm * jnp.cos(g_pp) - tl * jnp.cos(g_tp)) ** 2
                                  + (g_pm * jnp.sin(g_pp) - tl * jnp.sin(g_tp)) ** 2))

    C = radiation_pred.shape[1] // 2
    r_pm, r_pp = radiation_pred[:, :C], radiation_pred[:, C:]
    r_tm, r_tp = radiation_target[:, :C], radiation_target[:, C:]
    rad_huber = jnp.mean(_huber(r_pm - r_tm, HUBER_DELTA))
    rad_circ = jnp.mean(1.0 - jnp.cos(r_pp - r_tp))
    pl_lin, tl_lin = 10.0 ** (r_pm / 10.0), 10.0 ** (r_tm / 10.0)
    rad_euc = jnp.mean(jnp.sqrt((pl_lin * jnp.cos(r_pp) - tl_lin * jnp.cos(r_tp)) ** 2
                                + (pl_lin * jnp.sin(r_pp) - tl_lin * jnp.sin(r_tp)) ** 2))
    ant_loss = jnp.mean(jnp.abs(ant_pred))
    gamma_total = gamma_huber + gamma_circ
    rad_total = rad_huber + RAD_PHASE_FAC * rad_circ
    return ((1.0 - LAMDA) * (gamma_total + EUC_WEIGHT * gamma_euc)
            + LAMDA * (rad_total + EUC_WEIGHT * rad_euc)
            + GEO_WEIGHT * ant_loss)


if __name__ == "__main__":
    key = jax.random.PRNGKey(0)
    ks = jax.random.split(key, 9)
    B, F = 2, 8            # gamma: (B, 2F)
    C, H, W = 2, 16, 16    # radiation: (B, 2C, H, W)

    gp_mag = jax.random.uniform(ks[0], (B, F), minval=0.05, maxval=1.0)
    gp_ph = jax.random.uniform(ks[1], (B, F), minval=-jnp.pi, maxval=jnp.pi)
    gamma_pred = jnp.concatenate([gp_mag, gp_ph], axis=1)

    gt_mag = jax.random.uniform(ks[2], (B, F), minval=-20.0, maxval=0.0)   # dB
    gt_ph = jax.random.uniform(ks[3], (B, F), minval=-jnp.pi, maxval=jnp.pi)
    gamma_target = jnp.concatenate([gt_mag, gt_ph], axis=1)

    rp_mag = jax.random.uniform(ks[4], (B, C, H, W), minval=-15.0, maxval=5.0)  # dB
    rp_ph = jax.random.uniform(ks[5], (B, C, H, W), minval=-jnp.pi, maxval=jnp.pi)
    radiation_pred = jnp.concatenate([rp_mag, rp_ph], axis=1)

    rt_mag = jax.random.uniform(ks[6], (B, C, H, W), minval=-15.0, maxval=5.0)
    rt_ph = jax.random.uniform(ks[7], (B, C, H, W), minval=-jnp.pi, maxval=jnp.pi)
    radiation_target = jnp.concatenate([rt_mag, rt_ph], axis=1)

    ant_pred = jax.random.normal(ks[8], (B, 1, 16, 16), dtype=jnp.float32)

    loss, ant_loss = jax.jit(gamma_rad_loss)(
        gamma_pred, gamma_target, radiation_pred, radiation_target, ant_pred)
    loss = jax.block_until_ready(loss)
    ant_loss = jax.block_until_ready(ant_loss)

    expected = ref_loss(gamma_pred, gamma_target, radiation_pred, radiation_target, ant_pred)
    assert jnp.isfinite(loss)
    assert jnp.isfinite(ant_loss)
    assert jnp.allclose(loss, expected, rtol=1e-4, atol=1e-5), (loss, expected)
    assert jnp.allclose(ant_loss, jnp.mean(jnp.abs(ant_pred)), rtol=1e-5, atol=1e-6)
    print("KERNEL_OK")
</pallas_src>

<mosaic_0001>
module attributes {stable_mosaic.version = 11 : i64} {
  func.func @_fused_loss_kernel(%arg0: i32, %arg1: memref<2x8xf32, #tpu.memory_space<vmem>>, %arg2: memref<2x8xf32, #tpu.memory_space<vmem>>, %arg3: memref<2x8xf32, #tpu.memory_space<vmem>>, %arg4: memref<2x8xf32, #tpu.memory_space<vmem>>, %arg5: memref<2x256xf32, #tpu.memory_space<vmem>>, %arg6: memref<2x4x16x16xf32, #tpu.memory_space<vmem>>, %arg7: memref<2x4x16x16xf32, #tpu.memory_space<vmem>>, %arg8: memref<1x8x128xf32, #tpu.memory_space<vmem>>) attributes {dimension_semantics = [#tpu.dimension_semantics<parallel>], iteration_bounds = array<i64: 1>, scalar_prefetch = 0 : i64, scratch_operands = 0 : i64, tpu.core_type = #tpu.core_type<tc>, window_params = [{pipeline_mode = #tpu.pipeline_mode<synchronous>, transform_indices = @transform_0, window_bounds = array<i64: 2, 8>}, {pipeline_mode = #tpu.pipeline_mode<synchronous>, transform_indices = @transform_1, window_bounds = array<i64: 2, 8>}, {pipeline_mode = #tpu.pipeline_mode<synchronous>, transform_indices = @transform_2, window_bounds = array<i64: 2, 8>}, {pipeline_mode = #tpu.pipeline_mode<synchronous>, transform_indices = @transform_3, window_bounds = array<i64: 2, 8>}, {pipeline_mode = #tpu.pipeline_mode<synchronous>, transform_indices = @transform_4, window_bounds = array<i64: 2, 256>}, {transform_indices = @transform_5, window_bounds = array<i64: 2, 4, 16, 16>}, {transform_indices = @transform_6, window_bounds = array<i64: 2, 4, 16, 16>}, {transform_indices = @transform_7, window_bounds = array<i64: 1, 8, 128>}]} {
    %c0 = arith.constant 0 : index
    %c0_0 = arith.constant 0 : index
    %c0_1 = arith.constant 0 : index
    %c0_2 = arith.constant 0 : index
    %0 = vector.load %arg6[%c0, %c0_0, %c0_1, %c0_2] : memref<2x4x16x16xf32, #tpu.memory_space<vmem>>, vector<2x4x16x16xf32>
    %c0_3 = arith.constant 0 : index
    %c0_4 = arith.constant 0 : index
    %c0_5 = arith.constant 0 : index
    %c0_6 = arith.constant 0 : index
    %1 = vector.load %arg7[%c0_3, %c0_4, %c0_5, %c0_6] : memref<2x4x16x16xf32, #tpu.memory_space<vmem>>, vector<2x4x16x16xf32>
    %2 = vector.extract_strided_slice %0 {offsets = [0, 0, 0, 0], sizes = [2, 2, 16, 16], strides = [1, 1, 1, 1]} : vector<2x4x16x16xf32> to vector<2x2x16x16xf32>
    %3 = vector.extract_strided_slice %0 {offsets = [0, 2, 0, 0], sizes = [2, 2, 16, 16], strides = [1, 1, 1, 1]} : vector<2x4x16x16xf32> to vector<2x2x16x16xf32>
    %4 = vector.extract_strided_slice %1 {offsets = [0, 0, 0, 0], sizes = [2, 2, 16, 16], strides = [1, 1, 1, 1]} : vector<2x4x16x16xf32> to vector<2x2x16x16xf32>
    %5 = vector.extract_strided_slice %1 {offsets = [0, 2, 0, 0], sizes = [2, 2, 16, 16], strides = [1, 1, 1, 1]} : vector<2x4x16x16xf32> to vector<2x2x16x16xf32>
    %6 = arith.subf %2, %4 : vector<2x2x16x16xf32>
    %7 = math.absf %6 : vector<2x2x16x16xf32>
    %cst = arith.constant 1.000000e+00 : f32
    %8 = vector.broadcast %cst : f32 to vector<2x2x16x16xf32>
    %9 = arith.cmpf olt, %7, %8 : vector<2x2x16x16xf32>
    %cst_7 = arith.constant 5.000000e-01 : f32
    %10 = vector.broadcast %cst_7 : f32 to vector<2x2x16x16xf32>
    %11 = arith.mulf %10, %6 : vector<2x2x16x16xf32>
    %12 = arith.mulf %11, %6 : vector<2x2x16x16xf32>
    %cst_8 = arith.constant 5.000000e-01 : f32
    %13 = vector.broadcast %cst_8 : f32 to vector<2x2x16x16xf32>
    %14 = arith.subf %7, %13 : vector<2x2x16x16xf32>
    %cst_9 = arith.constant 1.000000e+00 : f32
    %15 = vector.broadcast %cst_9 : f32 to vector<2x2x16x16xf32>
    %16 = arith.mulf %15, %14 : vector<2x2x16x16xf32>
    %17 = arith.select %9, %12, %16 : vector<2x2x16x16xi1>, vector<2x2x16x16xf32>
    %18 = vector.shape_cast %17 : vector<2x2x16x16xf32> to vector<1x2x2x16x16xf32>
    %cst_10 = arith.constant dense<0.000000e+00> : vector<1xf32>
    %19 = vector.multi_reduction <add>, %18, %cst_10 [1, 2, 3, 4] : vector<1x2x2x16x16xf32> to vector<1xf32>
    %20 = vector.shape_cast %19 : vector<1xf32> to vector<1x1x1x1x1xf32>
    %21 = vector.extract %20[0, 0, 0, 0, 0] : f32 from vector<1x1x1x1x1xf32>
    %22 = math.cos %3 : vector<2x2x16x16xf32>
    %23 = math.sin %3 : vector<2x2x16x16xf32>
    %24 = math.cos %5 : vector<2x2x16x16xf32>
    %25 = math.sin %5 : vector<2x2x16x16xf32>
    %26 = arith.mulf %22, %24 : vector<2x2x16x16xf32>
    %27 = arith.mulf %23, %25 : vector<2x2x16x16xf32>
    %28 = arith.addf %26, %27 : vector<2x2x16x16xf32>
    %cst_11 = arith.constant 1.000000e+00 : f32
    %29 = vector.broadcast %cst_11 : f32 to vector<2x2x16x16xf32>
    %30 = arith.subf %29, %28 : vector<2x2x16x16xf32>
    %31 = vector.shape_cast %30 : vector<2x2x16x16xf32> to vector<1x2x2x16x16xf32>
    %cst_12 = arith.constant dense<0.000000e+00> : vector<1xf32>
    %32 = vector.multi_reduction <add>, %31, %cst_12 [1, 2, 3, 4] : vector<1x2x2x16x16xf32> to vector<1xf32>
    %33 = vector.shape_cast %32 : vector<1xf32> to vector<1x1x1x1x1xf32>
    %34 = vector.extract %33[0, 0, 0, 0, 0] : f32 from vector<1x1x1x1x1xf32>
    %cst_13 = arith.constant 0.23025851 : f32
    %35 = vector.broadcast %cst_13 : f32 to vector<2x2x16x16xf32>
    %36 = arith.mulf %2, %35 : vector<2x2x16x16xf32>
    %37 = math.exp %36 : vector<2x2x16x16xf32>
    %cst_14 = arith.constant 0.23025851 : f32
    %38 = vector.broadcast %cst_14 : f32 to vector<2x2x16x16xf32>
    %39 = arith.mulf %4, %38 : vector<2x2x16x16xf32>
    %40 = math.exp %39 : vector<2x2x16x16xf32>
    %41 = arith.mulf %37, %22 : vector<2x2x16x16xf32>
    %42 = arith.mulf %40, %24 : vector<2x2x16x16xf32>
    %43 = arith.subf %41, %42 : vector<2x2x16x16xf32>
    %44 = arith.mulf %37, %23 : vector<2x2x16x16xf32>
    %45 = arith.mulf %40, %25 : vector<2x2x16x16xf32>
    %46 = arith.subf %44, %45 : vector<2x2x16x16xf32>
    %47 = arith.mulf %43, %43 : vector<2x2x16x16xf32>
    %48 = arith.mulf %46, %46 : vector<2x2x16x16xf32>
    %49 = arith.addf %47, %48 : vector<2x2x16x16xf32>
    %50 = math.sqrt %49 : vector<2x2x16x16xf32>
    %51 = vector.shape_cast %50 : vector<2x2x16x16xf32> to vector<1x2x2x16x16xf32>
    %cst_15 = arith.constant dense<0.000000e+00> : vector<1xf32>
    %52 = vector.multi_reduction <add>, %51, %cst_15 [1, 2, 3, 4] : vector<1x2x2x16x16xf32> to vector<1xf32>
    %53 = vector.shape_cast %52 : vector<1xf32> to vector<1x1x1x1x1xf32>
    %54 = vector.extract %53[0, 0, 0, 0, 0] : f32 from vector<1x1x1x1x1xf32>
    %c0_i32 = arith.constant 0 : i32
    %55 = arith.cmpi eq, %arg0, %c0_i32 : i32
    %56 = arith.extui %55 : i1 to i32
    %c0_i32_16 = arith.constant 0 : i32
    %57 = arith.cmpi ne, %56, %c0_i32_16 : i32
    scf.if %57 {
      %c0_19 = arith.constant 0 : index
      %c0_20 = arith.constant 0 : index
      %61 = vector.load %arg1[%c0_19, %c0_20] : memref<2x8xf32, #tpu.memory_space<vmem>>, vector<2x8xf32>
      %c0_21 = arith.constant 0 : index
      %c0_22 = arith.constant 0 : index
      %62 = vector.load %arg2[%c0_21, %c0_22] : memref<2x8xf32, #tpu.memory_space<vmem>>, vector<2x8xf32>
      %c0_23 = arith.constant 0 : index
      %c0_24 = arith.constant 0 : index
      %63 = vector.load %arg3[%c0_23, %c0_24] : memref<2x8xf32, #tpu.memory_space<vmem>>, vector<2x8xf32>
      %c0_25 = arith.constant 0 : index
      %c0_26 = arith.constant 0 : index
      %64 = vector.load %arg4[%c0_25, %c0_26] : memref<2x8xf32, #tpu.memory_space<vmem>>, vector<2x8xf32>
      %65 = math.log %61 : vector<2x8xf32>
      %cst_27 = arith.constant 8.68588924 : f32
      %66 = vector.broadcast %cst_27 : f32 to vector<2x8xf32>
      %67 = arith.mulf %66, %65 : vector<2x8xf32>
      %68 = arith.subf %67, %63 : vector<2x8xf32>
      %69 = math.absf %68 : vector<2x8xf32>
      %cst_28 = arith.constant 1.000000e+00 : f32
      %70 = vector.broadcast %cst_28 : f32 to vector<2x8xf32>
      %71 = arith.cmpf olt, %69, %70 : vector<2x8xf32>
      %cst_29 = arith.constant 5.000000e-01 : f32
      %72 = vector.broadcast %cst_29 : f32 to vector<2x8xf32>
      %73 = arith.mulf %72, %68 : vector<2x8xf32>
      %74 = arith.mulf %73, %68 : vector<2x8xf32>
      %cst_30 = arith.constant 5.000000e-01 : f32
      %75 = vector.broadcast %cst_30 : f32 to vector<2x8xf32>
      %76 = arith.subf %69, %75 : vector<2x8xf32>
      %cst_31 = arith.constant 1.000000e+00 : f32
      %77 = vector.broadcast %cst_31 : f32 to vector<2x8xf32>
      %78 = arith.mulf %77, %76 : vector<2x8xf32>
      %79 = arith.select %71, %74, %78 : vector<2x8xi1>, vector<2x8xf32>
      %80 = vector.shape_cast %79 : vector<2x8xf32> to vector<1x2x8xf32>
      %cst_32 = arith.constant dense<0.000000e+00> : vector<1xf32>
      %81 = vector.multi_reduction <add>, %80, %cst_32 [1, 2] : vector<1x2x8xf32> to vector<1xf32>
      %82 = vector.shape_cast %81 : vector<1xf32> to vector<1x1x1xf32>
      %83 = vector.extract %82[0, 0, 0] : f32 from vector<1x1x1xf32>
      %84 = math.cos %62 : vector<2x8xf32>
      %85 = math.sin %62 : vector<2x8xf32>
      %86 = math.cos %64 : vector<2x8xf32>
      %87 = math.sin %64 : vector<2x8xf32>
      %88 = arith.mulf %84, %86 : vector<2x8xf32>
      %89 = arith.mulf %85, %87 : vector<2x8xf32>
      %90 = arith.addf %88, %89 : vector<2x8xf32>
      %cst_33 = arith.constant 1.000000e+00 : f32
      %91 = vector.broadcast %cst_33 : f32 to vector<2x8xf32>
      %92 = arith.subf %91, %90 : vector<2x8xf32>
      %93 = vector.shape_cast %92 : vector<2x8xf32> to vector<1x2x8xf32>
      %cst_34 = arith.constant dense<0.000000e+00> : vector<1xf32>
      %94 = vector.multi_reduction <add>, %93, %cst_34 [1, 2] : vector<1x2x8xf32> to vector<1xf32>
      %95 = vector.shape_cast %94 : vector<1xf32> to vector<1x1x1xf32>
      %96 = vector.extract %95[0, 0, 0] : f32 from vector<1x1x1xf32>
      %cst_35 = arith.constant 0.115129255 : f32
      %97 = vector.broadcast %cst_35 : f32 to vector<2x8xf32>
      %98 = arith.mulf %63, %97 : vector<2x8xf32>
      %99 = math.exp %98 : vector<2x8xf32>
      %100 = arith.mulf %61, %84 : vector<2x8xf32>
      %101 = arith.mulf %99, %86 : vector<2x8xf32>
      %102 = arith.subf %100, %101 : vector<2x8xf32>
      %103 = arith.mulf %61, %85 : vector<2x8xf32>
      %104 = arith.mulf %99, %87 : vector<2x8xf32>
      %105 = arith.subf %103, %104 : vector<2x8xf32>
      %106 = arith.mulf %102, %102 : vector<2x8xf32>
      %107 = arith.mulf %105, %105 : vector<2x8xf32>
      %108 = arith.addf %106, %107 : vector<2x8xf32>
      %109 = math.sqrt %108 : vector<2x8xf32>
      %110 = vector.shape_cast %109 : vector<2x8xf32> to vector<1x2x8xf32>
      %cst_36 = arith.constant dense<0.000000e+00> : vector<1xf32>
      %111 = vector.multi_reduction <add>, %110, %cst_36 [1, 2] : vector<1x2x8xf32> to vector<1xf32>
      %112 = vector.shape_cast %111 : vector<1xf32> to vector<1x1x1xf32>
      %113 = vector.extract %112[0, 0, 0] : f32 from vector<1x1x1xf32>
      %c0_37 = arith.constant 0 : index
      %c0_38 = arith.constant 0 : index
      %114 = vector.load %arg5[%c0_37, %c0_38] : memref<2x256xf32, #tpu.memory_space<vmem>>, vector<2x256xf32>
      %115 = math.absf %114 : vector<2x256xf32>
      %116 = vector.shape_cast %115 : vector<2x256xf32> to vector<1x2x256xf32>
      %cst_39 = arith.constant dense<0.000000e+00> : vector<1xf32>
      %117 = vector.multi_reduction <add>, %116, %cst_39 [1, 2] : vector<1x2x256xf32> to vector<1xf32>
      %118 = vector.shape_cast %117 : vector<1xf32> to vector<1x1x1xf32>
      %119 = vector.extract %118[0, 0, 0] : f32 from vector<1x1x1xf32>
      %120 = tpu.iota {dimensions = array<i32: 0>} : vector<8x128xi32>
      %121 = tpu.iota {dimensions = array<i32: 1>} : vector<8x128xi32>
      %cst_40 = arith.constant 0.000000e+00 : f32
      %122 = vector.broadcast %cst_40 : f32 to vector<8x128xf32>
      %c0_i32_41 = arith.constant 0 : i32
      %123 = vector.broadcast %c0_i32_41 : i32 to vector<8x128xi32>
      %124 = arith.cmpi eq, %120, %123 : vector<8x128xi32>
      %c0_i32_42 = arith.constant 0 : i32
      %125 = vector.broadcast %c0_i32_42 : i32 to vector<8x128xi32>
      %126 = arith.cmpi eq, %121, %125 : vector<8x128xi32>
      %127 = arith.andi %124, %126 : vector<8x128xi1>
      %128 = vector.broadcast %21 : f32 to vector<8x128xf32>
      %129 = arith.select %127, %128, %122 : vector<8x128xi1>, vector<8x128xf32>
      %c0_i32_43 = arith.constant 0 : i32
      %130 = vector.broadcast %c0_i32_43 : i32 to vector<8x128xi32>
      %131 = arith.cmpi eq, %120, %130 : vector<8x128xi32>
      %c1_i32 = arith.constant 1 : i32
      %132 = vector.broadcast %c1_i32 : i32 to vector<8x128xi32>
      %133 = arith.cmpi eq, %121, %132 : vector<8x128xi32>
      %134 = arith.andi %131, %133 : vector<8x128xi1>
      %135 = vector.broadcast %34 : f32 to vector<8x128xf32>
      %136 = arith.select %134, %135, %129 : vector<8x128xi1>, vector<8x128xf32>
      %c0_i32_44 = arith.constant 0 : i32
      %137 = vector.broadcast %c0_i32_44 : i32 to vector<8x128xi32>
      %138 = arith.cmpi eq, %120, %137 : vector<8x128xi32>
      %c2_i32 = arith.constant 2 : i32
      %139 = vector.broadcast %c2_i32 : i32 to vector<8x128xi32>
      %140 = arith.cmpi eq, %121, %139 : vector<8x128xi32>
      %141 = arith.andi %138, %140 : vector<8x128xi1>
      %142 = vector.broadcast %54 : f32 to vector<8x128xf32>
      %143 = arith.select %141, %142, %136 : vector<8x128xi1>, vector<8x128xf32>
      %c0_i32_45 = arith.constant 0 : i32
      %144 = vector.broadcast %c0_i32_45 : i32 to vector<8x128xi32>
      %145 = arith.cmpi eq, %120, %144 : vector<8x128xi32>
      %c3_i32 = arith.constant 3 : i32
      %146 = vector.broadcast %c3_i32 : i32 to vector<8x128xi32>
      %147 = arith.cmpi eq, %121, %146 : vector<8x128xi32>
      %148 = arith.andi %145, %147 : vector<8x128xi1>
      %149 = vector.broadcast %83 : f32 to vector<8x128xf32>
      %150 = arith.select %148, %149, %143 : vector<8x128xi1>, vector<8x128xf32>
      %c0_i32_46 = arith.constant 0 : i32
      %151 = vector.broadcast %c0_i32_46 : i32 to vector<8x128xi32>
      %152 = arith.cmpi eq, %120, %151 : vector<8x128xi32>
      %c4_i32 = arith.constant 4 : i32
      %153 = vector.broadcast %c4_i32 : i32 to vector<8x128xi32>
      %154 = arith.cmpi eq, %121, %153 : vector<8x128xi32>
      %155 = arith.andi %152, %154 : vector<8x128xi1>
      %156 = vector.broadcast %96 : f32 to vector<8x128xf32>
      %157 = arith.select %155, %156, %150 : vector<8x128xi1>, vector<8x128xf32>
      %c0_i32_47 = arith.constant 0 : i32
      %158 = vector.broadcast %c0_i32_47 : i32 to vector<8x128xi32>
      %159 = arith.cmpi eq, %120, %158 : vector<8x128xi32>
      %c5_i32 = arith.constant 5 : i32
      %160 = vector.broadcast %c5_i32 : i32 to vector<8x128xi32>
      %161 = arith.cmpi eq, %121, %160 : vector<8x128xi32>
      %162 = arith.andi %159, %161 : vector<8x128xi1>
      %163 = vector.broadcast %113 : f32 to vector<8x128xf32>
      %164 = arith.select %162, %163, %157 : vector<8x128xi1>, vector<8x128xf32>
      %c0_i32_48 = arith.constant 0 : i32
      %165 = vector.broadcast %c0_i32_48 : i32 to vector<8x128xi32>
      %166 = arith.cmpi eq, %120, %165 : vector<8x128xi32>
      %c6_i32 = arith.constant 6 : i32
      %167 = vector.broadcast %c6_i32 : i32 to vector<8x128xi32>
      %168 = arith.cmpi eq, %121, %167 : vector<8x128xi32>
      %169 = arith.andi %166, %168 : vector<8x128xi1>
      %170 = vector.broadcast %119 : f32 to vector<8x128xf32>
      %171 = arith.select %169, %170, %164 : vector<8x128xi1>, vector<8x128xf32>
      %172 = vector.shape_cast %171 : vector<8x128xf32> to vector<1x8x128xf32>
      %c0_49 = arith.constant 0 : index
      %c0_50 = arith.constant 0 : index
      %c0_51 = arith.constant 0 : index
      %173 = vector.load %arg8[%c0_49, %c0_50, %c0_51] : memref<1x8x128xf32, #tpu.memory_space<vmem>>, vector<1x8x128xf32>
      tpu.vector_store %arg8[%c0_49, %c0_50, %c0_51], %172 {strides = array<i32>} : memref<1x8x128xf32, #tpu.memory_space<vmem>>, vector<1x8x128xf32>,
    } else {
    }
    %c0_i32_17 = arith.constant 0 : i32
    %58 = arith.cmpi ne, %arg0, %c0_i32_17 : i32
    %59 = arith.extui %58 : i1 to i32
    %c0_i32_18 = arith.constant 0 : i32
    %60 = arith.cmpi ne, %59, %c0_i32_18 : i32
    scf.if %60 {
      %61 = tpu.iota {dimensions = array<i32: 0>} : vector<8x128xi32>
      %62 = tpu.iota {dimensions = array<i32: 1>} : vector<8x128xi32>
      %cst_19 = arith.constant 0.000000e+00 : f32
      %63 = vector.broadcast %cst_19 : f32 to vector<8x128xf32>
      %c0_i32_20 = arith.constant 0 : i32
      %64 = vector.broadcast %c0_i32_20 : i32 to vector<8x128xi32>
      %65 = arith.cmpi eq, %61, %64 : vector<8x128xi32>
      %c0_i32_21 = arith.constant 0 : i32
      %66 = vector.broadcast %c0_i32_21 : i32 to vector<8x128xi32>
      %67 = arith.cmpi eq, %62, %66 : vector<8x128xi32>
      %68 = arith.andi %65, %67 : vector<8x128xi1>
      %69 = vector.broadcast %21 : f32 to vector<8x128xf32>
      %70 = arith.select %68, %69, %63 : vector<8x128xi1>, vector<8x128xf32>
      %c0_i32_22 = arith.constant 0 : i32
      %71 = vector.broadcast %c0_i32_22 : i32 to vector<8x128xi32>
      %72 = arith.cmpi eq, %61, %71 : vector<8x128xi32>
      %c1_i32 = arith.constant 1 : i32
      %73 = vector.broadcast %c1_i32 : i32 to vector<8x128xi32>
      %74 = arith.cmpi eq, %62, %73 : vector<8x128xi32>
      %75 = arith.andi %72, %74 : vector<8x128xi1>
      %76 = vector.broadcast %34 : f32 to vector<8x128xf32>
      %77 = arith.select %75, %76, %70 : vector<8x128xi1>, vector<8x128xf32>
      %c0_i32_23 = arith.constant 0 : i32
      %78 = vector.broadcast %c0_i32_23 : i32 to vector<8x128xi32>
      %79 = arith.cmpi eq, %61, %78 : vector<8x128xi32>
      %c2_i32 = arith.constant 2 : i32
      %80 = vector.broadcast %c2_i32 : i32 to vector<8x128xi32>
      %81 = arith.cmpi eq, %62, %80 : vector<8x128xi32>
      %82 = arith.andi %79, %81 : vector<8x128xi1>
      %83 = vector.broadcast %54 : f32 to vector<8x128xf32>
      %84 = arith.select %82, %83, %77 : vector<8x128xi1>, vector<8x128xf32>
      %85 = vector.shape_cast %84 : vector<8x128xf32> to vector<1x8x128xf32>
      %c0_24 = arith.constant 0 : index
      %c0_25 = arith.constant 0 : index
      %c0_26 = arith.constant 0 : index
      %86 = vector.load %arg8[%c0_24, %c0_25, %c0_26] : memref<1x8x128xf32, #tpu.memory_space<vmem>>, vector<1x8x128xf32>
      tpu.vector_store %arg8[%c0_24, %c0_25, %c0_26], %85 {strides = array<i32>} : memref<1x8x128xf32, #tpu.memory_space<vmem>>, vector<1x8x128xf32>,
    } else {
    }
    return
  }
  func.func @transform_0(%arg0: i32) -> (i32, i32) {
    %c0_i32 = arith.constant 0 : i32
    %c0_i32_0 = arith.constant 0 : i32
    %c0_i32_1 = arith.constant 0 : i32
    return %c0_i32, %c0_i32_0 : i32, i32
  }
  func.func @transform_1(%arg0: i32) -> (i32, i32) {
    %c0_i32 = arith.constant 0 : i32
    %c0_i32_0 = arith.constant 0 : i32
    %c0_i32_1 = arith.constant 0 : i32
    return %c0_i32, %c0_i32_0 : i32, i32
  }
  func.func @transform_2(%arg0: i32) -> (i32, i32) {
    %c0_i32 = arith.constant 0 : i32
    %c0_i32_0 = arith.constant 0 : i32
    %c0_i32_1 = arith.constant 0 : i32
    return %c0_i32, %c0_i32_0 : i32, i32
  }
  func.func @transform_3(%arg0: i32) -> (i32, i32) {
    %c0_i32 = arith.constant 0 : i32
    %c0_i32_0 = arith.constant 0 : i32
    %c0_i32_1 = arith.constant 0 : i32
    return %c0_i32, %c0_i32_0 : i32, i32
  }
  func.func @transform_4(%arg0: i32) -> (i32, i32) {
    %c0_i32 = arith.constant 0 : i32
    %c0_i32_0 = arith.constant 0 : i32
    %c0_i32_1 = arith.constant 0 : i32
    return %c0_i32, %c0_i32_0 : i32, i32
  }
  func.func @transform_5(%arg0: i32) -> (i32, i32, i32, i32) {
    %c0_i32 = arith.constant 0 : i32
    %c0_i32_0 = arith.constant 0 : i32
    %c0_i32_1 = arith.constant 0 : i32
    %c0_i32_2 = arith.constant 0 : i32
    return %arg0, %c0_i32, %c0_i32_0, %c0_i32_1 : i32, i32, i32, i32
  }
  func.func @transform_6(%arg0: i32) -> (i32, i32, i32, i32) {
    %c0_i32 = arith.constant 0 : i32
    %c0_i32_0 = arith.constant 0 : i32
    %c0_i32_1 = arith.constant 0 : i32
    %c0_i32_2 = arith.constant 0 : i32
    return %arg0, %c0_i32, %c0_i32_0, %c0_i32_1 : i32, i32, i32, i32
  }
  func.func @transform_7(%arg0: i32) -> (i32, i32, i32) {
    %c0_i32 = arith.constant 0 : i32
    %c0_i32_0 = arith.constant 0 : i32
    %c0_i32_1 = arith.constant 0 : i32
    return %arg0, %c0_i32, %c0_i32_0 : i32, i32, i32
  }
}

</mosaic_0001>

<bundles_post_ra>
// kernel: gamma_rad_loss.1
= control target key start
LH: loop header
LB: loop body
LE: loop exit
PB: predicated region body
PF: predicated region fallthrough
CT: control target
= control target key end

     0   :  { %12 = vsyncpa [#allocation3], 0  ;;  %s9864_s0 = inlined_call_operand.vmem [shape: f32[2,8], index: 0, kind: input, shape index: {}]   ;;  %s9865_s1 = inlined_call_operand.vmem [shape: f32[2,8], index: 1, kind: input, shape index: {}]   ;;  %s9866_s2 = inlined_call_operand.vmem [shape: f32[2,8], index: 2, kind: input, shape index: {}]   ;;  %s9867_s3 = inlined_call_operand.vmem [shape: f32[2,8], index: 3, kind: input, shape index: {}]   ;;  %s9868_s4 = inlined_call_operand.vmem [shape: f32[2,256], index: 4, kind: input, shape index: {}]   ;;  %s9869_s5 = inlined_call_operand.hbm [shape: f32[2,4,16,16], index: 5, kind: input, shape index: {}]   ;;  %s9870_s6 = inlined_call_operand.hbm [shape: f32[2,4,16,16], index: 6, kind: input, shape index: {}]   ;;  %s9871_s7 = inlined_call_operand.vmem [shape: f32[1,8,128], index: 7, kind: output, shape index: {}]  }
   0x1   :  { %s28_s26 = sshll.u32 %s9869_s5, 4  ;;  %s29_s26 = int_to_ptr.hbm [resolvable:$true] %s28_s26 }
   0x2   :  { %13 = vsyncpa [#allocation5], 0  ;;  %s6470_s27 = smov [#allocation2]   ;;  %s41_s8 = sshll.u32 %s9870_s6, 4  ;;  %s42_s8 = int_to_ptr.hbm [resolvable:$true] %s41_s8 }
   0x3   :  { %s30_s28 = sshll.u32 %s6470_s27, 4  ;;  %s6471_s9 = smov 128   ;;  %s31_s28 = int_to_ptr.vmem [resolvable:$true] %s30_s28 }
   0x4   :  { %s6472_s10 = smov 8   ;;  %s6473_s11 = smov [#allocation4]  }
   0x5   :  { %36 = dma.hbm_to_vmem [thread:$0]  %s29_s26, 2048, %s31_s28, [#allocation3], %s6471_s9, %s6471_s9, %s6472_s10  }
   0x6   :  { %s43_s12 = sshll.u32 %s6473_s11, 4  ;;  %s44_s12 = int_to_ptr.vmem [resolvable:$true] %s43_s12 }
   0x7   :  { %49 = dma.hbm_to_vmem [thread:$0]  %s42_s8, 2048, %s44_s12, [#allocation5], %s6471_s9, %s6471_s9, %s6472_s10  }
   0x8   :  { %6466 = dma.done.wait [#allocation3], 2048  }
   0x9   :  { %6467 = vsyncadd [#allocation3], 4294965248 }
   0xa   :  { %6468 = dma.done.wait [#allocation5], 2048  }
   0xb   :  { %6469 = vsyncadd [#allocation5], 4294965248  ;;  %v58_v0 = vld [vmem:[#allocation2] sm:$0xff]  ;;  %v59_v1 = vld [vmem:[#allocation2 + $0x8] sm:$0xff]  ;;  %vm9924_vm0 = vcmask 130048  }
   0xc   :  { %v60_v2 = vld [vmem:[#allocation2 + $0x10] sm:$0xff]  ;;  %v74_v3 = vld [vmem:[#allocation4] sm:$0xff]  ;;  %v61_v4 = vld [vmem:[#allocation2 + $0x18] sm:$0xff] }
   0xd   :  { %v66_v5 = vld [vmem:[#allocation2 + $0x40] sm:$0xff]  ;;  %v75_v6 = vld [vmem:[#allocation4 + $0x8] sm:$0xff]  ;;  %v90_v7 = vsub.f32 %v58_v0, %v74_v3  ;;  %v76_v8 = vld [vmem:[#allocation4 + $0x10] sm:$0xff] }
   0xe   :  { %v77_v9 = vld [vmem:[#allocation4 + $0x18] sm:$0xff]  ;;  %v82_v10 = vld [vmem:[#allocation4 + $0x40] sm:$0xff]  ;;  %v91_v11 = vsub.f32 %v59_v1, %v75_v6  ;;  %v67_v12 = vld [vmem:[#allocation2 + $0x48] sm:$0xff]  ;;  %v92_v14 = vsub.f32 %v60_v2, %v76_v8 }
   0xf   :  { %v83_v13 = vld [vmem:[#allocation4 + $0x48] sm:$0xff]  ;;  %v93_v15 = vsub.f32 %v61_v4, %v77_v9  ;;  %v94_v16 = vsub.f32 %v66_v5, %v82_v10  ;;  %v68_v17 = vld [vmem:[#allocation2 + $0x50] sm:$0xff]  ;;  %v98_v21 = vand.u32 2147483647, %v90_v7  ;;  %v69_v22 = vld [vmem:[#allocation2 + $0x58] sm:$0xff]  ;;  %v114_v30 = vmul.f32 0.5, %v90_v7 }
  0x10   :  { %v84_v18 = vld [vmem:[#allocation4 + $0x50] sm:$0xff]  ;;  %v95_v19 = vsub.f32 %v67_v12, %v83_v13  ;;  %v85_v23 = vld [vmem:[#allocation4 + $0x58] sm:$0xff]  ;;  %v99_v24 = vand.u32 2147483647, %v91_v11  ;;  %v100_v26 = vand.u32 2147483647, %v92_v14 }
  0x11   :  { %v96_v20 = vsub.f32 %v68_v17, %v84_v18  ;;  %v97_v25 = vsub.f32 %v69_v22, %v85_v23  ;;  %v101_v27 = vand.u32 2147483647, %v93_v15  ;;  %v102_v28 = vand.u32 2147483647, %v94_v16  ;;  %v6562_v1 = vld [vmem:[#allocation2 + $0x20] sm:$0xff]  ;;  %v6566_v6 = vld [vmem:[#allocation2 + $0x28] sm:$0xff] }
  0x12   :  { %v103_v29 = vand.u32 2147483647, %v95_v19  ;;  %v115_v31 = vmul.f32 0.5, %v91_v11  ;;  %v116_v32 = vmul.f32 0.5, %v92_v14  ;;  %vm6527_vm1 = vcmp.lt.f32.partialorder %v98_v21, 1.0 }
  0x13   :  { %v104_v33 = vand.u32 2147483647, %v96_v20  ;;  %v117_v35 = vmul.f32 0.5, %v93_v15  ;;  %v118_v36 = vmul.f32 0.5, %v94_v16  ;;  %vm6531_vm2 = vcmp.lt.f32.partialorder %v99_v24, 1.0 }
  0x14   :  { %v122_v38 = vmul.f32 %v114_v30, %v90_v7  ;;  %v123_v39 = vmul.f32 %v115_v31, %v91_v11  ;;  %v124_v40 = vmul.f32 %v116_v32, %v92_v14  ;;  %vm6535_vm3 = vcmp.lt.f32.partialorder %v100_v26, 1.0 }
  0x15   :  { %vm6539_vm4 = vcmp.lt.f32.partialorder %v101_v27, 1.0  ;;  %v119_v43 = vmul.f32 0.5, %v95_v19  ;;  %v125_v44 = vmul.f32 %v117_v35, %v93_v15  ;;  %vm6543_vm5 = vcmp.lt.f32.partialorder %v102_v28, 1.0 }
  0x16   :  { %v6189_v46 = vadd.f32 -0.5, %v98_v21  ;;  %v6190_v47 = vadd.f32 -0.5, %v99_v24  ;;  %v6191_v48 = vadd.f32 -0.5, %v100_v26  ;;  %v120_v49 = vmul.f32 0.5, %v96_v20  ;;  %v6587_v21 = vld [vmem:[#allocation2 + $0x30] sm:$0xff] }
  0x17   :  { %v126_v50 = vmul.f32 %v118_v36, %v94_v16  ;;  %v6192_v51 = vadd.f32 -0.5, %v101_v27  ;;  %v6193_v52 = vadd.f32 -0.5, %v102_v28  ;;  %v121_v53 = vmul.f32 0.5, %v97_v25 }
  0x18   :  { %v138_v54 = vsel %vm6527_vm1, %v122_v38, %v6189_v46  ;;  %v139_v55 = vsel %vm6531_vm2, %v123_v39, %v6190_v47  ;;  %v140_v56 = vsel %vm6535_vm3, %v124_v40, %v6191_v48  ;;  %v105_v57 = vand.u32 2147483647, %v97_v25 }
  0x19   :  { %v127_v58 = vmul.f32 %v119_v43, %v95_v19  ;;  %v6194_v59 = vadd.f32 -0.5, %v103_v29  ;;  %v141_v60 = vsel %vm6539_vm4, %v125_v44, %v6192_v51  ;;  %vm6555_vm6 = vcmp.lt.f32.partialorder %v103_v29, 1.0 }
  0x1a   :  { %v147_v62 = vsel %vm9924_vm0, %v138_v54, 0.0  ;;  %v148_v63 = vsel %vm9924_vm0, %v139_v55, 0.0  ;;  %v150_v0 = vsel %vm9924_vm0, %v140_v56, 0.0  ;;  %v128_v2 = vmul.f32 %v120_v49, %v96_v20 }
  0x1b   :  { %v6195_v3 = vadd.f32 -0.5, %v104_v33  ;;  %v142_v4 = vsel %vm6543_vm5, %v126_v50, %v6193_v52  ;;  %v149_v5 = vadd.f32 %v148_v63, %v147_v62  ;;  %vm6568_vm7 = vcmp.lt.f32.partialorder %v104_v33, 1.0 }
  0x1c   :  { %v129_v8 = vmul.f32 %v121_v53, %v97_v25  ;;  %v152_v9 = vsel %vm9924_vm0, %v141_v60, 0.0  ;;  %v171_v10 = vand.u32 2147483647, %v6562_v1  ;;  %v6196_v11 = vadd.f32 -0.5, %v105_v57 }
  0x1d   :  { %v143_v12 = vsel %vm6555_vm6, %v127_v58, %v6194_v59  ;;  %v151_v13 = vadd.f32 %v150_v0, %v149_v5  ;;  %v174_v14 = vand.u32 2139095040, %v6562_v1  ;;  %vm6577_vm8 = vcmp.lt.f32.partialorder %v105_v57, 1.0 }
  0x1e   :  { %v154_v16 = vsel %vm9924_vm0, %v142_v4, 0.0  ;;  %v178_v17 = vand.u32 8388607, %v171_v10  ;;  %v328_v18 = vand.u32 2139095040, %v6566_v6  ;;  %v144_v19 = vsel %vm6568_vm7, %v128_v2, %v6195_v3 }
  0x1f   :  { %v153_v20 = vadd.f32 %v152_v9, %v151_v13  ;;  %v175_v22 = vshrl.u32 %v174_v14, 23  ;;  %v325_v23 = vand.u32 2147483647, %v6566_v6  ;;  %v156_v24 = vsel %vm9924_vm0, %v143_v12, 0.0 }
  0x20   :  { %v179_v25 = vor.u32 8388608, %v178_v17  ;;  %v329_v26 = vshrl.u32 %v328_v18, 23  ;;  %v145_v27 = vsel %vm6577_vm8, %v129_v8, %v6196_v11  ;;  %v158_v30 = vsel %vm9924_vm0, %v144_v19, 0.0 }
  0x21   :  { %v155_v28 = vadd.f32 %v154_v16, %v153_v20  ;;  %v6197_v29 = vadd.s32 4294967169, %v175_v22  ;;  %v482_v32 = vand.u32 2139095040, %v6587_v21  ;;  %v332_v35 = vand.u32 8388607, %v325_v23 }
  0x22   :  { %v6200_v31 = vadd.s32 4294967169, %v329_v26  ;;  %v160_v36 = vsel %vm9924_vm0, %v145_v27, 0.0  ;;  %v6598_v37 = vshll.u32 %v179_v25, 8  ;;  %v9890_v50 = vmov 683565275  }
  0x23   :  { %v157_v33 = vadd.f32 %v156_v24, %v155_v28  ;;  %v181_v34 = vadd.s32 1, %v6197_v29  ;;  %v483_v41 = vshrl.u32 %v482_v32, 23  ;;  %v333_v44 = vor.u32 8388608, %v332_v35 }
  0x24   :  { %v335_v38 = vadd.s32 1, %v6200_v31  ;;  %v6603_v47 = vand.u32 65535, %v6598_v37  ;;  %v9887_v52 = vmov 2475754826   ;;  %v9882_v54 = vmov 2131351028  }
  0x25   :  { %v159_v39 = vadd.f32 %v158_v30, %v157_v33  ;;  %vm182_vm9 = vcmp.gt.s32.totalorder %v181_v34, 0  ;;  %v9885_v56 = vmov 2102212464   ;;  %v9879_v58 = vmov 920167782  }
  0x26   :  { %v183_v40 = vsel %vm182_vm9, %v181_v34, 0  ;;  %vm336_vm10 = vcmp.gt.s32.totalorder %v335_v38, 0  ;;  %v221_v60 = vshrl.u32 %v6598_v37, 16  ;;  %v6613_v61 = vadd.s32 4294967169, %v483_v41 }
  0x27   :  { %v161_v42 = vadd.f32 %v160_v36, %v159_v39  ;;  %v185_v43 = vand.u32 31, %v183_v40  ;;  %v337_v45 = vsel %vm336_vm10, %v335_v38, 0  ;;  %v6600_v46 = vshrl.u32 %v183_v40, 5 }
  0x28   :  { %v6605_v48 = vand.u32 31, %v337_v45  ;;  %v6618_v2 = vshll.u32 %v333_v44, 8  ;;  %v9877_v4 = vmov 1326507024   ;;  %v6634_v17 = vshrl.u32 %v337_v45, 5 }
  0x29   :  { %162 = vadd.xlane.f32.xlu0 %v161_v42  ;;  %v186_v49 = vsub.s32 32, %v185_v43  ;;  %v188_v51 = vshll.u32 %v9890_v50, %v185_v43  ;;  %v191_v53 = vshll.u32 %v9887_v52, %v185_v43  ;;  %v194_v55 = vshll.u32 %v9882_v54, %v185_v43 }
  0x2a   :  { %v197_v57 = vshll.u32 %v9885_v56, %v185_v43  ;;  %v200_v59 = vshll.u32 %v9879_v58, %v185_v43  ;;  %vm203_vm11 = vcmp.lt.s32.totalorder %v6600_v46, 1  ;;  %vm206_vm12 = vcmp.lt.s32.totalorder %v6600_v46, 4 }
  0x2b   :  { %v189_v62 = vshrl.u32 %v9887_v52, %v186_v49  ;;  %v192_v63 = vshrl.u32 %v9882_v54, %v186_v49  ;;  %v195_v0 = vshrl.u32 %v9885_v56, %v186_v49  ;;  %v198_v3 = vshrl.u32 %v9879_v58, %v186_v49 }
  0x2c   :  { %v201_v5 = vshrl.u32 %v9877_v4, %v186_v49  ;;  %v6625_v11 = vsub.s32 32, %v6605_v48  ;;  %v187_v12 = vshrl.u32 %v9890_v50, %v186_v49  ;;  %vm205_vm13 = vcmp.lt.s32.totalorder %v6600_v46, 3 }
  0x2d   :  { %v190_v7 = vor.u32 %v189_v62, %v188_v51  ;;  %v193_v8 = vor.u32 %v192_v63, %v191_v53  ;;  %v196_v9 = vor.u32 %v195_v0, %v194_v55  ;;  %v199_v13 = vor.u32 %v198_v3, %v197_v57 }
  0x2e   :  { %v202_v14 = vor.u32 %v201_v5, %v200_v59  ;;  %vm204_vm14 = vcmp.lt.s32.totalorder %v6600_v46, 2  ;;  %v342_v20 = vshll.u32 %v9890_v50, %v6605_v48  ;;  %v345_v22 = vshll.u32 %v9887_v52, %v6605_v48 }
  0x2f   :  { %v211_v15 = vsel %vm203_vm11, %v190_v7, %v193_v8  ;;  %v215_v16 = vsel %vm203_vm11, %v193_v8, %v196_v9  ;;  %v212_v18 = vsel %vm206_vm12, %v199_v13, 920167782  ;;  %v208_v24 = vsel %vm206_vm12, %v196_v9, 2102212464 }
  0x30   :  { %v216_v19 = vsel %vm206_vm12, %v202_v14, 1326507024  ;;  %v213_v25 = vsel %vm205_vm13, %v196_v9, %v212_v18  ;;  %v343_v27 = vshrl.u32 %v9887_v52, %v6625_v11  ;;  %v207_v28 = vsel %vm203_vm11, %v187_v12, %v190_v7 }
  0x31   :  { %v217_v26 = vsel %vm205_vm13, %v199_v13, %v216_v19  ;;  %v214_v29 = vsel %vm204_vm14, %v211_v15, %v213_v25  ;;  %v346_v31 = vshrl.u32 %v9882_v54, %v6625_v11  ;;  %v209_v36 = vsel %vm205_vm13, %v193_v8, %v208_v24 }
  0x32   :  { %v218_v30 = vsel %vm204_vm14, %v215_v16, %v217_v26  ;;  %v244_v34 = vand.u32 65535, %v214_v29  ;;  %v245_v35 = vshrl.u32 %v214_v29, 16  ;;  %v6662_v38 = vor.u32 %v343_v27, %v342_v20 }
  0x33   :  { %v222_v32 = vand.u32 65535, %v218_v30  ;;  %v223_v33 = vshrl.u32 %v218_v30, 16  ;;  %v6664_v39 = vor.u32 %v346_v31, %v345_v22  ;;  %v348_v40 = vshll.u32 %v9882_v54, %v6605_v48 }
  0x34   :  { %v349_v44 = vshrl.u32 %v9885_v56, %v6625_v11  ;;  %v246_v49 = vmul.u32 %v244_v34, %v6603_v47  ;;  %v247_v51 = vmul.u32 %v245_v35, %v6603_v47  ;;  %v248_v53 = vmul.u32 %v244_v34, %v221_v60 }
  0x35   :  { %v224_v41 = vmul.u32 %v222_v32, %v6603_v47  ;;  %v225_v42 = vmul.u32 %v223_v33, %v6603_v47  ;;  %v226_v43 = vmul.u32 %v222_v32, %v221_v60  ;;  %v227_v45 = vmul.u32 %v223_v33, %v221_v60 }
  0x36   :  { %v249_v62 = vmul.u32 %v245_v35, %v221_v60  ;;  %v250_v0 = vshll.u32 %v247_v51, 16  ;;  %v251_v3 = vshrl.u32 %v247_v51, 16  ;;  %v252_v5 = vshll.u32 %v248_v53, 16 }
  0x37   :  { %v228_v55 = vshll.u32 %v225_v42, 16  ;;  %v229_v57 = vshrl.u32 %v225_v42, 16  ;;  %v230_v59 = vshll.u32 %v226_v43, 16  ;;  %v231_v63 = vshrl.u32 %v226_v43, 16 }
  0x38   :  { %v253_v8 = vshrl.u32 %v248_v53, 16  ;;  %v351_v9 = vshll.u32 %v9885_v56, %v6605_v48  ;;  %v9896_v12 = vmov 0   ;;  %vm254_vm1 = vc.u32 %v246_v49, %v250_v0 }
  0x39   :  { %vm232_vm15 = vc.u32 %v224_v41, %v228_v55  ;;  %v234_v7 = vadd.s32 %v228_v55, %v224_v41  ;;  %v256_v47 = vadd.s32 %v250_v0, %v246_v49  ;;  %v352_v14 = vshrl.u32 %v9879_v58, %v6625_v11 }
  0x3a   :  { %v233_v13 = vsel %vm232_vm15, 1, %v9896_v12  ;;  %v255_v60 = vsel %vm254_vm1, 1, %v9896_v12  ;;  %v354_v16 = vshll.u32 %v9879_v58, %v6605_v48  ;;  %v6683_v20 = vor.u32 %v349_v44, %v348_v40 }
  0x3b   :  { %v235_v15 = vadd.s32 %v233_v13, %v227_v45  ;;  %vm236_vm2 = vc.u32 %v234_v7, %v230_v59  ;;  %v257_v19 = vadd.s32 %v255_v60, %v249_v62  ;;  %vm258_vm3 = vc.u32 %v256_v47, %v252_v5 }
  0x3c   :  { %v237_v18 = vsel %vm236_vm2, 1, %v9896_v12  ;;  %v259_v24 = vsel %vm258_vm3, 1, %v9896_v12  ;;  %v353_v25 = vor.u32 %v352_v14, %v351_v9  ;;  %v355_v26 = vshrl.u32 %v9877_v4, %v6625_v11 }
  0x3d   :  { %v239_v22 = vadd.s32 %v237_v18, %v235_v15  ;;  %v6688_v27 = vadd.s32 %v256_v47, %v252_v5  ;;  %v261_v29 = vadd.s32 %v259_v24, %v257_v19  ;;  %vm357_vm4 = vcmp.lt.s32.totalorder %v6634_v17, 1 }
  0x3e   :  { %vm359_vm5 = vcmp.lt.s32.totalorder %v6634_v17, 3  ;;  %v356_v30 = vor.u32 %v355_v26, %v354_v16  ;;  %vm358_vm6 = vcmp.lt.s32.totalorder %v6634_v17, 2  ;;  %vm360_vm7 = vcmp.lt.s32.totalorder %v6634_v17, 4 }
  0x3f   :  { %v240_v48 = vadd.s32 %v239_v22, %v229_v57  ;;  %v210_v31 = vsel %vm204_vm14, %v207_v28, %v209_v36  ;;  %v262_v32 = vadd.s32 %v261_v29, %v251_v3  ;;  %v365_v33 = vsel %vm357_vm4, %v6662_v38, %v6664_v39 }
  0x40   :  { %v366_v34 = vsel %vm360_vm7, %v353_v25, 920167782  ;;  %v369_v46 = vsel %vm357_vm4, %v6664_v39, %v6683_v20  ;;  %v374_v28 = vand.u32 65535, %v6618_v2  ;;  %v370_v42 = vsel %vm360_vm7, %v356_v30, 1326507024 }
  0x41   :  { %v6702_v35 = vadd.s32 %v240_v48, %v231_v63  ;;  %v367_v40 = vsel %vm359_vm5, %v6683_v20, %v366_v34  ;;  %v263_v36 = vadd.s32 %v262_v32, %v253_v8  ;;  %v375_v43 = vshrl.u32 %v6618_v2, 16 }
  0x42   :  { %v368_v41 = vsel %vm358_vm6, %v365_v33, %v367_v40  ;;  %v264_v44 = vmul.u32 %v6598_v37, %v210_v31  ;;  %v371_v45 = vsel %vm359_vm5, %v353_v25, %v370_v42  ;;  %v489_v3 = vadd.s32 1, %v6613_v61 }
  0x43   :  { %vm266_vm8 = vc.u32 %v6702_v35, %v6688_v27  ;;  %v398_v49 = vand.u32 65535, %v368_v41  ;;  %v267_v51 = vadd.s32 1, %v263_v36  ;;  %v372_v53 = vsel %vm358_vm6, %v369_v46, %v371_v45 }
  0x44   :  { %v399_v55 = vshrl.u32 %v368_v41, 16  ;;  %v376_v57 = vand.u32 65535, %v372_v53  ;;  %v377_v59 = vshrl.u32 %v372_v53, 16  ;;  %vm490_vm9 = vcmp.gt.s32.totalorder %v489_v3, 0 }
  0x45   :  { %v268_v62 = vsel %vm266_vm8, %v267_v51, %v263_v36  ;;  %v402_v0 = vmul.u32 %v398_v49, %v375_v43  ;;  %v400_v8 = vmul.u32 %v398_v49, %v374_v28  ;;  %v491_v26 = vsel %vm490_vm9, %v489_v3, 0 }
  0x46   :  { %v401_v63 = vmul.u32 %v399_v55, %v374_v28  ;;  %v269_v37 = vadd.s32 %v268_v62, %v264_v44  ;;  %v378_v5 = vmul.u32 %v376_v57, %v374_v28  ;;  %v379_v7 = vmul.u32 %v377_v59, %v374_v28 }
  0x47   :  { %v380_v9 = vmul.u32 %v376_v57, %v375_v43  ;;  %v403_v15 = vmul.u32 %v399_v55, %v375_v43  ;;  %v381_v60 = vmul.u32 %v377_v59, %v375_v43  ;;  %v406_v18 = vshll.u32 %v402_v0, 16 }
  0x48   :  { %v404_v13 = vshll.u32 %v401_v63, 16  ;;  %v270_v47 = vadd.s32 536870912, %v269_v37  ;;  %v382_v14 = vshll.u32 %v379_v7, 16  ;;  %v493_v32 = vand.u32 31, %v491_v26 }
  0x49   :  { %v384_v16 = vshll.u32 %v380_v9, 16  ;;  %v405_v34 = vshrl.u32 %v401_v63, 16  ;;  %v479_v46 = vand.u32 2147483647, %v6587_v21  ;;  %v341_v28 = vshrl.u32 %v9890_v50, %v6625_v11 }
  0x4a   :  { %vm386_vm10 = vc.u32 %v378_v5, %v382_v14  ;;  %v388_v19 = vadd.s32 %v382_v14, %v378_v5  ;;  %vm408_vm11 = vc.u32 %v400_v8, %v404_v13  ;;  %v410_v24 = vadd.s32 %v404_v13, %v400_v8 }
  0x4b   :  { %v387_v22 = vsel %vm386_vm10, 1, %v9896_v12  ;;  %v409_v61 = vsel %vm408_vm11, 1, %v9896_v12  ;;  %v6727_v25 = vshrl.u32 %v270_v47, 30  ;;  %v383_v36 = vshrl.u32 %v379_v7, 16 }
  0x4c   :  { %vm390_vm12 = vc.u32 %v388_v19, %v384_v16  ;;  %v389_v29 = vadd.s32 %v387_v22, %v381_v60  ;;  %v411_v48 = vadd.s32 %v409_v61, %v403_v15  ;;  %vm412_vm13 = vc.u32 %v410_v24, %v406_v18 }
  0x4d   :  { %v391_v30 = vsel %vm390_vm12, 1, %v9896_v12  ;;  %v413_v31 = vsel %vm412_vm13, 1, %v9896_v12  ;;  %v272_v33 = vshll.u32 %v6727_v25, 30  ;;  %v362_v42 = vsel %vm360_vm7, %v6683_v20, 2102212464 }
  0x4e   :  { %v415_v40 = vadd.s32 %v413_v31, %v411_v48  ;;  %v393_v41 = vadd.s32 %v391_v30, %v389_v29  ;;  %v6738_v43 = vsub.s32 32, %v493_v32  ;;  %v407_v45 = vshrl.u32 %v402_v0, 16 }
  0x4f   :  { %v6740_v44 = vsub.s32 %v269_v37, %v272_v33  ;;  %v486_v51 = vand.u32 8388607, %v479_v46  ;;  %v361_v53 = vsel %vm357_vm4, %v341_v28, %v6662_v38  ;;  %v363_v11 = vsel %vm359_vm5, %v6664_v39, %v362_v42 }
  0x50   :  { %v416_v49 = vadd.s32 %v415_v40, %v405_v34  ;;  %v385_v55 = vshrl.u32 %v380_v9, 16  ;;  %v394_v57 = vadd.s32 %v393_v41, %v383_v36  ;;  %v496_v20 = vshll.u32 %v9890_v50, %v493_v32 }
  0x51   :  { %v497_v59 = vshrl.u32 %v9887_v52, %v6738_v43  ;;  %v499_v62 = vshll.u32 %v9887_v52, %v493_v32  ;;  %v500_v63 = vshrl.u32 %v9882_v54, %v6738_v43  ;;  %v6756_v0 = vadd.s32 %v410_v24, %v406_v18 }
  0x52   :  { %v6758_v3 = vshrl.u32 %v491_v26, 5  ;;  %v505_v38 = vshll.u32 %v9885_v56, %v493_v32  ;;  %v506_v39 = vshrl.u32 %v9879_v58, %v6738_v43  ;;  %v275_v37 = vsub.s32 0, %v6740_v44 }
  0x53   :  { %v417_v5 = vadd.s32 %v416_v49, %v407_v45  ;;  %v502_v7 = vshll.u32 %v9882_v54, %v493_v32  ;;  %v503_v8 = vshrl.u32 %v9885_v56, %v6738_v43  ;;  %vm274_vm14 = vcmp.lt.s32.totalorder %v6740_v44, 0 }
  0x54   :  { %v6768_v9 = vadd.s32 %v394_v57, %v385_v55  ;;  %v508_v13 = vshll.u32 %v9879_v58, %v493_v32  ;;  %v509_v47 = vshrl.u32 %v9877_v4, %v6738_v43  ;;  %v487_v14 = vor.u32 8388608, %v486_v51 }
  0x55   :  { %v6773_v15 = vor.u32 %v497_v59, %v496_v20  ;;  %v6775_v60 = vor.u32 %v500_v63, %v499_v62  ;;  %v364_v16 = vsel %vm358_vm6, %v361_v53, %v363_v11  ;;  %v507_v18 = vor.u32 %v506_v39, %v505_v38 }
  0x56   :  { %vm511_vm15 = vcmp.lt.s32.totalorder %v6758_v3, 1  ;;  %v276_v19 = vsel %vm274_vm14, %v275_v37, %v6740_v44  ;;  %v421_v22 = vadd.s32 1, %v417_v5  ;;  %v6781_v61 = vor.u32 %v503_v8, %v502_v7 }
  0x57   :  { %vm514_vm1 = vcmp.lt.s32.totalorder %v6758_v3, 4  ;;  %vm420_vm2 = vc.u32 %v6768_v9, %v6756_v0  ;;  %v510_v24 = vor.u32 %v509_v47, %v508_v13  ;;  %vm513_vm3 = vcmp.lt.s32.totalorder %v6758_v3, 3 }
  0x58   :  { %vm512_vm4 = vcmp.lt.s32.totalorder %v6758_v3, 2  ;;  %v519_v17 = vsel %vm511_vm15, %v6773_v15, %v6775_v60  ;;  %v6792_v26 = vshll.u32 %v487_v14, 8  ;;  %v277_v29 = vclz %v276_v19  ;;  %v6856_v3 = vld [vmem:[#allocation2 + $0x60] sm:$0xff] }
  0x59   :  { %v418_v48 = vmul.u32 %v6618_v2, %v364_v16  ;;  %v520_v30 = vsel %vm514_vm1, %v507_v18, 920167782  ;;  %v422_v31 = vsel %vm420_vm2, %v421_v22, %v417_v5  ;;  %v523_v33 = vsel %vm511_vm15, %v6775_v60, %v6781_v61 }
  0x5a   :  { %v521_v32 = vsel %vm513_vm3, %v6781_v61, %v520_v30  ;;  %v524_v40 = vsel %vm514_vm1, %v510_v24, 1326507024  ;;  %v528_v28 = vand.u32 65535, %v6792_v26  ;;  %v6198_v36 = vadd.s32 4294967294, %v277_v29 }
  0x5b   :  { %v522_v34 = vsel %vm512_vm4, %v519_v17, %v521_v32  ;;  %v525_v2 = vsel %vm513_vm3, %v507_v18, %v524_v40  ;;  %v423_v41 = vadd.s32 %v422_v31, %v418_v48  ;;  %v529_v45 = vshrl.u32 %v6792_v26, 16 }
  0x5c   :  { %v526_v42 = vsel %vm512_vm4, %v523_v33, %v525_v2  ;;  %v553_v53 = vshrl.u32 %v522_v34, 16  ;;  %v552_v20 = vand.u32 65535, %v522_v34  ;;  %vm6199_vm5 = vcmp.lt.s32.totalorder %v6198_v36, 0  ;;  %v6822_v33 = vld [vmem:[#allocation2 + $0x38] sm:$0xff] }
  0x5d   :  { %v530_v49 = vand.u32 65535, %v526_v42  ;;  %v531_v51 = vshrl.u32 %v526_v42, 16  ;;  %v424_v57 = vadd.s32 536870912, %v423_v41  ;;  %v280_v38 = vsel %vm6199_vm5, 0, %v6198_v36 }
  0x5e   :  { %v555_v63 = vmul.u32 %v553_v53, %v528_v28  ;;  %v554_v37 = vmul.u32 %v552_v20, %v528_v28  ;;  %v556_v8 = vmul.u32 %v552_v20, %v529_v45  ;;  %v285_v14 = vsub.s32 4294967266, %v280_v38 }
  0x5f   :  { %v532_v11 = vmul.u32 %v530_v49, %v528_v28  ;;  %v533_v55 = vmul.u32 %v531_v51, %v528_v28  ;;  %v534_v59 = vmul.u32 %v530_v49, %v529_v45  ;;  %v6814_v39 = vshrl.u32 %v424_v57, 30 }
  0x60   :  { %v535_v5 = vmul.u32 %v531_v51, %v529_v45  ;;  %v558_v13 = vshll.u32 %v555_v63, 16  ;;  %v557_v19 = vmul.u32 %v553_v53, %v529_v45  ;;  %v560_v24 = vshll.u32 %v556_v8, 16 }
  0x61   :  { %v536_v62 = vshll.u32 %v533_v55, 16  ;;  %v538_v7 = vshll.u32 %v534_v59, 16  ;;  %v426_v18 = vshll.u32 %v6814_v39, 30  ;;  %v265_v17 = vadd.s32 %v6688_v27, %v6702_v35 }
  0x62   :  { %vm562_vm8 = vc.u32 %v554_v37, %v558_v13  ;;  %v281_v48 = vsub.s32 32, %v280_v38  ;;  %v286_v30 = vadd.s32 127, %v285_v14  ;;  %v564_v32 = vadd.s32 %v558_v13, %v554_v37 }
  0x63   :  { %vm540_vm6 = vc.u32 %v532_v11, %v536_v62  ;;  %v542_v16 = vadd.s32 %v536_v62, %v532_v11  ;;  %v563_v31 = vsel %vm562_vm8, 1, %v9896_v12  ;;  %v6824_v34 = vsub.s32 %v423_v41, %v426_v18 }
  0x64   :  { %v541_v47 = vsel %vm540_vm6, 1, %v9896_v12  ;;  %v565_v40 = vadd.s32 %v563_v31, %v557_v19  ;;  %v537_v2 = vshrl.u32 %v533_v55, 16  ;;  %v559_v36 = vshrl.u32 %v555_v63, 16 }
  0x65   :  { %v543_v22 = vadd.s32 %v541_v47, %v535_v5  ;;  %vm544_vm7 = vc.u32 %v542_v16, %v538_v7  ;;  %vm566_vm9 = vc.u32 %v564_v32, %v560_v24  ;;  %v282_v42 = vshll.u32 %v6740_v44, %v280_v38 }
  0x66   :  { %v545_v29 = vsel %vm544_vm7, 1, %v9896_v12  ;;  %v567_v27 = vsel %vm566_vm9, 1, %v9896_v12  ;;  %v283_v35 = vshrl.u32 %v265_v17, %v281_v48  ;;  %v287_v45 = vshll.u32 %v286_v30, 23 }
  0x67   :  { %v547_v28 = vadd.s32 %v545_v29, %v543_v22  ;;  %v569_v49 = vadd.s32 %v567_v27, %v565_v40  ;;  %v636_v51 = vand.u32 2139095040, %v6822_v33  ;;  %v429_v53 = vsub.s32 0, %v6824_v34 }
  0x68   :  { %v495_v41 = vshrl.u32 %v9890_v50, %v6738_v43  ;;  %v561_v11 = vshrl.u32 %v556_v8, 16  ;;  %vm428_vm10 = vcmp.lt.s32.totalorder %v6824_v34, 0  ;;  %v539_v55 = vshrl.u32 %v534_v59, 16 }
  0x69   :  { %v548_v57 = vadd.s32 %v547_v28, %v537_v2  ;;  %v570_v20 = vadd.s32 %v569_v49, %v559_v36  ;;  %v516_v44 = vsel %vm514_vm1, %v6781_v61, 2102212464  ;;  %v637_v62 = vshrl.u32 %v636_v51, 23 }
  0x6a   :  { %v284_v63 = vor.u32 %v283_v35, %v282_v42  ;;  %v288_v38 = vor.u32 4788187, %v287_v45  ;;  %v430_v37 = vsel %vm428_vm10, %v429_v53, %v6824_v34  ;;  %v515_v43 = vsel %vm511_vm15, %v495_v41, %v6773_v15 }
  0x6b   :  { %v571_v5 = vadd.s32 %v570_v20, %v561_v11  ;;  %v6206_v7 = vadd.s32 4294967169, %v637_v62  ;;  %v517_v59 = vsel %vm513_vm3, %v6775_v60, %v516_v44  ;;  %v6843_v8 = vadd.s32 %v548_v57, %v539_v55 }
  0x6c   :  { %v6845_v13 = vadd.s32 %v564_v32, %v560_v24  ;;  %v289_v47 = vand.u32 2147483647, %v288_v38  ;;  %v291_v14 = vcvt.s32.f32 %v284_v63  ;;  %v431_v16 = vclz %v430_v37 }
  0x6d   :  { %v643_v61 = vadd.s32 1, %v6206_v7  ;;  %v518_v18 = vsel %vm512_vm4, %v515_v43, %v517_v59  ;;  %v575_v19 = vadd.s32 1, %v571_v5  ;;  %v9876_v48 = vand.u32 2147483647, %v6822_v33 }
  0x6e   :  { %vm574_vm12 = vc.u32 %v6843_v8, %v6845_v13  ;;  %v292_v17 = vmul.f32 %v291_v14, %v289_v47  ;;  %v6201_v60 = vadd.s32 4294967294, %v431_v16  ;;  %v572_v29 = vmul.u32 %v6792_v26, %v518_v18 }
  0x6f   :  { %vm644_vm11 = vcmp.gt.s32.totalorder %v643_v61, 0  ;;  %v576_v24 = vsel %vm574_vm12, %v575_v19, %v571_v5  ;;  %vm173_vm13 = vcmp.lt.s32.totalorder %v6562_v1, 0  ;;  %v640_v2 = vand.u32 8388607, %v9876_v48 }
  0x70   :  { %v645_v15 = vsel %vm644_vm11, %v643_v61, 0  ;;  %v293_v31 = vxor.u32 2147483648, %v292_v17  ;;  %vm6202_vm14 = vcmp.lt.s32.totalorder %v6201_v60, 0  ;;  %v577_v32 = vadd.s32 %v576_v24, %v572_v29 }
  0x71   :  { %v647_v22 = vand.u32 31, %v645_v15  ;;  %vm6874_vm15 = vcmp.le.f32.partialorder %v171_v10, 0.7853982  ;;  %v6878_v51 = vshrl.u32 %v645_v15, 5  ;;  %v790_v53 = vand.u32 2139095040, %v6856_v3 }
  0x72   :  { %v578_v41 = vadd.s32 536870912, %v577_v32  ;;  %v294_v20 = vsel %vm173_vm13, %v293_v31, %v292_v17  ;;  %v419_v10 = vadd.s32 %v6756_v0, %v6768_v9  ;;  %v434_v44 = vsel %vm6202_vm14, 0, %v6201_v60 }
  0x73   :  { %v6853_v30 = vsub.s32 32, %v647_v22  ;;  %v659_v40 = vshll.u32 %v9885_v56, %v647_v22  ;;  %v650_v28 = vshll.u32 %v9890_v50, %v647_v22  ;;  %v653_v26 = vshll.u32 %v9887_v52, %v647_v22 }
  0x74   :  { %v656_v35 = vshll.u32 %v9882_v54, %v647_v22  ;;  %v662_v55 = vshll.u32 %v9879_v58, %v647_v22  ;;  %v641_v62 = vor.u32 8388608, %v640_v2  ;;  %vm665_vm1 = vcmp.lt.s32.totalorder %v6878_v51, 1 }
  0x75   :  { %v660_v36 = vshrl.u32 %v9879_v58, %v6853_v30  ;;  %v651_v42 = vshrl.u32 %v9887_v52, %v6853_v30  ;;  %v654_v27 = vshrl.u32 %v9882_v54, %v6853_v30  ;;  %v657_v45 = vshrl.u32 %v9885_v56, %v6853_v30 }
  0x76   :  { %v663_v57 = vshrl.u32 %v9877_v4, %v6853_v30  ;;  %vm667_vm2 = vcmp.lt.s32.totalorder %v6878_v51, 3  ;;  %vm668_vm3 = vcmp.lt.s32.totalorder %v6878_v51, 4  ;;  %v791_v7 = vshrl.u32 %v790_v53, 23 }
  0x77   :  { %v661_v11 = vor.u32 %v660_v36, %v659_v40  ;;  %v652_v63 = vor.u32 %v651_v42, %v650_v28  ;;  %v655_v38 = vor.u32 %v654_v27, %v653_v26  ;;  %v658_v37 = vor.u32 %v657_v45, %v656_v35 }
  0x78   :  { %v664_v5 = vor.u32 %v663_v57, %v662_v55  ;;  %v6895_v43 = vsel %vm6874_vm15, %v6562_v1, %v294_v20  ;;  %v435_v0 = vsub.s32 32, %v434_v44  ;;  %v6897_v9 = vshrl.u32 %v578_v41, 30 }
  0x79   :  { %v674_v59 = vsel %vm668_vm3, %v661_v11, 920167782  ;;  %v439_v61 = vsub.s32 4294967266, %v434_v44  ;;  %v6901_v47 = vshll.u32 %v641_v62, 8  ;;  %vm666_vm4 = vcmp.lt.s32.totalorder %v6878_v51, 2 }
  0x7a   :  { %v673_v14 = vsel %vm665_vm1, %v652_v63, %v655_v38  ;;  %v675_v16 = vsel %vm667_vm2, %v658_v37, %v674_v59  ;;  %v678_v18 = vsel %vm668_vm3, %v664_v5, 1326507024  ;;  %v6912_v19 = vmul.f32 %v6895_v43, %v6895_v43 }
  0x7b   :  { %v677_v15 = vsel %vm665_vm1, %v655_v38, %v658_v37  ;;  %v6209_v22 = vadd.s32 4294967169, %v791_v7  ;;  %v436_v17 = vshll.u32 %v6824_v34, %v434_v44  ;;  %v437_v60 = vshrl.u32 %v419_v10, %v435_v0 }
  0x7c   :  { %v580_v29 = vshll.u32 %v6897_v9, 30  ;;  %v683_v24 = vshrl.u32 %v6901_v47, 16  ;;  %v676_v31 = vsel %vm666_vm4, %v673_v14, %v675_v16  ;;  %v679_v40 = vsel %vm667_vm2, %v661_v11, %v678_v18 }
  0x7d   :  { %v682_v2 = vand.u32 65535, %v6901_v47  ;;  %v300_v28 = vmul.f32 -0.001358992, %v6912_v19  ;;  %v440_v26 = vadd.s32 127, %v439_v61  ;;  %v680_v36 = vsel %vm666_vm4, %v677_v15, %v679_v40 }
  0x7e   :  { %v706_v34 = vand.u32 65535, %v676_v31  ;;  %v684_v42 = vand.u32 65535, %v680_v36  ;;  %v685_v27 = vshrl.u32 %v680_v36, 16  ;;  %v707_v35 = vshrl.u32 %v676_v31, 16 }
  0x7f   :  { %v797_v45 = vadd.s32 1, %v6209_v22  ;;  %v307_v53 = vmul.f32 -0.00019511016, %v6912_v19  ;;  %v6928_v41 = vor.u32 %v437_v60, %v436_v17  ;;  %v6930_v55 = vsub.s32 %v577_v32, %v580_v29 }
  0x80   :  { %v710_v11 = vmul.u32 %v706_v34, %v683_v24  ;;  %v649_v57 = vshrl.u32 %v9890_v50, %v6853_v30  ;;  %v686_v20 = vmul.u32 %v684_v42, %v682_v2  ;;  %v687_v10 = vmul.u32 %v685_v27, %v682_v2 }
  0x81   :  { %v688_v44 = vmul.u32 %v684_v42, %v683_v24  ;;  %v441_v62 = vshll.u32 %v440_v26, 23  ;;  %v670_v5 = vsel %vm668_vm3, %v658_v37, 2102212464  ;;  %v708_v7 = vmul.u32 %v706_v34, %v682_v2 }
  0x82   :  { %v709_v0 = vmul.u32 %v707_v35, %v682_v2  ;;  %v689_v59 = vmul.u32 %v685_v27, %v683_v24  ;;  %v690_v61 = vshll.u32 %v687_v10, 16  ;;  %vm798_vm5 = vcmp.gt.s32.totalorder %v797_v45, 0 }
  0x83   :  { %v692_v14 = vshll.u32 %v688_v44, 16  ;;  %v583_v32 = vsub.s32 0, %v6930_v55  ;;  %v711_v16 = vmul.u32 %v707_v35, %v683_v24  ;;  %v714_v15 = vshll.u32 %v710_v11, 16 }
  0x84   :  { %v712_v18 = vshll.u32 %v709_v0, 16  ;;  %v669_v30 = vsel %vm665_vm1, %v649_v57, %v652_v63  ;;  %v671_v22 = vsel %vm667_vm2, %v655_v38, %v670_v5  ;;  %vm694_vm6 = vc.u32 %v686_v20, %v690_v61 }
  0x85   :  { %v696_v17 = vadd.s32 %v690_v61, %v686_v20  ;;  %v695_v37 = vsel %vm694_vm6, 1, %v9896_v12  ;;  %v799_v29 = vsel %vm798_vm5, %v797_v45, 0  ;;  %v691_v31 = vshrl.u32 %v687_v10, 16 }
  0x86   :  { %vm716_vm7 = vc.u32 %v708_v7, %v712_v18  ;;  %v718_v60 = vadd.s32 %v712_v18, %v708_v7  ;;  %v697_v40 = vadd.s32 %v695_v37, %v689_v59  ;;  %v713_v26 = vshrl.u32 %v709_v0, 16 }
  0x87   :  { %vm698_vm8 = vc.u32 %v696_v17, %v692_v14  ;;  %v717_v24 = vsel %vm716_vm7, 1, %v9896_v12  ;;  %v693_v63 = vshrl.u32 %v688_v44, 16  ;;  %v801_v42 = vand.u32 31, %v799_v29 }
  0x88   :  { %v699_v2 = vsel %vm698_vm8, 1, %v9896_v12  ;;  %v719_v36 = vadd.s32 %v717_v24, %v711_v16  ;;  %vm720_vm9 = vc.u32 %v718_v60, %v714_v15  ;;  %v301_v27 = vadd.f32 0.041655596, %v300_v28 }
  0x89   :  { %v701_v34 = vadd.s32 %v699_v2, %v697_v40  ;;  %v721_v38 = vsel %vm720_vm9, 1, %v9896_v12  ;;  %vm582_vm10 = vcmp.lt.s32.totalorder %v6930_v55, 0  ;;  %v715_v35 = vshrl.u32 %v710_v11, 16 }
  0x8a   :  { %v723_v45 = vadd.s32 %v721_v38, %v719_v36  ;;  %v308_v57 = vadd.f32 0.008332121, %v307_v53  ;;  %v6946_v10 = vadd.s32 %v718_v60, %v714_v15  ;;  %v6948_v5 = vsub.s32 32, %v801_v42 }
  0x8b   :  { %v702_v20 = vadd.s32 %v701_v34, %v691_v31  ;;  %v442_v7 = vor.u32 4788187, %v441_v62  ;;  %v672_v0 = vsel %vm666_vm4, %v669_v30, %v671_v22  ;;  %v9875_v59 = vand.u32 2147483647, %v6856_v3 }
  0x8c   :  { %v724_v44 = vadd.s32 %v723_v45, %v713_v26  ;;  %v445_v61 = vcvt.s32.f32 %v6928_v41  ;;  %v584_v28 = vsel %vm582_vm10, %v583_v32, %v6930_v55  ;;  %v804_v53 = vshll.u32 %v9890_v50, %v801_v42 }
  0x8d   :  { %v6955_v14 = vadd.s32 %v702_v20, %v693_v63  ;;  %v805_v16 = vshrl.u32 %v9887_v52, %v6948_v5  ;;  %v807_v62 = vshll.u32 %v9887_v52, %v801_v42  ;;  %v808_v51 = vshrl.u32 %v9882_v54, %v6948_v5 }
  0x8e   :  { %v725_v11 = vadd.s32 %v724_v44, %v715_v35  ;;  %v726_v18 = vmul.u32 %v6901_v47, %v672_v0  ;;  %v810_v41 = vshll.u32 %v9882_v54, %v801_v42  ;;  %v811_v32 = vshrl.u32 %v9885_v56, %v6948_v5 }
  0x8f   :  { %vm728_vm11 = vc.u32 %v6955_v14, %v6946_v10  ;;  %v443_v15 = vand.u32 2147483647, %v442_v7  ;;  %v794_v22 = vand.u32 8388607, %v9875_v59  ;;  %v6971_v17 = vshrl.u32 %v799_v29, 5 }
  0x90   :  { %v729_v30 = vadd.s32 1, %v725_v11  ;;  %v813_v37 = vshll.u32 %v9885_v56, %v801_v42  ;;  %v814_v47 = vshrl.u32 %v9879_v58, %v6948_v5  ;;  %v816_v60 = vshll.u32 %v9879_v58, %v801_v42 }
  0x91   :  { %v817_v31 = vshrl.u32 %v9877_v4, %v6948_v5  ;;  %v585_v40 = vclz %v584_v28  ;;  %v6979_v2 = vor.u32 %v805_v16, %v804_v53  ;;  %v6981_v26 = vor.u32 %v808_v51, %v807_v62 }
  0x92   :  { %v730_v24 = vsel %vm728_vm11, %v729_v30, %v725_v11  ;;  %v6985_v29 = vor.u32 %v811_v32, %v810_v41  ;;  %v815_v63 = vor.u32 %v814_v47, %v813_v37  ;;  %v309_v38 = vmul.f32 %v308_v57, %v6912_v19 }
  0x93   :  { %v6983_v36 = vadd.s32 %v730_v24, %v726_v18  ;;  %v818_v34 = vor.u32 %v817_v31, %v816_v60  ;;  %v446_v35 = vmul.f32 %v445_v61, %v443_v15  ;;  %vm819_vm12 = vcmp.lt.s32.totalorder %v6971_v17, 1 }
  0x94   :  { %vm822_vm14 = vcmp.lt.s32.totalorder %v6971_v17, 4  ;;  %v295_v42 = vsub.s32 4, %v6727_v25  ;;  %v302_v45 = vmul.f32 %v301_v27, %v6912_v19  ;;  %vm821_vm1 = vcmp.lt.s32.totalorder %v6971_v17, 3 }
  0x95   :  { %v6204_v20 = vadd.s32 4294967294, %v585_v40  ;;  %v732_v7 = vadd.s32 536870912, %v6983_v36  ;;  %v795_v0 = vor.u32 8388608, %v794_v22  ;;  %vm820_vm2 = vcmp.lt.s32.totalorder %v6971_v17, 2 }
  0x96   :  { %v827_v57 = vsel %vm819_vm12, %v6979_v2, %v6981_v26  ;;  %v828_v44 = vsel %vm822_vm14, %v815_v63, 920167782  ;;  %v831_v27 = vsel %vm819_vm12, %v6981_v26, %v6985_v29  ;;  %v832_v61 = vsel %vm822_vm14, %v818_v34, 1326507024 }
  0x97   :  { %v310_v28 = vadd.f32 -0.16666654, %v309_v38  ;;  %v447_v53 = vxor.u32 2147483648, %v446_v35  ;;  %v829_v11 = vsel %vm821_vm1, %v6985_v29, %v828_v44  ;;  %v833_v16 = vsel %vm821_vm1, %v815_v63, %v832_v61 }
  0x98   :  { %vm327_vm3 = vcmp.lt.s32.totalorder %v6566_v6, 0  ;;  %v834_v62 = vsel %vm820_vm2, %v831_v27, %v833_v16  ;;  %v296_v51 = vsel %vm173_vm13, %v295_v42, %v6727_v25  ;;  %v830_v18 = vsel %vm820_vm2, %v827_v57, %v829_v11 }
  0x99   :  { %v7020_v41 = vshll.u32 %v795_v0, 8  ;;  %v838_v32 = vand.u32 65535, %v834_v62  ;;  %v303_v15 = vadd.f32 -0.4999988, %v302_v45  ;;  %vm6205_vm4 = vcmp.lt.s32.totalorder %v6204_v20, 0  ;;  %v6385_v45 = vld [vmem:[#allocation2 + $0x28] sm:$0xff] }
  0x9a   :  { %v7022_v30 = vshrl.u32 %v732_v7, 30  ;;  %v839_v22 = vshrl.u32 %v834_v62, 16  ;;  %v311_v37 = vmul.f32 %v310_v28, %v6912_v19  ;;  %vm7027_vm5 = vcmp.le.f32.partialorder %v325_v23, 0.7853982 }
  0x9b   :  { %v448_v1 = vsel %vm327_vm3, %v447_v53, %v446_v35  ;;  %v836_v25 = vand.u32 65535, %v7020_v41  ;;  %v7036_v60 = vsel %vm6874_vm15, 0, %v296_v51  ;;  %v837_v31 = vshrl.u32 %v7020_v41, 16 }
  0x9c   :  { %10006 = vst [vmem:[#allocation8_spill] sm:$0xff] %v7036_v60  ;;  %v860_v40 = vand.u32 65535, %v830_v18  ;;  %v861_v24 = vshrl.u32 %v830_v18, 16  ;;  %v7040_v63 = vand.u32 3, %v7036_v60  ;;  %v588_v23 = vsel %vm6205_vm4, 0, %v6204_v20 }
  0x9d   :  { %v840_v34 = vmul.u32 %v838_v32, %v836_v25  ;;  %v841_v38 = vmul.u32 %v839_v22, %v836_v25  ;;  %v304_v42 = vmul.f32 %v303_v15, %v6912_v19  ;;  %v7045_v35 = vsel %vm7027_vm5, %v6385_v45, %v448_v1 }
  0x9e   :  { %v734_v49 = vshll.u32 %v7022_v30, 30  ;;  %v842_v7 = vmul.u32 %v838_v32, %v837_v31  ;;  %v312_v0 = vadd.f32 1.0, %v311_v37  ;;  %v573_v57 = vadd.s32 %v6845_v13, %v6843_v8 }
  0x9f   :  { %v843_v44 = vmul.u32 %v839_v22, %v837_v31  ;;  %v844_v27 = vshll.u32 %v841_v38, 16  ;;  %v593_v61 = vsub.s32 4294967266, %v588_v23  ;;  %v862_v28 = vmul.u32 %v860_v40, %v836_v25 }
  0xa0   :  { %v846_v20 = vshll.u32 %v842_v7, 16  ;;  %v863_v53 = vmul.u32 %v861_v24, %v836_v25  ;;  %v7052_v19 = vmul.f32 %v7045_v35, %v7045_v35  ;;  %v864_v16 = vmul.u32 %v860_v40, %v837_v31  ;;  %v7064_v25 = vld [vmem:[#allocation2 + $0x68] sm:$0xff] }
  0xa1   :  { %vm848_vm13 = vc.u32 %v840_v34, %v844_v27  ;;  %v850_v11 = vadd.s32 %v844_v27, %v840_v34  ;;  %v589_v62 = vsub.s32 32, %v588_v23  ;;  %v7055_v51 = vsub.s32 %v6983_v36, %v734_v49 }
  0xa2   :  { %v849_v18 = vsel %vm848_vm13, 1, %v9896_v12  ;;  %v866_v8 = vshll.u32 %v863_v53, 16  ;;  %v7058_v13 = vadd.f32 1.0, %v304_v42  ;;  %v7061_v32 = vmul.f32 %v312_v0, %v6895_v43 }
  0xa3   :  { %v454_v15 = vmul.f32 -0.001358992, %v7052_v19  ;;  %v851_v22 = vadd.s32 %v849_v18, %v843_v44  ;;  %v594_v37 = vadd.s32 127, %v593_v61  ;;  %vm852_vm15 = vc.u32 %v850_v11, %v846_v20 }
  0xa4   :  { %10007 = vst [vmem:[#allocation9_spill] sm:$0xff] %v7058_v13  ;;  %v865_v1 = vmul.u32 %v861_v24, %v837_v31  ;;  %vm870_vm6 = vc.u32 %v862_v28, %v866_v8  ;;  %v590_v36 = vshll.u32 %v6930_v55, %v588_v23  ;;  %v803_v40 = vshrl.u32 %v9890_v50, %v6948_v5 }
  0xa5   :  { %10008 = vst [vmem:[#allocation10_spill] sm:$0xff] %v7061_v32  ;;  %v845_v34 = vshrl.u32 %v841_v38, 16  ;;  %v868_v42 = vshll.u32 %v864_v16, 16  ;;  %v591_v45 = vshrl.u32 %v573_v57, %v589_v62  ;;  %v737_v43 = vsub.s32 0, %v7055_v51 }
  0xa6   :  { %v853_v49 = vsel %vm852_vm15, 1, %v9896_v12  ;;  %v871_v0 = vsel %vm870_vm6, 1, %v9896_v12  ;;  %vm736_vm7 = vcmp.lt.s32.totalorder %v7055_v51, 0  ;;  %v824_v31 = vsel %vm822_vm14, %v6985_v29, 2102212464 }
  0xa7   :  { %v855_v24 = vadd.s32 %v853_v49, %v851_v22  ;;  %v872_v55 = vadd.s32 %v866_v8, %v862_v28  ;;  %v595_v23 = vshll.u32 %v594_v37, 23  ;;  %v847_v44 = vshrl.u32 %v842_v7, 16 }
  0xa8   :  { %v873_v5 = vadd.s32 %v871_v0, %v865_v1  ;;  %v944_v38 = vand.u32 2139095040, %v7064_v25  ;;  %vm317_vm8 = vcmp.eq.s32.totalorder %v7040_v63, 0  ;;  %v823_v57 = vsel %vm819_vm12, %v803_v40, %v6979_v2 }
  0xa9   :  { %v856_v27 = vadd.s32 %v855_v24, %v845_v34  ;;  %v867_v61 = vshrl.u32 %v863_v53, 16  ;;  %vm874_vm9 = vc.u32 %v872_v55, %v868_v42  ;;  %v738_v20 = vsel %vm736_vm7, %v737_v43, %v7055_v51 }
  0xaa   :  { %v825_v29 = vsel %vm821_vm1, %v6981_v26, %v824_v31  ;;  %v875_v7 = vsel %vm874_vm9, 1, %v9896_v12  ;;  %v945_v28 = vshrl.u32 %v944_v38, 23  ;;  %v461_v11 = vmul.f32 -0.00019511016, %v7052_v19 }
  0xab   :  { %v592_v62 = vor.u32 %v591_v45, %v590_v36  ;;  %v869_v18 = vshrl.u32 %v864_v16, 16  ;;  %v877_v8 = vadd.s32 %v875_v7, %v873_v5  ;;  %v596_v22 = vor.u32 4788187, %v595_v23  ;;  %v7102_v5 = vld [vmem:[#allocation2 + $0x30] sm:$0xff] }
  0xac   :  { %v7087_v37 = vadd.s32 %v856_v27, %v847_v44  ;;  %v7089_v2 = vadd.s32 %v872_v55, %v868_v42  ;;  %v6212_v53 = vadd.s32 4294967169, %v945_v28  ;;  %vm320_vm10 = vcmp.eq.s32.totalorder %v7040_v63, 2 }
  0xad   :  { %v739_v1 = vclz %v738_v20  ;;  %v826_v26 = vsel %vm820_vm2, %v823_v57, %v825_v29  ;;  %v878_v40 = vadd.s32 %v877_v8, %v867_v61  ;;  %v9873_v34 = vxor.u32 2147483648, %v7061_v32 }
  0xae   :  { %v9872_v43 = vxor.u32 2147483648, %v7058_v13  ;;  %v449_v16 = vsub.s32 4, %v6814_v39  ;;  %v951_v36 = vadd.s32 1, %v6212_v53  ;;  %v455_v45 = vadd.f32 0.041655596, %v454_v15 }
  0xaf   :  { %v462_v49 = vadd.f32 0.008332121, %v461_v11  ;;  %v599_v0 = vcvt.s32.f32 %v592_v62  ;;  %v879_v42 = vadd.s32 %v878_v40, %v869_v18  ;;  %v597_v31 = vand.u32 2147483647, %v596_v22 }
  0xb0   :  { %v880_v24 = vmul.u32 %v7020_v41, %v826_v26  ;;  %vm882_vm11 = vc.u32 %v7087_v37, %v7089_v2  ;;  %vm952_vm12 = vcmp.gt.s32.totalorder %v951_v36, 0  ;;  %v6207_v17 = vadd.s32 4294967294, %v739_v1 }
  0xb1   :  { %v883_v55 = vadd.s32 1, %v879_v42  ;;  %v9874_v23 = vand.u32 2147483647, %v7064_v25  ;;  %v953_v44 = vsel %vm952_vm12, %v951_v36, 0  ;;  %vm316_vm14 = vcmp.lt.s32.totalorder %v7040_v63, 2 }
  0xb2   :  { %vm481_vm1 = vcmp.lt.s32.totalorder %v7102_v5, 0  ;;  %v955_v15 = vand.u32 31, %v953_v44  ;;  %v322_v41 = vsel %vm320_vm10, %v9872_v43, %v7061_v32  ;;  %v7113_v38 = vsel %vm327_vm3, %v449_v16, %v6814_v39 }
  0xb3   :  { %v456_v57 = vmul.f32 %v455_v45, %v7052_v19  ;;  %v884_v27 = vsel %vm882_vm11, %v883_v55, %v879_v42  ;;  %v319_v61 = vsel %vm317_vm8, %v7058_v13, %v9873_v34  ;;  %v600_v20 = vmul.f32 %v599_v0, %v597_v31 }
  0xb4   :  { %v885_v29 = vadd.s32 %v884_v27, %v880_v24  ;;  %v7121_v7 = vsub.s32 32, %v955_v15  ;;  %v463_v28 = vmul.f32 %v462_v49, %v7052_v19  ;;  %vm7126_vm2 = vcmp.le.f32.partialorder %v479_v46, 0.7853982  ;;  %v7164_v27 = vld [vmem:[#allocation2 + $0x70] sm:$0xff] }
  0xb5   :  { %vm6208_vm3 = vcmp.lt.s32.totalorder %v6207_v17, 0  ;;  %v948_v39 = vand.u32 8388607, %v9874_v23  ;;  %v958_v11 = vshll.u32 %v9890_v50, %v955_v15  ;;  %v961_v8 = vshll.u32 %v9887_v52, %v955_v15 }
  0xb6   :  { %v886_v62 = vadd.s32 536870912, %v885_v29  ;;  %v959_v18 = vshrl.u32 %v9887_v52, %v7121_v7  ;;  %v962_v22 = vshrl.u32 %v9882_v54, %v7121_v7  ;;  %v457_v21 = vadd.f32 -0.4999988, %v456_v57  ;;  %v7159_v57 = vld [vmem:[#allocation2 + $0x20] sm:$0xff] }
  0xb7   :  { %v7138_v46 = vshrl.u32 %v953_v44, 5  ;;  %v967_v53 = vshll.u32 %v9885_v56, %v955_v15  ;;  %v968_v1 = vshrl.u32 %v9879_v58, %v7121_v7  ;;  %v601_v26 = vxor.u32 2147483648, %v600_v20  ;;  %10011 = vst [vmem:[#allocation11_spill] sm:$0xff] %v7159_v57 }
  0xb8   :  { %v7143_v40 = vshrl.u32 %v886_v62, 30  ;;  %v964_v16 = vshll.u32 %v9882_v54, %v955_v15  ;;  %v965_v36 = vshrl.u32 %v9885_v56, %v7121_v7  ;;  %v323_v45 = vsel %vm316_vm14, %v319_v61, %v322_v41 }
  0xb9   :  { %v742_v49 = vsel %vm6208_vm3, 0, %v6207_v17  ;;  %v949_v0 = vor.u32 8388608, %v948_v39  ;;  %v7151_v42 = vor.u32 %v959_v18, %v958_v11  ;;  %v7154_v24 = vor.u32 %v962_v22, %v961_v8 }
  0xba   :  { %v888_v31 = vshll.u32 %v7143_v40, 30  ;;  %v970_v55 = vshll.u32 %v9879_v58, %v955_v15  ;;  %v971_v44 = vshrl.u32 %v9877_v4, %v7121_v7  ;;  %vm314_vm4 = vweird.f32 %v7159_v57 }
  0xbb   :  { %v458_v63 = vmul.f32 %v457_v21, %v7052_v19  ;;  %v464_v41 = vadd.f32 -0.16666654, %v463_v28  ;;  %v969_v17 = vor.u32 %v968_v1, %v967_v53  ;;  %vm973_vm13 = vcmp.lt.s32.totalorder %v7138_v46, 1 }
  0xbc   :  { %v602_v61 = vsel %vm481_vm1, %v601_v26, %v600_v20  ;;  %v7168_v39 = vsub.s32 %v885_v29, %v888_v31  ;;  %v966_v15 = vor.u32 %v965_v36, %v964_v16  ;;  %vm976_vm15 = vcmp.lt.s32.totalorder %v7138_v46, 4 }
  0xbd   :  { %v727_v11 = vadd.s32 %v6946_v10, %v6955_v14  ;;  %v743_v62 = vsub.s32 32, %v742_v49  ;;  %v747_v18 = vsub.s32 4294967266, %v742_v49  ;;  %vm975_vm6 = vcmp.lt.s32.totalorder %v7138_v46, 3 }
  0xbe   :  { %v972_v28 = vor.u32 %v971_v44, %v970_v55  ;;  %vm974_vm7 = vcmp.lt.s32.totalorder %v7138_v46, 2  ;;  %v981_v20 = vsel %vm973_vm13, %v7151_v42, %v7154_v24  ;;  %v7179_v29 = vshll.u32 %v949_v0, 8 }
  0xbf   :  { %v465_v8 = vmul.f32 %v464_v41, %v7052_v19  ;;  %v603_v22 = vsub.s32 4, %v6897_v9  ;;  %v982_v10 = vsel %vm976_vm15, %v969_v17, 920167782  ;;  %v1098_v14 = vand.u32 2139095040, %v7164_v27 }
  0xc0   :  { %v7189_v21 = vsel %vm7126_vm2, %v7102_v5, %v602_v61  ;;  %v744_v53 = vshll.u32 %v7055_v51, %v742_v49  ;;  %v891_v1 = vsub.s32 0, %v7168_v39  ;;  %v983_v26 = vsel %vm975_vm6, %v966_v15, %v982_v10 }
  0xc1   :  { %v745_v19 = vshrl.u32 %v727_v11, %v743_v62  ;;  %v748_v16 = vadd.s32 127, %v747_v18  ;;  %vm890_vm8 = vcmp.lt.s32.totalorder %v7168_v39, 0  ;;  %v984_v36 = vsel %vm974_vm7, %v981_v20, %v983_v26 }
  0xc2   :  { %v7198_v0 = vadd.f32 1.0, %v458_v63  ;;  %v986_v31 = vsel %vm976_vm15, %v972_v28, 1326507024  ;;  %v990_v55 = vand.u32 65535, %v7179_v29  ;;  %v1015_v51 = vshrl.u32 %v984_v36, 16 }
  0xc3   :  { %v466_v49 = vadd.f32 1.0, %v465_v8  ;;  %v7205_v44 = vmul.f32 %v7189_v21, %v7189_v21  ;;  %v991_v41 = vshrl.u32 %v7179_v29, 16  ;;  %v1099_v61 = vshrl.u32 %v1098_v14, 23 }
  0xc4   :  { %10012 = vst [vmem:[#allocation12_spill] sm:$0xff] %v7198_v0  ;;  %v892_v11 = vsel %vm890_vm8, %v891_v1, %v7168_v39  ;;  %v985_v63 = vsel %vm973_vm13, %v7154_v24, %v966_v15  ;;  %v987_v62 = vsel %vm975_vm6, %v969_v17, %v986_v31  ;;  %v1014_v18 = vand.u32 65535, %v984_v36 }
  0xc5   :  { %v7217_v28 = vsel %vm7027_vm5, 0, %v7113_v38  ;;  %v7219_v20 = vor.u32 %v745_v19, %v744_v53  ;;  %v749_v8 = vshll.u32 %v748_v16, 23  ;;  %v7223_v10 = vsel %vm314_vm4, nan, %v323_v45 }
  0xc6   :  { %10013 = vst [vmem:[#allocation13_spill] sm:$0xff] %v7217_v28  ;;  %v7226_v14 = vand.u32 3, %v7217_v28  ;;  %v7231_v17 = vsel %vm481_vm1, %v603_v22, %v6897_v9  ;;  %v1017_v1 = vmul.u32 %v1015_v51, %v990_v55  ;;  %v7234_v47 = vmul.f32 %v466_v49, %v7045_v35 }
  0xc7   :  { %10014 = vst [vmem:[#allocation14_spill] sm:$0xff] %v7223_v10  ;;  %v893_v38 = vclz %v892_v11  ;;  %v988_v53 = vsel %vm974_vm7, %v985_v63, %v987_v62  ;;  %v6215_v26 = vadd.s32 4294967169, %v1099_v61  ;;  %v608_v19 = vmul.f32 -0.001358992, %v7205_v44 }
  0xc8   :  { %10015 = vst [vmem:[#allocation15_spill] sm:$0xff] %v7234_v47  ;;  %v615_v16 = vmul.f32 -0.00019511016, %v7205_v44  ;;  %v1018_v36 = vmul.u32 %v1014_v18, %v991_v41  ;;  %v750_v31 = vor.u32 4788187, %v749_v8  ;;  %v753_v9 = vcvt.s32.f32 %v7219_v20 }
  0xc9   :  { %v957_v22 = vshrl.u32 %v9890_v50, %v7121_v7  ;;  %v992_v35 = vand.u32 65535, %v988_v53  ;;  %v978_v49 = vsel %vm976_vm15, %v966_v15, 2102212464  ;;  %v993_v11 = vshrl.u32 %v988_v53, 16 }
  0xca   :  { %v1016_v63 = vmul.u32 %v1014_v18, %v990_v55  ;;  %v1020_v61 = vshll.u32 %v1017_v1, 16  ;;  %v6210_v62 = vadd.s32 4294967294, %v893_v38  ;;  %v9881_v34 = vand.u32 2147483647, %v7164_v27 }
  0xcb   :  { %v996_v43 = vmul.u32 %v992_v35, %v991_v41  ;;  %v1105_v23 = vadd.s32 1, %v6215_v26  ;;  %v994_v59 = vmul.u32 %v992_v35, %v990_v55  ;;  %v995_v45 = vmul.u32 %v993_v11, %v990_v55 }
  0xcc   :  { %v1019_v8 = vmul.u32 %v1015_v51, %v991_v41  ;;  %v1022_v48 = vshll.u32 %v1018_v36, 16  ;;  %v751_v20 = vand.u32 2147483647, %v750_v31  ;;  %v977_v7 = vsel %vm973_vm13, %v957_v22, %v7151_v42 }
  0xcd   :  { %v979_v15 = vsel %vm975_vm6, %v7154_v24, %v978_v49  ;;  %v997_v18 = vmul.u32 %v993_v11, %v991_v41  ;;  %v998_v53 = vshll.u32 %v995_v45, 16  ;;  %v1000_v38 = vshll.u32 %v996_v43, 16 }
  0xce   :  { %vm1024_vm5 = vc.u32 %v1016_v63, %v1020_v61  ;;  %v1026_v4 = vadd.s32 %v1020_v61, %v1016_v63  ;;  %vm6211_vm9 = vcmp.lt.s32.totalorder %v6210_v62, 0  ;;  %v1021_v26 = vshrl.u32 %v1017_v1, 16 }
  0xcf   :  { %v1025_v55 = vsel %vm1024_vm5, 1, %v9896_v12  ;;  %vm1106_vm10 = vcmp.gt.s32.totalorder %v1105_v23, 0  ;;  %vm1002_vm11 = vc.u32 %v994_v59, %v998_v53  ;;  %v1004_v51 = vadd.s32 %v998_v53, %v994_v59 }
  0xd0   :  { %v1027_v31 = vadd.s32 %v1025_v55, %v1019_v8  ;;  %vm1028_vm12 = vc.u32 %v1026_v4, %v1022_v48  ;;  %v999_v35 = vshrl.u32 %v995_v45, 16  ;;  %v1003_v42 = vsel %vm1002_vm11, 1, %v9896_v12 }
  0xd1   :  { %v1023_v22 = vshrl.u32 %v1018_v36, 16  ;;  %v1029_v24 = vsel %vm1028_vm12, 1, %v9896_v12  ;;  %v1005_v41 = vadd.s32 %v1003_v42, %v997_v18  ;;  %vm1006_vm14 = vc.u32 %v1004_v51, %v1000_v38 }
  0xd2   :  { %v1031_v49 = vadd.s32 %v1029_v24, %v1027_v31  ;;  %v1107_v11 = vsel %vm1106_vm10, %v1105_v23, 0  ;;  %v609_v63 = vadd.f32 0.041655596, %v608_v19  ;;  %v980_v1 = vsel %vm974_vm7, %v977_v7, %v979_v15 }
  0xd3   :  { %v1007_v61 = vsel %vm1006_vm14, 1, %v9896_v12  ;;  %v1109_v58 = vand.u32 31, %v1107_v11  ;;  %v896_v59 = vsel %vm6211_vm9, 0, %v6210_v62  ;;  %v1001_v8 = vshrl.u32 %v996_v43, 16 }
  0xd4   :  { %v1009_v45 = vadd.s32 %v1007_v61, %v1005_v41  ;;  %v1032_v53 = vadd.s32 %v1031_v49, %v1021_v26  ;;  %v616_v55 = vadd.f32 0.008332121, %v615_v16  ;;  %v881_v36 = vadd.s32 %v7089_v2, %v7087_v37 }
  0xd5   :  { %v1102_v18 = vand.u32 8388607, %v9881_v34  ;;  %v7264_v23 = vsub.s32 32, %v1109_v58  ;;  %v754_v19 = vmul.f32 %v753_v9, %v751_v20  ;;  %v7266_v7 = vadd.s32 %v1026_v4, %v1022_v48 }
  0xd6   :  { %v1010_v46 = vadd.s32 %v1009_v45, %v999_v35  ;;  %v1033_v15 = vadd.s32 %v1032_v53, %v1023_v22  ;;  %v897_v38 = vsub.s32 32, %v896_v59  ;;  %v901_v51 = vsub.s32 4294967266, %v896_v59 }
  0xd7   :  { %v1034_v43 = vmul.u32 %v7179_v29, %v980_v1  ;;  %v1112_v62 = vshll.u32 %v9890_v50, %v1109_v58  ;;  %v1115_v37 = vshll.u32 %v9887_v52, %v1109_v58  ;;  %v1121_v2 = vshll.u32 %v9885_v56, %v1109_v58 }
  0xd8   :  { %v7270_v16 = vadd.s32 %v1010_v46, %v1001_v8  ;;  %v1037_v26 = vadd.s32 1, %v1033_v15  ;;  %v1113_v9 = vshrl.u32 %v9887_v52, %v7264_v23  ;;  %v1116_v4 = vshrl.u32 %v9882_v54, %v7264_v23 }
  0xd9   :  { %v1118_v48 = vshll.u32 %v9882_v54, %v1109_v58  ;;  %v1119_v29 = vshrl.u32 %v9885_v56, %v7264_v23  ;;  %v755_v20 = vxor.u32 2147483648, %v754_v19  ;;  %v7283_v31 = vshrl.u32 %v1107_v11, 5 }
  0xda   :  { %vm1036_vm1 = vc.u32 %v7270_v16, %v7266_v7  ;;  %v10016_v35 = vmov 920167782   ;;  %v902_v22 = vadd.s32 127, %v901_v51  ;;  %v1103_v41 = vor.u32 8388608, %v1102_v18 }
  0xdb   :  { %v1122_v42 = vshrl.u32 %v10016_v35, %v7264_v23  ;;  %v1038_v24 = vsel %vm1036_vm1, %v1037_v26, %v1033_v15  ;;  %v1124_v49 = vshll.u32 %v10016_v35, %v1109_v58  ;;  %v898_v1 = vshll.u32 %v7168_v39, %v896_v59 }
  0xdc   :  { %v1039_v61 = vadd.s32 %v1038_v24, %v1034_v43  ;;  %v10017_v45 = vmov 1326507024   ;;  %v899_v46 = vshrl.u32 %v881_v36, %v897_v38  ;;  %v7291_v34 = vor.u32 %v1113_v9, %v1112_v62 }
  0xdd   :  { %v1123_v8 = vor.u32 %v1122_v42, %v1121_v2  ;;  %v1125_v53 = vshrl.u32 %v10017_v45, %v7264_v23  ;;  %v7293_v11 = vor.u32 %v1116_v4, %v1115_v37  ;;  %v7295_v54 = vor.u32 %v1119_v29, %v1118_v48 }
  0xde   :  { %vm471_vm3 = vcmp.eq.s32.totalorder %v7226_v14, 0  ;;  %vm474_vm13 = vcmp.eq.s32.totalorder %v7226_v14, 2  ;;  %v1040_v18 = vadd.s32 536870912, %v1039_v61  ;;  %vm1127_vm15 = vcmp.lt.s32.totalorder %v7283_v31, 1 }
  0xdf   :  { %vm1129_vm6 = vcmp.lt.s32.totalorder %v7283_v31, 3  ;;  %vm1130_vm7 = vcmp.lt.s32.totalorder %v7283_v31, 4  ;;  %vm635_vm8 = vcmp.lt.s32.totalorder %v6822_v33, 0  ;;  %v903_v58 = vshll.u32 %v902_v22, 23 }
  0xe0   :  { %v1126_v39 = vor.u32 %v1125_v53, %v1124_v49  ;;  %v7303_v59 = vshll.u32 %v1103_v41, 8  ;;  %v9884_v36 = vxor.u32 2147483648, %v7234_v47  ;;  %v610_v15 = vmul.f32 %v609_v63, %v7205_v44 }
  0xe1   :  { %v7307_v38 = vshrl.u32 %v1040_v18, 30  ;;  %v1136_v51 = vsel %vm1130_vm7, %v1123_v8, 920167782  ;;  %v617_v43 = vmul.f32 %v616_v55, %v7205_v44  ;;  %vm1128_vm5 = vcmp.lt.s32.totalorder %v7283_v31, 2 }
  0xe2   :  { %v1135_v62 = vsel %vm1127_vm15, %v7291_v34, %v7293_v11  ;;  %v1137_v26 = vsel %vm1129_vm6, %v7295_v54, %v1136_v51  ;;  %v10018_v63 = vand.u32 2147483647, %v6822_v33  ;;  %v756_v55 = vsel %vm635_vm8, %v755_v20, %v754_v19 }
  0xe3   :  { %v900_v2 = vor.u32 %v899_v46, %v898_v1  ;;  %v1042_v9 = vshll.u32 %v7307_v38, 30  ;;  %v904_v4 = vor.u32 4788187, %v903_v58  ;;  %v1139_v48 = vsel %vm1127_vm15, %v7293_v11, %v7295_v54  ;;  %v7343_v1 = vld [vmem:[#allocation2 + $0x38] sm:$0xff] }
  0xe4   :  { %vm7322_vm9 = vcmp.le.f32.partialorder %v10018_v63, 0.7853982  ;;  %v1140_v29 = vsel %vm1130_vm7, %v1126_v39, 1326507024  ;;  %v1144_v42 = vand.u32 65535, %v7303_v59  ;;  %v1138_v24 = vsel %vm1128_vm5, %v1135_v62, %v1137_v26 }
  0xe5   :  { %v7336_v22 = vsub.s32 %v1039_v61, %v1042_v9  ;;  %v1141_v19 = vsel %vm1129_vm6, %v1123_v8, %v1140_v29  ;;  %v1145_v20 = vshrl.u32 %v7303_v59, 16  ;;  %v611_v41 = vadd.f32 -0.4999988, %v610_v15 }
  0xe6   :  { %v618_v49 = vadd.f32 -0.16666654, %v617_v43  ;;  %v7348_v53 = vsel %vm7322_vm9, %v7343_v1, %v756_v55  ;;  %v1142_v61 = vsel %vm1128_vm5, %v1139_v48, %v1141_v19  ;;  %v905_v58 = vand.u32 2147483647, %v904_v4 }
  0xe7   :  { %vm1044_vm10 = vcmp.lt.s32.totalorder %v7336_v22, 0  ;;  %v1045_v46 = vsub.s32 0, %v7336_v22  ;;  %v1146_v18 = vand.u32 65535, %v1142_v61  ;;  %v1147_v8 = vshrl.u32 %v1142_v61, 16 }
  0xe8   :  { %v907_v39 = vcvt.s32.f32 %v900_v2  ;;  %v1168_v15 = vand.u32 65535, %v1138_v24  ;;  %v1169_v51 = vshrl.u32 %v1138_v24, 16  ;;  %v7362_v55 = vsel %vm471_vm3, %v7198_v0, %v9884_v36 }
  0xe9   :  { %v1046_v43 = vsel %vm1044_vm10, %v1045_v46, %v7336_v22  ;;  %v1148_v62 = vmul.u32 %v1146_v18, %v1144_v42  ;;  %v1149_v26 = vmul.u32 %v1147_v8, %v1144_v42  ;;  %v7355_v63 = vmul.u32 %v1146_v18, %v1145_v20 }
  0xea   :  { %v10021_v9 = vxor.u32 2147483648, %v7198_v0  ;;  %v7372_v4 = vmul.f32 %v611_v41, %v7205_v44  ;;  %v1047_v48 = vclz %v1046_v43  ;;  %v1151_v29 = vmul.u32 %v1147_v8, %v1145_v20 }
  0xeb   :  { %v1152_v24 = vshll.u32 %v1149_v26, 16  ;;  %v1154_v19 = vshll.u32 %v7355_v63, 16  ;;  %v1171_v61 = vmul.u32 %v1169_v51, %v1144_v42  ;;  %v619_v46 = vmul.f32 %v618_v49, %v7205_v44 }
  0xec   :  { %v7369_v2 = vsel %vm474_vm13, %v10021_v9, %v7234_v47  ;;  %v7378_v18 = vmul.f32 %v7348_v53, %v7348_v53  ;;  %v908_v36 = vmul.f32 %v907_v39, %v905_v58  ;;  %v6213_v56 = vadd.s32 4294967294, %v1047_v48 }
  0xed   :  { %vm789_vm11 = vcmp.lt.s32.totalorder %v6856_v3, 0  ;;  %v1111_v41 = vshrl.u32 %v9890_v50, %v7264_v23  ;;  %vm1156_vm12 = vc.u32 %v1148_v62, %v1152_v24  ;;  %v1158_v43 = vadd.s32 %v1152_v24, %v1148_v62 }
  0xee   :  { %v1172_v8 = vmul.u32 %v1168_v15, %v1145_v20  ;;  %v1035_v9 = vadd.s32 %v7266_v7, %v7270_v16  ;;  %vm6214_vm14 = vcmp.lt.s32.totalorder %v6213_v56, 0  ;;  %v1157_v44 = vsel %vm1156_vm12, 1, %v9896_v12  ;;  %v7389_v16 = vld [vmem:[#allocation2 + $0x78] sm:$0xff] }
  0xef   :  { %v1170_v49 = vmul.u32 %v1168_v15, %v1144_v42  ;;  %vm470_vm1 = vcmp.lt.s32.totalorder %v7226_v14, 2  ;;  %v1050_v52 = vsel %vm6214_vm14, 0, %v6213_v56  ;;  %v1159_v58 = vadd.s32 %v1157_v44, %v1151_v29  ;;  %10022 = vst [vmem:[#allocation16_spill] sm:$0xff] %v7389_v16 }
  0xf0   :  { %vm1160_vm3 = vc.u32 %v1158_v43, %v1154_v19  ;;  %v1174_v39 = vshll.u32 %v1171_v61, 16  ;;  %v762_v48 = vmul.f32 -0.001358992, %v7378_v18  ;;  %v1051_v10 = vsub.s32 32, %v1050_v52 }
  0xf1   :  { %v1055_v23 = vsub.s32 4294967266, %v1050_v52  ;;  %v1153_v50 = vshrl.u32 %v1149_v26, 16  ;;  %v909_v62 = vxor.u32 2147483648, %v908_v36  ;;  %v1161_v24 = vsel %vm1160_vm3, 1, %v9896_v12 }
  0xf2   :  { %v1173_v57 = vmul.u32 %v1169_v51, %v1145_v20  ;;  %v1176_v7 = vshll.u32 %v1172_v8, 16  ;;  %v1052_v42 = vshll.u32 %v7336_v22, %v1050_v52  ;;  %v1053_v15 = vshrl.u32 %v1035_v9, %v1051_v10 }
  0xf3   :  { %v1056_v0 = vadd.s32 127, %v1055_v23  ;;  %v1163_v56 = vadd.s32 %v1161_v24, %v1159_v58  ;;  %v1131_v29 = vsel %vm1127_vm15, %v1111_v41, %v7291_v34  ;;  %v1132_v26 = vsel %vm1130_vm7, %v7295_v54, 2102212464 }
  0xf4   :  { %vm1178_vm13 = vc.u32 %v1170_v49, %v1174_v39  ;;  %v1180_v19 = vadd.s32 %v1174_v39, %v1170_v49  ;;  %v1155_v20 = vshrl.u32 %v7355_v63, 16  ;;  %v1175_v52 = vshrl.u32 %v1171_v61, 16 }
  0xf5   :  { %v1057_v43 = vshll.u32 %v1056_v0, 23  ;;  %v1164_v51 = vadd.s32 %v1163_v56, %v1153_v50  ;;  %v1179_v44 = vsel %vm1178_vm13, 1, %v9896_v12  ;;  %v1252_v22 = vand.u32 2139095040, %v7389_v16 }
  0xf6   :  { %v1181_v10 = vadd.s32 %v1179_v44, %v1173_v57  ;;  %vm1182_vm10 = vc.u32 %v1180_v19, %v1176_v7  ;;  %v1054_v9 = vor.u32 %v1053_v15, %v1052_v42  ;;  %v1133_v34 = vsel %vm1129_vm6, %v7293_v11, %v1132_v26 }
  0xf7   :  { %v1058_v58 = vor.u32 4788187, %v1057_v43  ;;  %v1183_v54 = vsel %vm1182_vm10, 1, %v9896_v12  ;;  %v10023_v0 = vand.u32 2147483647, %v6856_v3  ;;  %v1177_v50 = vshrl.u32 %v1172_v8, 16 }
  0xf8   :  { %v1185_v61 = vadd.s32 %v1183_v54, %v1181_v10  ;;  %v1253_v57 = vshrl.u32 %v1252_v22, 23  ;;  %v769_v41 = vmul.f32 -0.00019511016, %v7378_v18  ;;  %v910_v49 = vsel %vm789_vm11, %v909_v62, %v908_v36 }
  0xf9   :  { %vm7407_vm15 = vcmp.le.f32.partialorder %v10023_v0, 0.7853982  ;;  %v7414_v39 = vadd.s32 %v1164_v51, %v1155_v20  ;;  %v7416_v23 = vadd.s32 %v1180_v19, %v1176_v7  ;;  %v763_v11 = vadd.f32 0.041655596, %v762_v48  ;;  %v7431_v48 = vld [vmem:[#allocation2 + $0x60] sm:$0xff] }
  0xfa   :  { %v1134_v24 = vsel %vm1128_vm5, %v1131_v29, %v1133_v34  ;;  %v1186_v42 = vadd.s32 %v1185_v61, %v1175_v52  ;;  %v6218_v15 = vadd.s32 4294967169, %v1253_v57  ;;  %v7424_v8 = vsel %vm470_vm1, %v7362_v55, %v7369_v2 }
  0xfb   :  { %10026 = vst [vmem:[#allocation17_spill] sm:$0xff] %v7424_v8  ;;  %v7429_v36 = vsel %vm7126_vm2, 0, %v7231_v17  ;;  %v1059_v62 = vand.u32 2147483647, %v1058_v58  ;;  %v1061_v7 = vcvt.s32.f32 %v1054_v9  ;;  %v620_v56 = vadd.f32 1.0, %v619_v46 }
  0xfc   :  { %10027 = vst [vmem:[#allocation18_spill] sm:$0xff] %v7429_v36  ;;  %v7436_v31 = vsel %vm7407_vm15, %v7431_v48, %v910_v49  ;;  %v1187_v29 = vadd.s32 %v1186_v42, %v1177_v50  ;;  %v1259_v26 = vadd.s32 1, %v6218_v15  ;;  %v7439_v14 = vadd.f32 1.0, %v7372_v4 }
  0xfd   :  { %v757_v55 = vsub.s32 4, %v7022_v30  ;;  %v1188_v6 = vmul.u32 %v7303_v59, %v1134_v24  ;;  %vm1190_vm2 = vc.u32 %v7414_v39, %v7416_v23  ;;  %v764_v17 = vmul.f32 %v763_v11, %v7378_v18 }
  0xfe   :  { %v770_v2 = vadd.f32 0.008332121, %v769_v41  ;;  %v1191_v46 = vadd.s32 1, %v1187_v29  ;;  %vm1260_vm6 = vcmp.gt.s32.totalorder %v1259_v26, 0  ;;  %v7447_v19 = vand.u32 3, %v7429_v36 }
  0xff   :  { %v7451_v43 = vmul.f32 %v7436_v31, %v7436_v31  ;;  %v1062_v4 = vmul.f32 %v1061_v7, %v1059_v62  ;;  %v1261_v20 = vsel %vm1260_vm6, %v1259_v26, 0  ;;  %v7454_v51 = vmul.f32 %v620_v56, %v7189_v21 }
 0x100   :  { %v1192_v59 = vsel %vm1190_vm2, %v1191_v46, %v1187_v29  ;;  %v9895_v44 = vand.u32 2147483647, %v7389_v16  ;;  %v1263_v52 = vand.u32 31, %v1261_v20  ;;  %v758_v22 = vsel %vm635_vm8, %v757_v55, %v7022_v30 }
 0x101   :  { %v911_v9 = vsub.s32 4, %v7143_v40  ;;  %v1193_v58 = vadd.s32 %v1192_v59, %v1188_v6  ;;  %v765_v34 = vadd.f32 -0.4999988, %v764_v17  ;;  %v771_v54 = vmul.f32 %v770_v2, %v7378_v18 }
 0x102   :  { %vm943_vm7 = vcmp.lt.s32.totalorder %v7064_v25, 0  ;;  %v7464_v21 = vsub.s32 32, %v1263_v52  ;;  %v916_v0 = vmul.f32 -0.001358992, %v7451_v43  ;;  %v923_v50 = vmul.f32 -0.00019511016, %v7451_v43 }
 0x103   :  { %v1063_v61 = vxor.u32 2147483648, %v1062_v4  ;;  %v1194_v57 = vadd.s32 536870912, %v1193_v58  ;;  %v1256_v33 = vand.u32 8388607, %v9895_v44  ;;  %v10028_v30 = vmov 683565275  }
 0x104   :  { %v1266_v41 = vshll.u32 %v10028_v30, %v1263_v52  ;;  %v10029_v49 = vmov 2475754826   ;;  %v10030_v24 = vmov 2102212464   ;;  %v10031_v7 = vmov 2131351028  }
 0x105   :  { %v1269_v11 = vshll.u32 %v10029_v49, %v1263_v52  ;;  %v1275_v42 = vshll.u32 %v10030_v24, %v1263_v52  ;;  %v7473_v15 = vshrl.u32 %v1194_v57, 30  ;;  %v1267_v62 = vshrl.u32 %v10029_v49, %v7464_v21 }
 0x106   :  { %v1270_v56 = vshrl.u32 %v10031_v7, %v7464_v21  ;;  %v1276_v29 = vshrl.u32 %v10016_v35, %v7464_v21  ;;  %v772_v26 = vadd.f32 -0.16666654, %v771_v54  ;;  %v7481_v55 = vshrl.u32 %v1261_v20, 5 }
 0x107   :  { %v1272_v6 = vshll.u32 %v10031_v7, %v1263_v52  ;;  %v1273_v17 = vshrl.u32 %v10030_v24, %v7464_v21  ;;  %v924_v2 = vadd.f32 0.008332121, %v923_v50  ;;  %v10032_v46 = vand.u32 2147483647, %v7064_v25 }
 0x108   :  { %v1064_v57 = vsel %vm943_vm7, %v1063_v61, %v1062_v4  ;;  %v1196_v44 = vshll.u32 %v7473_v15, 30  ;;  %v1257_v54 = vor.u32 8388608, %v1256_v33  ;;  %v1277_v20 = vor.u32 %v1276_v29, %v1275_v42 }
 0x109   :  { %vm7488_vm8 = vcmp.le.f32.partialorder %v10032_v46, 0.7853982  ;;  %v1278_v10 = vshll.u32 %v10016_v35, %v1263_v52  ;;  %v1279_v12 = vshrl.u32 %v10017_v45, %v7464_v21  ;;  %v917_v47 = vadd.f32 0.041655596, %v916_v0 }
 0x10a   :  { %v7498_v50 = vsub.s32 %v1193_v58, %v1196_v44  ;;  %v7500_v13 = vor.u32 %v1267_v62, %v1266_v41  ;;  %v7502_v46 = vor.u32 %v1270_v56, %v1269_v11  ;;  %v7507_v4 = vsel %vm7488_vm8, %v7064_v25, %v1064_v57  ;;  %v7669_v25 = vld [vmem:[#allocation2 + $0x28] sm:$0xff] }
 0x10b   :  { %v7509_v61 = vor.u32 %v1273_v17, %v1272_v6  ;;  %vm1281_vm5 = vcmp.lt.s32.totalorder %v7481_v55, 1  ;;  %vm1284_vm12 = vcmp.lt.s32.totalorder %v7481_v55, 4  ;;  %v925_v52 = vmul.f32 %v924_v2, %v7451_v43 }
 0x10c   :  { %vm1198_vm14 = vcmp.lt.s32.totalorder %v7498_v50, 0  ;;  %v1199_v44 = vsub.s32 0, %v7498_v50  ;;  %vm1283_vm1 = vcmp.lt.s32.totalorder %v7481_v55, 3  ;;  %v7519_v58 = vsel %vm7322_vm9, 0, %v758_v22  ;;  %v7535_v22 = vld [vmem:[#allocation4 + $0x20] sm:$0xff] }
 0x10d   :  { %v1280_v0 = vor.u32 %v1279_v12, %v1278_v10  ;;  %v1290_v33 = vsel %vm1284_vm12, %v1277_v20, 920167782  ;;  %v7523_v41 = vshll.u32 %v1257_v54, 8  ;;  %v7527_v11 = vmul.f32 %v7507_v4, %v7507_v4  ;;  %10035 = vst [vmem:[#allocation19_spill] sm:$0xff] %v7535_v22 }
 0x10e   :  { %v1200_v42 = vsel %vm1198_vm14, %v1199_v44, %v7498_v50  ;;  %vm1282_vm3 = vcmp.lt.s32.totalorder %v7481_v55, 2  ;;  %v1289_v37 = vsel %vm1281_vm5, %v7500_v13, %v7502_v46  ;;  %v7538_v12 = vmul.f32 %v765_v34, %v7378_v18 }
 0x10f   :  { %v7543_v10 = vsel %vm789_vm11, %v911_v9, %v7143_v40  ;;  %v1201_v62 = vclz %v1200_v42  ;;  %v1291_v56 = vsel %vm1283_vm1, %v7509_v61, %v1290_v33  ;;  %v7549_v29 = vmul.f32 %v772_v26, %v7378_v18 }
 0x110   :  { %v918_v6 = vmul.f32 %v917_v47, %v7451_v43  ;;  %v926_v17 = vadd.f32 -0.16666654, %v925_v52  ;;  %v1293_v34 = vsel %vm1281_vm5, %v7502_v46, %v7509_v61  ;;  %v1189_v3 = vadd.s32 %v7416_v23, %v7414_v39 }
 0x111   :  { %v6216_v40 = vadd.s32 4294967294, %v1201_v62  ;;  %v1292_v9 = vsel %vm1282_vm3, %v1289_v37, %v1291_v56  ;;  %v1294_v2 = vsel %vm1284_vm12, %v1280_v0, 1326507024  ;;  %v1077_v18 = vmul.f32 -0.00019511016, %v7527_v11 }
 0x112   :  { %v1295_v47 = vsel %vm1283_vm1, %v1277_v20, %v1294_v2  ;;  %v1298_v26 = vand.u32 65535, %v7523_v41  ;;  %v2646_v57 = vand.u32 2139095040, %v7535_v22  ;;  %v1070_v54 = vmul.f32 -0.001358992, %v7527_v11 }
 0x113   :  { %vm6217_vm9 = vcmp.lt.s32.totalorder %v6216_v40, 0  ;;  %v1296_v39 = vsel %vm1282_vm3, %v1293_v34, %v1295_v47  ;;  %v1299_v23 = vshrl.u32 %v7523_v41, 16  ;;  %v1323_v33 = vshrl.u32 %v1292_v9, 16 }
 0x114   :  { %v1204_v52 = vsel %vm6217_vm9, 0, %v6216_v40  ;;  %v1300_v44 = vand.u32 65535, %v1296_v39  ;;  %v1301_v0 = vshrl.u32 %v1296_v39, 16  ;;  %v7571_v42 = vadd.f32 -0.4999988, %v918_v6 }
 0x115   :  { %v1205_v37 = vsub.s32 32, %v1204_v52  ;;  %v1206_v20 = vshll.u32 %v7498_v50, %v1204_v52  ;;  %v1209_v62 = vsub.s32 4294967266, %v1204_v52  ;;  %v7575_v56 = vmul.f32 %v926_v17, %v7451_v43 }
 0x116   :  { %v1078_v2 = vadd.f32 0.008332121, %v1077_v18  ;;  %v1322_v32 = vand.u32 65535, %v1292_v9  ;;  %v7577_v36 = vshrl.u32 %v2646_v57, 23  ;;  %v1302_v28 = vmul.u32 %v1300_v44, %v1298_v26 }
 0x117   :  { %v1207_v34 = vshrl.u32 %v1189_v3, %v1205_v37  ;;  %v1210_v47 = vadd.s32 127, %v1209_v62  ;;  %v1303_v40 = vmul.u32 %v1301_v0, %v1298_v26  ;;  %v1071_v60 = vadd.f32 0.041655596, %v1070_v54 }
 0x118   :  { %vm1097_vm11 = vcmp.lt.s32.totalorder %v7164_v27, 0  ;;  %v1265_v6 = vshrl.u32 %v10028_v30, %v7464_v21  ;;  %v1304_v39 = vmul.u32 %v1300_v44, %v1299_v23  ;;  %v1325_v50 = vmul.u32 %v1323_v33, %v1298_v26 }
 0x119   :  { %v10036_v52 = vand.u32 2147483647, %v7164_v27  ;;  %v1208_v9 = vor.u32 %v1207_v34, %v1206_v20  ;;  %v1211_v18 = vshll.u32 %v1210_v47, 23  ;;  %v1305_v3 = vmul.u32 %v1301_v0, %v1299_v23 }
 0x11a   :  { %v1306_v57 = vshll.u32 %v1303_v40, 16  ;;  %v1079_v37 = vmul.f32 %v1078_v2, %v7527_v11  ;;  %v1308_v54 = vshll.u32 %v1304_v39, 16  ;;  %v1324_v62 = vmul.u32 %v1322_v32, %v1298_v26 }
 0x11b   :  { %vm7584_vm13 = vcmp.le.f32.partialorder %v10036_v52, 0.7853982  ;;  %v1326_v16 = vmul.u32 %v1322_v32, %v1299_v23  ;;  %v1212_v45 = vor.u32 4788187, %v1211_v18  ;;  %v1215_v7 = vcvt.s32.f32 %v1208_v9 }
 0x11c   :  { %vm1310_vm10 = vc.u32 %v1302_v28, %v1306_v57  ;;  %v1312_v21 = vadd.s32 %v1306_v57, %v1302_v28  ;;  %v10039_v44 = vmov 0   ;;  %v1327_v35 = vmul.u32 %v1323_v33, %v1299_v23 }
 0x11d   :  { %v1311_v49 = vsel %vm1310_vm10, 1, %v10039_v44  ;;  %v1328_v52 = vshll.u32 %v1325_v50, 16  ;;  %v1330_v24 = vshll.u32 %v1326_v16, 16  ;;  %v1213_v30 = vand.u32 2147483647, %v1212_v45 }
 0x11e   :  { %v1307_v8 = vshrl.u32 %v1303_v40, 16  ;;  %v1313_v20 = vadd.s32 %v1311_v49, %v1305_v3  ;;  %vm1314_vm2 = vc.u32 %v1312_v21, %v1308_v54  ;;  %vm628_vm6 = vcmp.eq.s32.totalorder %v7447_v19, 2 }
 0x11f   :  { %v1286_v26 = vsel %vm1284_vm12, %v7509_v61, 2102212464  ;;  %v1315_v32 = vsel %vm1314_vm2, 1, %v10039_v44  ;;  %vm1332_vm14 = vc.u32 %v1324_v62, %v1328_v52  ;;  %v1334_v0 = vadd.s32 %v1328_v52, %v1324_v62 }
 0x120   :  { %v1216_v28 = vmul.f32 %v1215_v7, %v1213_v30  ;;  %v1309_v2 = vshrl.u32 %v1304_v39, 16  ;;  %v1317_v34 = vadd.s32 %v1315_v32, %v1313_v20  ;;  %v1333_v23 = vsel %vm1332_vm14, 1, %v10039_v44 }
 0x121   :  { %v1285_v45 = vsel %vm1281_vm5, %v1265_v6, %v7500_v13  ;;  %v1329_v49 = vshrl.u32 %v1325_v50, 16  ;;  %v1335_v33 = vadd.s32 %v1333_v23, %v1327_v35  ;;  %vm1336_vm9 = vc.u32 %v1334_v0, %v1330_v24 }
 0x122   :  { %v1217_v47 = vxor.u32 2147483648, %v1216_v28  ;;  %v1287_v61 = vsel %vm1283_vm1, %v7502_v46, %v1286_v26  ;;  %v1318_v40 = vadd.s32 %v1317_v34, %v1307_v8  ;;  %v1337_v9 = vsel %vm1336_vm9, 1, %v10039_v44 }
 0x123   :  { %v1072_v30 = vmul.f32 %v1071_v60, %v7527_v11  ;;  %v1080_v7 = vadd.f32 -0.16666654, %v1079_v37  ;;  %v1331_v39 = vshrl.u32 %v1326_v16, 16  ;;  %v1339_v18 = vadd.s32 %v1337_v9, %v1335_v33 }
 0x124   :  { %v774_v3 = vadd.f32 1.0, %v7549_v29  ;;  %v1218_v13 = vsel %vm1097_vm11, %v1217_v47, %v1216_v28  ;;  %v7607_v35 = vadd.s32 %v1318_v40, %v1309_v2  ;;  %v7609_v6 = vadd.s32 %v1334_v0, %v1330_v24 }
 0x125   :  { %vm625_vm5 = vcmp.eq.s32.totalorder %v7447_v19, 0  ;;  %v920_v8 = vmul.f32 %v7571_v42, %v7451_v43  ;;  %v7617_v60 = vsel %vm7584_vm13, %v7164_v27, %v1218_v13  ;;  %v1288_v16 = vsel %vm1282_vm3, %v1285_v45, %v1287_v61 }
 0x126   :  { %v1340_v46 = vadd.s32 %v1339_v18, %v1329_v49  ;;  %v7622_v29 = vand.u32 3, %v7519_v58  ;;  %v7627_v24 = vsel %vm7407_vm15, 0, %v7543_v10  ;;  %v928_v50 = vadd.f32 1.0, %v7575_v56 }
 0x127   :  { %v6245_v43 = vadd.s32 4294967169, %v7577_v36  ;;  %v1065_v42 = vsub.s32 4, %v7307_v38  ;;  %v1073_v57 = vadd.f32 -0.4999988, %v1072_v30  ;;  %v1081_v37 = vmul.f32 %v1080_v7, %v7527_v11 }
 0x128   :  { %v1341_v55 = vadd.s32 %v1340_v46, %v1331_v39  ;;  %v7634_v54 = vadd.f32 1.0, %v7538_v12  ;;  %v7638_v62 = vmul.f32 %v7617_v60, %v7617_v60  ;;  %v1342_v63 = vmul.u32 %v7523_v41, %v1288_v16 }
 0x129   :  { %vm1344_vm15 = vc.u32 %v7607_v35, %v7609_v6  ;;  %v7644_v36 = vmul.f32 %v774_v3, %v7348_v53  ;;  %v7646_v10 = vadd.f32 1.0, %v920_v8  ;;  %v931_v56 = vand.u32 3, %v7627_v24 }
 0x12a   :  { %v1345_v21 = vadd.s32 1, %v1341_v55  ;;  %vm624_vm12 = vcmp.lt.s32.totalorder %v7447_v19, 2  ;;  %v9922_v12 = vxor.u32 2147483648, %v7454_v51  ;;  %v10040_v52 = vxor.u32 2147483648, %v7439_v14 }
 0x12b   :  { %v7657_v20 = vmul.f32 %v928_v50, %v7436_v31  ;;  %v2653_v53 = vadd.s32 1, %v6245_v43  ;;  %v1066_v26 = vsel %vm943_vm7, %v1065_v42, %v7307_v38  ;;  %v1074_v32 = vmul.f32 %v1073_v57, %v7527_v11 }
 0x12c   :  { %v630_v41 = vsel %vm628_vm6, %v10040_v52, %v7454_v51  ;;  %v1082_v0 = vadd.f32 1.0, %v1081_v37  ;;  %v1346_v28 = vsel %vm1344_vm15, %v1345_v21, %v1341_v55  ;;  %vm779_vm1 = vcmp.eq.s32.totalorder %v7622_v29, 0 }
 0x12d   :  { %vm782_vm3 = vcmp.eq.s32.totalorder %v7622_v29, 2  ;;  %v1231_v2 = vmul.f32 -0.00019511016, %v7638_v62  ;;  %v1347_v34 = vadd.s32 %v1346_v28, %v1342_v63  ;;  %v9921_v23 = vxor.u32 2147483648, %v7644_v36 }
 0x12e   :  { %v9920_v31 = vxor.u32 2147483648, %v7634_v54  ;;  %vm933_vm10 = vcmp.eq.s32.totalorder %v931_v56, 0  ;;  %v9918_v45 = vxor.u32 2147483648, %v7646_v10  ;;  %vm468_vm7 = vweird.f32 %v7669_v25 }
 0x12f   :  { %vm622_vm2 = vweird.f32 %v7102_v5  ;;  %v9919_v38 = vxor.u32 2147483648, %v7657_v20  ;;  %v7676_v11 = vsel %vm7488_vm8, 0, %v1066_v26  ;;  %v1348_v49 = vadd.s32 536870912, %v1347_v34 }
 0x130   :  { %vm2654_vm6 = vcmp.gt.s32.totalorder %v2653_v53, 0  ;;  %vm936_vm14 = vcmp.eq.s32.totalorder %v931_v56, 2  ;;  %v7678_v33 = vadd.f32 1.0, %v1074_v32  ;;  %v7681_v47 = vmul.f32 %v1082_v0, %v7507_v4  ;;  %v10041_v32 = vld [vmem:[#allocation17_spill] sm:$0xff] }
 0x131   :  { %v1085_v61 = vand.u32 3, %v7676_v11  ;;  %v627_v40 = vsel %vm625_vm5, %v7439_v14, %v9922_v12  ;;  %v1224_v59 = vmul.f32 -0.001358992, %v7638_v62  ;;  %v1232_v9 = vadd.f32 0.008332121, %v1231_v2  ;;  %v7755_v2 = vld [vmem:[#allocation2 + $0x68] sm:$0xff] }
 0x132   :  { %v7690_v30 = vshrl.u32 %v1348_v49, 30  ;;  %vm778_vm8 = vcmp.lt.s32.totalorder %v7622_v29, 2  ;;  %v781_v4 = vsel %vm779_vm1, %v7634_v54, %v9921_v23  ;;  %v784_v7 = vsel %vm782_vm3, %v9920_v31, %v7644_v36  ;;  %10046 = vst [vmem:[#allocation23_spill] sm:$0xff] %v7755_v2 }
 0x133   :  { %v2655_v39 = vsel %vm2654_vm6, %v2653_v53, 0  ;;  %vm932_vm9 = vcmp.lt.s32.totalorder %v931_v56, 2  ;;  %v935_v18 = vsel %vm933_vm10, %v7646_v10, %v9919_v38  ;;  %v938_v3 = vsel %vm936_vm14, %v9918_v45, %v7657_v20 }
 0x134   :  { %v1350_v13 = vshll.u32 %v7690_v30, 30  ;;  %v9917_v8 = vxor.u32 2147483648, %v7681_v47  ;;  %vm1090_vm5 = vcmp.eq.s32.totalorder %v1085_v61, 2  ;;  %v9916_v16 = vxor.u32 2147483648, %v7678_v33 }
 0x135   :  { %v1219_v46 = vsub.s32 4, %v7473_v15  ;;  %v1225_v50 = vadd.f32 0.041655596, %v1224_v59  ;;  %v1233_v43 = vmul.f32 %v1232_v9, %v7638_v62  ;;  %v2657_v57 = vand.u32 31, %v2655_v39 }
 0x136   :  { %v7715_v42 = vsub.s32 %v1347_v34, %v1350_v13  ;;  %v631_v37 = vsel %vm624_vm12, %v627_v40, %v630_v41  ;;  %vm776_vm15 = vweird.f32 %v7343_v1  ;;  %vm9926_vm1 = vweird.f32 %v7431_v48 }
 0x137   :  { %vm1087_vm3 = vcmp.eq.s32.totalorder %v1085_v61, 0  ;;  %v785_v55 = vsel %vm778_vm8, %v781_v4, %v784_v7  ;;  %v939_v63 = vsel %vm932_vm9, %v935_v18, %v938_v3  ;;  %v9915_v52 = vand.u32 2147483647, %v7535_v22 }
 0x138   :  { %v1353_v21 = vsub.s32 0, %v7715_v42  ;;  %vm1086_vm10 = vcmp.lt.s32.totalorder %v1085_v61, 2  ;;  %v1092_v19 = vsel %vm1090_vm5, %v9916_v16, %v7681_v47  ;;  %v1220_v41 = vsel %vm1097_vm11, %v1219_v46, %v7473_v15  ;;  %v10054_v16 = vld [vmem:[#allocation16_spill] sm:$0xff] }
 0x139   :  { %vm1352_vm12 = vcmp.lt.s32.totalorder %v7715_v42, 0  ;;  %v1089_v29 = vsel %vm1087_vm3, %v7678_v33, %v9917_v8  ;;  %v1226_v56 = vmul.f32 %v1225_v50, %v7638_v62  ;;  %v1234_v53 = vadd.f32 -0.16666654, %v1233_v43 }
 0x13a   :  { %v2658_v26 = vsub.s32 32, %v2657_v57  ;;  %v7741_v0 = vsel %vm468_vm7, nan, %v10041_v32  ;;  %v7745_v28 = vsel %vm622_vm2, nan, %v631_v37  ;;  %v7749_v27 = vsel %vm776_vm15, nan, %v785_v55  ;;  %v7777_v37 = vld [vmem:[#allocation4 + $0x28] sm:$0xff] }
 0x13b   :  { %10042 = vst [vmem:[#allocation17_spill] sm:$0xff] %v7741_v0  ;;  %v7753_v15 = vsel %vm9926_vm1, nan, %v939_v63  ;;  %vm9925_vm11 = vweird.f32 %v7755_v2  ;;  %v7760_v34 = vsel %vm7584_vm13, 0, %v1220_v41  ;;  %v1354_v49 = vsel %vm1352_vm12, %v1353_v21, %v7715_v42 }
 0x13c   :  { %10043 = vst [vmem:[#allocation20_spill] sm:$0xff] %v7745_v28  ;;  %v7765_v40 = vand.u32 8388607, %v9915_v52  ;;  %v1093_v59 = vsel %vm1086_vm10, %v1089_v29, %v1092_v19  ;;  %v7769_v9 = vand.u32 3, %v7760_v34  ;;  %v7771_v4 = vshrl.u32 %v2655_v39, 5 }
 0x13d   :  { %10044 = vst [vmem:[#allocation21_spill] sm:$0xff] %v7749_v27  ;;  %v10047_v7 = vmov 683565275   ;;  %v1227_v3 = vadd.f32 -0.4999988, %v1226_v56  ;;  %v1235_v17 = vmul.f32 %v1234_v53, %v7638_v62  ;;  %v1355_v55 = vclz %v1354_v49  ;;  %v10055_v49 = vld [vmem:[#allocation8_spill] sm:$0xff] }
 0x13e   :  { %10045 = vst [vmem:[#allocation22_spill] sm:$0xff] %v7753_v15  ;;  %v2660_v18 = vshll.u32 %v10047_v7, %v2657_v57  ;;  %v10048_v13 = vmov 2102212464   ;;  %v10049_v50 = vmov 920167782   ;;  %v7788_v52 = vsel %vm9925_vm11, nan, %v1093_v59 }
 0x13f   :  { %v2669_v46 = vshll.u32 %v10048_v13, %v2657_v57  ;;  %v2670_v43 = vshrl.u32 %v10049_v50, %v2658_v26  ;;  %v10050_v63 = vmov 2475754826   ;;  %v10051_v21 = vmov 2131351028   ;;  %10053 = vst [vmem:[#allocation24_spill] sm:$0xff] %v7788_v52 }
 0x140   :  { %v2663_v61 = vshll.u32 %v10050_v63, %v2657_v57  ;;  %v2666_v19 = vshll.u32 %v10051_v21, %v2657_v57  ;;  %v2667_v41 = vshrl.u32 %v10048_v13, %v2658_v26  ;;  %v2661_v39 = vshrl.u32 %v10050_v63, %v2658_v26 }
 0x141   :  { %v2664_v29 = vshrl.u32 %v10051_v21, %v2658_v26  ;;  %v2672_v56 = vshll.u32 %v10049_v50, %v2657_v57  ;;  %v10052_v53 = vmov 1326507024   ;;  %vm1251_vm13 = vcmp.lt.s32.totalorder %v10054_v16, 0 }
 0x142   :  { %v2673_v32 = vshrl.u32 %v10052_v53, %v2658_v26  ;;  %v1547_v8 = vadd.s32 3, %v10055_v49  ;;  %v2651_v45 = vor.u32 8388608, %v7765_v40  ;;  %v1228_v38 = vmul.f32 %v1227_v3, %v7638_v62  ;;  %v10059_v62 = vld [vmem:[#allocation13_spill] sm:$0xff] }
 0x143   :  { %v1236_v31 = vadd.f32 1.0, %v1235_v17  ;;  %v2671_v23 = vor.u32 %v2670_v43, %v2669_v46  ;;  %vm1241_vm6 = vcmp.eq.s32.totalorder %v7769_v9, 0  ;;  %vm1244_vm14 = vcmp.eq.s32.totalorder %v7769_v9, 2 }
 0x144   :  { %v6219_v57 = vadd.s32 4294967294, %v1355_v55  ;;  %v2659_v59 = vshrl.u32 %v10047_v7, %v2658_v26  ;;  %v2668_v52 = vor.u32 %v2667_v41, %v2666_v19  ;;  %vm2678_vm8 = vcmp.lt.s32.totalorder %v7771_v4, 4 }
 0x145   :  { %v10056_v49 = vand.u32 2147483647, %v10054_v16  ;;  %v1702_v3 = vadd.s32 3, %v10059_v62  ;;  %v2662_v17 = vor.u32 %v2661_v39, %v2660_v18  ;;  %v2665_v46 = vor.u32 %v2664_v29, %v2663_v61 }
 0x146   :  { %v2674_v43 = vor.u32 %v2673_v32, %v2672_v56  ;;  %v1548_v12 = vand.u32 3, %v1547_v8  ;;  %vm2675_vm5 = vcmp.lt.s32.totalorder %v7771_v4, 1  ;;  %vm2677_vm3 = vcmp.lt.s32.totalorder %v7771_v4, 3 }
 0x147   :  { %vm7801_vm9 = vcmp.le.f32.partialorder %v10056_v49, 0.7853982  ;;  %v2680_v26 = vsel %vm2678_vm8, %v2668_v52, 2102212464  ;;  %v7810_v55 = vadd.f32 1.0, %v1228_v38  ;;  %v7813_v19 = vmul.f32 %v1236_v31, %v7617_v60  ;;  %v10060_v49 = vld [vmem:[#allocation18_spill] sm:$0xff] }
 0x148   :  { %vm1240_vm10 = vcmp.lt.s32.totalorder %v7769_v9, 2  ;;  %v1373_v41 = vsub.s32 4, %v7690_v30  ;;  %v2684_v18 = vsel %vm2678_vm8, %v2671_v23, 920167782  ;;  %v1343_v8 = vadd.s32 %v7609_v6, %v7607_v35 }
 0x149   :  { %vm6220_vm12 = vcmp.lt.s32.totalorder %v6219_v57, 0  ;;  %vm2676_vm0 = vcmp.lt.s32.totalorder %v7771_v4, 2  ;;  %v2679_v38 = vsel %vm2675_vm5, %v2659_v59, %v2662_v17  ;;  %v1703_v61 = vand.u32 3, %v1702_v3 }
 0x14a   :  { %v2681_v60 = vsel %vm2677_vm3, %v2665_v46, %v2680_v26  ;;  %v2683_v31 = vsel %vm2675_vm5, %v2662_v17, %v2665_v46  ;;  %v2688_v39 = vsel %vm2678_vm8, %v2674_v43, 1326507024  ;;  %vm1550_vm11 = vcmp.eq.s32.totalorder %v1548_v12, 0  ;;  %v10063_v26 = vld [vmem:[#allocation9_spill] sm:$0xff] }
 0x14b   :  { %vm1553_vm1 = vcmp.eq.s32.totalorder %v1548_v12, 2  ;;  %v2685_v35 = vsel %vm2677_vm3, %v2668_v52, %v2684_v18  ;;  %v2687_v6 = vsel %vm2675_vm5, %v2665_v46, %v2668_v52  ;;  %v9927_v29 = vxor.u32 2147483648, %v7813_v19  ;;  %v10061_v52 = vld [vmem:[#allocation10_spill] sm:$0xff] }
 0x14c   :  { %v9929_v56 = vxor.u32 2147483648, %v7810_v55  ;;  %v1358_v32 = vsel %vm6220_vm12, 0, %v6219_v57  ;;  %v1374_v59 = vsel %vm1251_vm13, %v1373_v41, %v7690_v30  ;;  %v1857_v62 = vadd.s32 3, %v10060_v49 }
 0x14d   :  { %v7842_v3 = vsel %vm2676_vm0, %v2679_v38, %v2681_v60  ;;  %v2689_v17 = vsel %vm2677_vm3, %v2671_v23, %v2688_v39  ;;  %v7846_v43 = vshll.u32 %v2651_v45, 8  ;;  %vm1549_vm8 = vcmp.lt.s32.totalorder %v1548_v12, 2 }
 0x14e   :  { %v10062_v46 = vxor.u32 2147483648, %v10061_v52  ;;  %v10064_v18 = vxor.u32 2147483648, %v10063_v26  ;;  %vm1705_vm5 = vcmp.eq.s32.totalorder %v1703_v61, 0  ;;  %v1363_v41 = vsub.s32 4294967266, %v1358_v32 }
 0x14f   :  { %v7856_v38 = vsel %vm7801_vm9, 0, %v1374_v59  ;;  %vm1708_vm12 = vcmp.eq.s32.totalorder %v1703_v61, 2  ;;  %v2690_v23 = vsel %vm2676_vm0, %v2687_v6, %v2689_v17  ;;  %v1243_v12 = vsel %vm1241_vm6, %v7810_v55, %v9927_v29  ;;  %v10065_v59 = vld [vmem:[#allocation15_spill] sm:$0xff]  ;;  %v10067_v6 = vld [vmem:[#allocation12_spill] sm:$0xff] }
 0x150   :  { %v1552_v57 = vsel %vm1550_vm11, %v10063_v26, %v10062_v46  ;;  %v1555_v30 = vsel %vm1553_vm1, %v10064_v18, %v10061_v52  ;;  %v1246_v45 = vsel %vm1244_vm14, %v9929_v56, %v7813_v19  ;;  %vm1704_vm1 = vcmp.lt.s32.totalorder %v1703_v61, 2 }
 0x151   :  { %v2686_v60 = vsel %vm2676_vm0, %v2683_v31, %v2685_v35  ;;  %v1556_v39 = vsel %vm1549_vm8, %v1552_v57, %v1555_v30  ;;  %v10066_v49 = vxor.u32 2147483648, %v10065_v59  ;;  %v2692_v52 = vand.u32 65535, %v7846_v43 }
 0x152   :  { %v2693_v46 = vshrl.u32 %v7846_v43, 16  ;;  %v10068_v26 = vxor.u32 2147483648, %v10067_v6  ;;  %v2694_v29 = vand.u32 65535, %v2690_v23  ;;  %v2695_v15 = vshrl.u32 %v2690_v23, 16 }
 0x153   :  { %v1707_v17 = vsel %vm1705_vm5, %v10067_v6, %v10066_v49  ;;  %v2716_v56 = vand.u32 65535, %v2686_v60  ;;  %v1247_v4 = vsel %vm1240_vm10, %v1243_v12, %v1246_v45  ;;  %v1359_v31 = vsub.s32 32, %v1358_v32 }
 0x154   :  { %v1710_v18 = vsel %vm1708_vm12, %v10068_v26, %v10065_v59  ;;  %v1364_v35 = vadd.s32 127, %v1363_v41  ;;  %v2717_v57 = vshrl.u32 %v2686_v60, 16  ;;  %v7884_v49 = vsel %vm314_vm4, nan, %v1556_v39  ;;  %v7888_v26 = vld [vmem:[#allocation2 + $0x70] sm:$0xff] }
 0x155   :  { %10070 = vst [vmem:[#allocation16_spill] sm:$0xff] %v7884_v49  ;;  %v2696_v27 = vmul.u32 %v2694_v29, %v2692_v52  ;;  %v2697_v28 = vmul.u32 %v2695_v15, %v2692_v52  ;;  %v2698_v0 = vmul.u32 %v2694_v29, %v2693_v46  ;;  %v1711_v2 = vsel %vm1704_vm1, %v1707_v17, %v1710_v18 }
 0x156   :  { %v1858_v6 = vand.u32 3, %v1857_v62  ;;  %v2012_v59 = vadd.s32 3, %v7519_v58  ;;  %v2719_v23 = vmul.u32 %v2717_v57, %v2692_v52  ;;  %vm1238_vm0 = vweird.f32 %v7888_v26 }
 0x157   :  { %v2699_v9 = vmul.u32 %v2695_v15, %v2693_v46  ;;  %v2700_v41 = vshll.u32 %v2697_v28, 16  ;;  %v2702_v12 = vshll.u32 %v2698_v0, 16  ;;  %v2718_v45 = vmul.u32 %v2716_v56, %v2692_v52 }
 0x158   :  { %v1360_v60 = vshll.u32 %v7715_v42, %v1358_v32  ;;  %v1361_v39 = vshrl.u32 %v1343_v8, %v1359_v31  ;;  %v1365_v30 = vshll.u32 %v1364_v35, 23  ;;  %v2720_v49 = vmul.u32 %v2716_v56, %v2693_v46 }
 0x159   :  { %vm2704_vm4 = vc.u32 %v2696_v27, %v2700_v41  ;;  %v2706_v61 = vadd.s32 %v2700_v41, %v2696_v27  ;;  %v2721_v29 = vmul.u32 %v2717_v57, %v2693_v46  ;;  %v2722_v62 = vshll.u32 %v2719_v23, 16 }
 0x15a   :  { %vm1860_vm11 = vcmp.eq.s32.totalorder %v1858_v6, 0  ;;  %vm1863_vm6 = vcmp.eq.s32.totalorder %v1858_v6, 2  ;;  %v2701_v58 = vshrl.u32 %v2697_v28, 16  ;;  %v2705_v17 = vsel %vm2704_vm4, 1, %v10039_v44 }
 0x15b   :  { %v2707_v18 = vadd.s32 %v2705_v17, %v2699_v9  ;;  %vm2708_vm14 = vc.u32 %v2706_v61, %v2702_v12  ;;  %v2724_v15 = vshll.u32 %v2720_v49, 16  ;;  %vm2726_vm3 = vc.u32 %v2718_v45, %v2722_v62 }
 0x15c   :  { %v1362_v22 = vor.u32 %v1361_v39, %v1360_v60  ;;  %v1366_v52 = vor.u32 4788187, %v1365_v30  ;;  %v2709_v42 = vsel %vm2708_vm14, 1, %v10039_v44  ;;  %v2727_v8 = vsel %vm2726_vm3, 1, %v10039_v44 }
 0x15d   :  { %v2711_v56 = vadd.s32 %v2709_v42, %v2707_v18  ;;  %v2728_v32 = vadd.s32 %v2722_v62, %v2718_v45  ;;  %v2729_v27 = vadd.s32 %v2727_v8, %v2721_v29  ;;  %v10071_v46 = vand.u32 2139095040, %v7777_v37 }
 0x15e   :  { %vm1859_vm10 = vcmp.lt.s32.totalorder %v1858_v6, 2  ;;  %v10072_v28 = vxor.u32 2147483648, %v7454_v51  ;;  %v2167_v57 = vadd.s32 3, %v7627_v24  ;;  %v2703_v9 = vshrl.u32 %v2698_v0, 16 }
 0x15f   :  { %v2801_v31 = vshrl.u32 %v10071_v46, 23  ;;  %v2712_v41 = vadd.s32 %v2711_v56, %v2701_v58  ;;  %v2723_v12 = vshrl.u32 %v2719_v23, 16  ;;  %vm2730_vm8 = vc.u32 %v2728_v32, %v2724_v15 }
 0x160   :  { %v1862_v35 = vsel %vm1860_vm11, %v7439_v14, %v10072_v28  ;;  %v1369_v39 = vcvt.s32.f32 %v1362_v22  ;;  %v10073_v45 = vxor.u32 2147483648, %v7439_v14  ;;  %v2731_v61 = vsel %vm2730_vm8, 1, %v10039_v44 }
 0x161   :  { %v6248_v60 = vadd.s32 4294967169, %v2801_v31  ;;  %v9936_v29 = vand.u32 2147483647, %v7777_v37  ;;  %v1367_v62 = vand.u32 2147483647, %v1366_v52  ;;  %v2725_v17 = vshrl.u32 %v2720_v49, 16 }
 0x162   :  { %v1865_v30 = vsel %vm1863_vm6, %v10073_v45, %v7454_v51  ;;  %v2733_v18 = vadd.s32 %v2731_v61, %v2729_v27  ;;  %v7910_v24 = vsel %vm1238_vm0, nan, %v1247_v4  ;;  %v7912_v0 = vand.u32 3, %v2012_v59 }
 0x163   :  { %v2807_v42 = vadd.s32 1, %v6248_v60  ;;  %10074 = vst [vmem:[#allocation8_spill] sm:$0xff] %v7910_v24  ;;  %v7914_v22 = vadd.s32 %v2712_v41, %v2703_v9  ;;  %v7916_v23 = vadd.s32 %v2728_v32, %v2724_v15  ;;  %v1866_v14 = vsel %vm1859_vm10, %v1862_v35, %v1865_v30 }
 0x164   :  { %v7919_v51 = vand.u32 3, %v2167_v57  ;;  %v2734_v58 = vadd.s32 %v2733_v18, %v2723_v12  ;;  %v7923_v49 = vsel %vm468_vm7, nan, %v1711_v2  ;;  %v7926_v52 = vadd.s32 3, %v7676_v11 }
 0x165   :  { %vm2808_vm5 = vcmp.gt.s32.totalorder %v2807_v42, 0  ;;  %10075 = vst [vmem:[#allocation13_spill] sm:$0xff] %v7923_v49  ;;  %v2804_v4 = vand.u32 8388607, %v9936_v29  ;;  %v1370_v8 = vmul.f32 %v1369_v39, %v1367_v62  ;;  %v7931_v15 = vand.u32 3, %v7856_v38 }
 0x166   :  { %v2809_v59 = vsel %vm2808_vm5, %v2807_v42, 0  ;;  %v2735_v6 = vadd.s32 %v2734_v58, %v2725_v17  ;;  %v7935_v32 = vsel %vm622_vm2, nan, %v1866_v14  ;;  %vm2015_vm7 = vcmp.eq.s32.totalorder %v7912_v0, 0 }
 0x167   :  { %v2811_v56 = vand.u32 31, %v2809_v59  ;;  %10076 = vst [vmem:[#allocation18_spill] sm:$0xff] %v7935_v32  ;;  %v2736_v25 = vmul.u32 %v7846_v43, %v7842_v3  ;;  %vm2738_vm12 = vc.u32 %v7914_v22, %v7916_v23  ;;  %vm2014_vm1 = vcmp.lt.s32.totalorder %v7912_v0, 2 }
 0x168   :  { %vm2018_vm4 = vcmp.eq.s32.totalorder %v7912_v0, 2  ;;  %vm2170_vm11 = vcmp.eq.s32.totalorder %v7919_v51, 0  ;;  %v2739_v11 = vadd.s32 1, %v2735_v6  ;;  %v2805_v5 = vor.u32 8388608, %v2804_v4  ;;  %v8032_v0 = vld [vmem:[#allocation4 + $0x30] sm:$0xff] }
 0x169   :  { %v7945_v2 = vsub.s32 32, %v2811_v56  ;;  %v7947_v27 = vshrl.u32 %v2809_v59, 5  ;;  %v2814_v46 = vshll.u32 %v10047_v7, %v2811_v56  ;;  %v2817_v31 = vshll.u32 %v10050_v63, %v2811_v56 }
 0x16a   :  { %v1371_v3 = vxor.u32 2147483648, %v1370_v8  ;;  %v2740_v43 = vsel %vm2738_vm12, %v2739_v11, %v2735_v6  ;;  %v2820_v9 = vshll.u32 %v10051_v21, %v2811_v56  ;;  %v2823_v12 = vshll.u32 %v10048_v13, %v2811_v56 }
 0x16b   :  { %v2815_v28 = vshrl.u32 %v10050_v63, %v7945_v2  ;;  %v2818_v35 = vshrl.u32 %v10051_v21, %v7945_v2  ;;  %v2741_v57 = vadd.s32 %v2740_v43, %v2736_v25  ;;  %v2821_v41 = vshrl.u32 %v10048_v13, %v7945_v2 }
 0x16c   :  { %v2824_v45 = vshrl.u32 %v10049_v50, %v7945_v2  ;;  %v2826_v30 = vshll.u32 %v10049_v50, %v2811_v56  ;;  %v2827_v62 = vshrl.u32 %v10052_v53, %v7945_v2  ;;  %vm2829_vm2 = vcmp.lt.s32.totalorder %v7947_v27, 1 }
 0x16d   :  { %v7959_v60 = vor.u32 %v2815_v28, %v2814_v46  ;;  %v7961_v39 = vor.u32 %v2818_v35, %v2817_v31  ;;  %v2742_v61 = vadd.s32 536870912, %v2741_v57  ;;  %v7969_v17 = vshll.u32 %v2805_v5, 8 }
 0x16e   :  { %v1372_v18 = vsel %vm1251_vm13, %v1371_v3, %v1370_v8  ;;  %v2822_v42 = vor.u32 %v2821_v41, %v2820_v9  ;;  %v2825_v14 = vor.u32 %v2824_v45, %v2823_v12  ;;  %vm2832_vm6 = vcmp.lt.s32.totalorder %v7947_v27, 4 }
 0x16f   :  { %v10077_v58 = vxor.u32 2147483648, %v7644_v36  ;;  %v7979_v59 = vshrl.u32 %v2742_v61, 30  ;;  %v2828_v6 = vor.u32 %v2827_v62, %v2826_v30  ;;  %vm2831_vm14 = vcmp.lt.s32.totalorder %v7947_v27, 3 }
 0x170   :  { %v10078_v56 = vxor.u32 2147483648, %v7634_v54  ;;  %vm2830_vm13 = vcmp.lt.s32.totalorder %v7947_v27, 2  ;;  %v2837_v25 = vsel %vm2829_vm2, %v7959_v60, %v7961_v39  ;;  %v2838_v11 = vsel %vm2832_vm6, %v2825_v14, 920167782 }
 0x171   :  { %v2017_v4 = vsel %vm2015_vm7, %v7634_v54, %v10077_v58  ;;  %v7997_v5 = vsel %vm7801_vm9, %v10054_v16, %v1372_v18  ;;  %v10079_v54 = vxor.u32 2147483648, %v7657_v20  ;;  %v2744_v46 = vshll.u32 %v7979_v59, 30 }
 0x172   :  { %v2020_v8 = vsel %vm2018_vm4, %v10078_v56, %v7644_v36  ;;  %v2846_v31 = vand.u32 65535, %v7969_v17  ;;  %v2839_v3 = vsel %vm2831_vm14, %v2822_v42, %v2838_v11  ;;  %v2841_v40 = vsel %vm2829_vm2, %v7961_v39, %v2822_v42 }
 0x173   :  { %v8004_v36 = vsel %vm2170_vm11, %v7646_v10, %v10079_v54  ;;  %v2842_v16 = vsel %vm2832_vm6, %v2828_v6, 1326507024  ;;  %v2847_v43 = vshrl.u32 %v7969_v17, 16  ;;  %v8018_v28 = vsel %vm2014_vm1, %v2017_v4, %v2020_v8 }
 0x174   :  { %v8020_v35 = vsub.s32 %v2741_v57, %v2744_v46  ;;  %v2840_v9 = vsel %vm2830_vm13, %v2837_v25, %v2839_v3  ;;  %v2843_v41 = vsel %vm2831_vm14, %v2825_v14, %v2842_v16  ;;  %v8028_v12 = vmul.f32 %v7997_v5, %v7997_v5 }
 0x175   :  { %v2844_v45 = vsel %vm2830_vm13, %v2841_v40, %v2843_v41  ;;  %v2870_v30 = vand.u32 65535, %v2840_v9  ;;  %v2871_v61 = vshrl.u32 %v2840_v9, 16  ;;  %v8037_v58 = vand.u32 3, %v7926_v52 }
 0x176   :  { %vm2746_vm9 = vcmp.lt.s32.totalorder %v8020_v35, 0  ;;  %v2747_v57 = vsub.s32 0, %v8020_v35  ;;  %v2848_v62 = vand.u32 65535, %v2844_v45  ;;  %v2849_v18 = vshrl.u32 %v2844_v45, 16 }
 0x177   :  { %v2872_v14 = vmul.u32 %v2870_v30, %v2846_v31  ;;  %v2873_v4 = vmul.u32 %v2871_v61, %v2846_v31  ;;  %v2874_v6 = vmul.u32 %v2870_v30, %v2847_v43  ;;  %vm2173_vm3 = vcmp.eq.s32.totalorder %v7919_v51, 2 }
 0x178   :  { %v2748_v56 = vsel %vm2746_vm9, %v2747_v57, %v8020_v35  ;;  %v2850_v8 = vmul.u32 %v2848_v62, %v2846_v31  ;;  %v2851_v25 = vmul.u32 %v2849_v18, %v2846_v31  ;;  %v2852_v11 = vmul.u32 %v2848_v62, %v2847_v43 }
 0x179   :  { %v1385_v54 = vmul.f32 -0.00019511016, %v8028_v12  ;;  %v2749_v46 = vclz %v2748_v56  ;;  %v2876_v3 = vshll.u32 %v2873_v4, 16  ;;  %v2954_v40 = vand.u32 2139095040, %v8032_v0 }
 0x17a   :  { %v2853_v16 = vmul.u32 %v2849_v18, %v2847_v43  ;;  %v2854_v9 = vshll.u32 %v2851_v25, 16  ;;  %v2856_v52 = vshll.u32 %v2852_v11, 16  ;;  %v2875_v41 = vmul.u32 %v2871_v61, %v2847_v43 }
 0x17b   :  { %v6246_v45 = vadd.s32 4294967294, %v2749_v46  ;;  %v2813_v30 = vshrl.u32 %v10047_v7, %v7945_v2  ;;  %v2878_v29 = vshll.u32 %v2874_v6, 16  ;;  %vm2880_vm10 = vc.u32 %v2872_v14, %v2876_v3 }
 0x17c   :  { %vm2858_vm8 = vc.u32 %v2850_v8, %v2854_v9  ;;  %v2860_v57 = vadd.s32 %v2854_v9, %v2850_v8  ;;  %v2881_v31 = vsel %vm2880_vm10, 1, %v10039_v44  ;;  %v2882_v62 = vadd.s32 %v2876_v3, %v2872_v14 }
 0x17d   :  { %v1378_v56 = vmul.f32 -0.001358992, %v8028_v12  ;;  %v2834_v32 = vsel %vm2832_vm6, %v2822_v42, 2102212464  ;;  %v2859_v18 = vsel %vm2858_vm8, 1, %v10039_v44  ;;  %v2955_v49 = vshrl.u32 %v2954_v40, 23 }
 0x17e   :  { %vm2169_vm5 = vcmp.lt.s32.totalorder %v7919_v51, 2  ;;  %vm6247_vm7 = vcmp.lt.s32.totalorder %v6246_v45, 0  ;;  %v2861_v43 = vadd.s32 %v2859_v18, %v2853_v16  ;;  %vm2862_vm12 = vc.u32 %v2860_v57, %v2856_v52 }
 0x17f   :  { %v2883_v2 = vadd.s32 %v2881_v31, %v2875_v41  ;;  %v1386_v61 = vadd.f32 0.008332121, %v1385_v54  ;;  %v2477_v8 = vadd.s32 3, %v7760_v34  ;;  %v2833_v14 = vsel %vm2829_vm2, %v2813_v30, %v7959_v60 }
 0x180   :  { %v2855_v46 = vshrl.u32 %v2851_v25, 16  ;;  %v2835_v42 = vsel %vm2831_vm14, %v7961_v39, %v2834_v32  ;;  %v2863_v3 = vsel %vm2862_vm12, 1, %v10039_v44  ;;  %v2877_v40 = vshrl.u32 %v2873_v4, 16 }
 0x181   :  { %vm2884_vm1 = vc.u32 %v2882_v62, %v2878_v29  ;;  %v2752_v9 = vsel %vm6247_vm7, 0, %v6246_v45  ;;  %v2857_v16 = vshrl.u32 %v2852_v11, 16  ;;  %v2865_v52 = vadd.s32 %v2863_v3, %v2861_v43 }
 0x182   :  { %v2885_v54 = vsel %vm2884_vm1, 1, %v10039_v44  ;;  %v1379_v41 = vadd.f32 0.041655596, %v1378_v56  ;;  %v2879_v34 = vshrl.u32 %v2874_v6, 16  ;;  %v6251_v31 = vadd.s32 4294967169, %v2955_v49 }
 0x183   :  { %v2887_v57 = vadd.s32 %v2885_v54, %v2883_v2  ;;  %v1387_v60 = vmul.f32 %v1386_v61, %v8028_v12  ;;  %v10080_v25 = vxor.u32 2147483648, %v7646_v10  ;;  %v2866_v39 = vadd.s32 %v2865_v52, %v2855_v46 }
 0x184   :  { %v8066_v4 = vadd.s32 %v2882_v62, %v2878_v29  ;;  %v2757_v45 = vsub.s32 4294967266, %v2752_v9  ;;  %v2836_v11 = vsel %vm2830_vm13, %v2833_v14, %v2835_v42  ;;  %v2961_v56 = vadd.s32 1, %v6251_v31 }
 0x185   :  { %v2175_v32 = vsel %vm2173_vm3, %v10080_v25, %v7657_v20  ;;  %v2888_v30 = vadd.s32 %v2887_v57, %v2877_v40  ;;  %vm2325_vm4 = vcmp.eq.s32.totalorder %v8037_v58, 0  ;;  %vm2328_vm11 = vcmp.eq.s32.totalorder %v8037_v58, 2 }
 0x186   :  { %v8072_v49 = vand.u32 3, %v2477_v8  ;;  %v8074_v6 = vadd.s32 %v2866_v39, %v2857_v16  ;;  %v1380_v10 = vmul.f32 %v1379_v41, %v8028_v12  ;;  %v2737_v20 = vadd.s32 %v7916_v23, %v7914_v22 }
 0x187   :  { %v2889_v29 = vadd.s32 %v2888_v30, %v2879_v34  ;;  %vm2962_vm2 = vcmp.gt.s32.totalorder %v2961_v56, 0  ;;  %v2753_v62 = vsub.s32 32, %v2752_v9  ;;  %v2890_v27 = vmul.u32 %v7969_v17, %v2836_v11 }
 0x188   :  { %vm2892_vm6 = vc.u32 %v8074_v6, %v8066_v4  ;;  %v2963_v18 = vsel %vm2962_vm2, %v2961_v56, 0  ;;  %v1388_v43 = vadd.f32 -0.16666654, %v1387_v60  ;;  %v2758_v2 = vadd.s32 127, %v2757_v45 }
 0x189   :  { %v2893_v61 = vadd.s32 1, %v2889_v29  ;;  %v2965_v8 = vand.u32 31, %v2963_v18  ;;  %v8085_v14 = vsel %vm776_vm15, nan, %v8018_v28  ;;  %v8090_v22 = vsel %vm2169_vm5, %v8004_v36, %v2175_v32 }
 0x18a   :  { %10081 = vst [vmem:[#allocation10_spill] sm:$0xff] %v8085_v14  ;;  %v10082_v23 = vxor.u32 2147483648, %v7681_v47  ;;  %v9939_v46 = vand.u32 2147483647, %v8032_v0  ;;  %v10083_v42 = vxor.u32 2147483648, %v7678_v33  ;;  %vm2480_vm15 = vcmp.eq.s32.totalorder %v8072_v49, 0 }
 0x18b   :  { %v2894_v51 = vsel %vm2892_vm6, %v2893_v61, %v2889_v29  ;;  %v8108_v36 = vsub.s32 32, %v2965_v8  ;;  %vm2483_vm14 = vcmp.eq.s32.totalorder %v8072_v49, 2  ;;  %v2754_v28 = vshll.u32 %v8020_v35, %v2752_v9 }
 0x18c   :  { %v8097_v17 = vsel %vm2325_vm4, %v7678_v33, %v10082_v23  ;;  %v8105_v1 = vsel %vm2328_vm11, %v10083_v42, %v7681_v47  ;;  %v2755_v3 = vshrl.u32 %v2737_v20, %v2753_v62  ;;  %v2895_v40 = vadd.s32 %v2894_v51, %v2890_v27 }
 0x18d   :  { %v1381_v16 = vadd.f32 -0.4999988, %v1380_v10  ;;  %v1389_v52 = vmul.f32 %v1388_v43, %v8028_v12  ;;  %v2759_v54 = vshll.u32 %v2758_v2, 23  ;;  %v2977_v33 = vshll.u32 %v10048_v13, %v2965_v8 }
 0x18e   :  { %v2896_v41 = vadd.s32 536870912, %v2895_v40  ;;  %v2958_v47 = vand.u32 8388607, %v9939_v46  ;;  %v8116_v34 = vshrl.u32 %v2963_v18, 5  ;;  %v2978_v57 = vshrl.u32 %v10049_v50, %v8108_v36 }
 0x18f   :  { %v2971_v31 = vshll.u32 %v10050_v63, %v2965_v8  ;;  %v2972_v35 = vshrl.u32 %v10051_v21, %v8108_v36  ;;  %v2974_v9 = vshll.u32 %v10051_v21, %v2965_v8  ;;  %v2975_v60 = vshrl.u32 %v10048_v13, %v8108_v36 }
 0x190   :  { %vm2324_vm13 = vcmp.lt.s32.totalorder %v8037_v58, 2  ;;  %v2756_v25 = vor.u32 %v2755_v3, %v2754_v28  ;;  %v8127_v32 = vshrl.u32 %v2896_v41, 30  ;;  %v2968_v39 = vshll.u32 %v10047_v7, %v2965_v8  ;;  %v8158_v3 = vld [vmem:[#allocation4 + $0x38] sm:$0xff] }
 0x191   :  { %v2969_v45 = vshrl.u32 %v10050_v63, %v8108_v36  ;;  %vm2479_vm9 = vcmp.lt.s32.totalorder %v8072_v49, 2  ;;  %v2760_v11 = vor.u32 4788187, %v2759_v54  ;;  %v2979_v30 = vor.u32 %v2978_v57, %v2977_v33 }
 0x192   :  { %v2980_v56 = vshll.u32 %v10049_v50, %v2965_v8  ;;  %v2981_v10 = vshrl.u32 %v10052_v53, %v8108_v36  ;;  %v1382_v20 = vmul.f32 %v1381_v16, %v8028_v12  ;;  %v10084_v29 = vxor.u32 2147483648, %v7813_v19 }
 0x193   :  { %v2898_v27 = vshll.u32 %v8127_v32, 30  ;;  %v2959_v18 = vor.u32 8388608, %v2958_v47  ;;  %v8143_v43 = vor.u32 %v2972_v35, %v2971_v31  ;;  %v8145_v2 = vor.u32 %v2975_v60, %v2974_v9 }
 0x194   :  { %v2482_v62 = vsel %vm2480_vm15, %v7810_v55, %v10084_v29  ;;  %v2982_v61 = vor.u32 %v2981_v10, %v2980_v56  ;;  %vm2986_vm3 = vcmp.lt.s32.totalorder %v8116_v34, 4  ;;  %v1390_v8 = vadd.f32 1.0, %v1389_v52  ;;  %v8165_v52 = vld [vmem:[#allocation4 + $0x20] sm:$0xff] }
 0x195   :  { %v8148_v23 = vsub.s32 %v2895_v40, %v2898_v27  ;;  %v8150_v12 = vor.u32 %v2969_v45, %v2968_v39  ;;  %vm2983_vm10 = vcmp.lt.s32.totalorder %v8116_v34, 1  ;;  %vm1395_vm8 = vcmp.eq.s32.totalorder %v7931_v15, 0  ;;  %10086 = vst [vmem:[#allocation9_spill] sm:$0xff] %v8165_v52 }
 0x196   :  { %vm1398_vm5 = vcmp.eq.s32.totalorder %v7931_v15, 2  ;;  %v2761_v42 = vand.u32 2147483647, %v2760_v11  ;;  %v2763_v51 = vcvt.s32.f32 %v2756_v25  ;;  %vm2985_vm7 = vcmp.lt.s32.totalorder %v8116_v34, 3 }
 0x197   :  { %v2992_v28 = vsel %vm2986_vm3, %v2979_v30, 920167782  ;;  %v10085_v40 = vxor.u32 2147483648, %v7810_v55  ;;  %vm2645_vm12 = vcmp.lt.s32.totalorder %v8165_v52, 0  ;;  %vm2900_vm1 = vcmp.lt.s32.totalorder %v8148_v23, 0 }
 0x198   :  { %v2901_v54 = vsub.s32 0, %v8148_v23  ;;  %v8170_v33 = vshll.u32 %v2959_v18, 8  ;;  %v8172_v41 = vadd.f32 1.0, %v1382_v20  ;;  %vm2984_vm4 = vcmp.lt.s32.totalorder %v8116_v34, 2 }
 0x199   :  { %v2485_v16 = vsel %vm2483_vm14, %v10085_v40, %v7813_v19  ;;  %v2995_v55 = vsel %vm2983_vm10, %v8143_v43, %v8145_v2  ;;  %v2996_v19 = vsel %vm2986_vm3, %v2982_v61, 1326507024  ;;  %v8182_v47 = vmul.f32 %v1390_v8, %v7997_v5 }
 0x19a   :  { %v2902_v57 = vsel %vm2900_vm1, %v2901_v54, %v8148_v23  ;;  %v2991_v31 = vsel %vm2983_vm10, %v8150_v12, %v8143_v43  ;;  %v2993_v35 = vsel %vm2985_vm7, %v8145_v2, %v2992_v28  ;;  %v2764_v9 = vmul.f32 %v2763_v51, %v2761_v42  ;;  %v10093_v54 = vld [vmem:[#allocation23_spill] sm:$0xff] }
 0x19b   :  { %v2903_v60 = vclz %v2902_v57  ;;  %v2997_v25 = vsel %vm2985_vm7, %v2979_v30, %v2996_v19  ;;  %v3108_v39 = vand.u32 2139095040, %v8158_v3  ;;  %vm10087_vm11 = vweird.f32 %v7431_v48 }
 0x19c   :  { %v8198_v5 = vsel %vm10087_vm11, nan, %v8090_v22  ;;  %v2632_v45 = vadd.s32 3, %v7856_v38  ;;  %v2998_v11 = vsel %vm2984_vm4, %v2995_v55, %v2997_v25  ;;  %v3000_v56 = vand.u32 65535, %v8170_v33 }
 0x19d   :  { %10088 = vst [vmem:[#allocation15_spill] sm:$0xff] %v8198_v5  ;;  %v2331_v10 = vsel %vm2324_vm13, %v8097_v17, %v8105_v1  ;;  %v6249_v30 = vadd.s32 4294967294, %v2903_v60  ;;  %v2994_v20 = vsel %vm2984_vm4, %v2991_v31, %v2993_v35  ;;  %v3003_v29 = vshrl.u32 %v2998_v11, 16  ;;  %v10089_v17 = vld [vmem:[#allocation19_spill] sm:$0xff] }
 0x19e   :  { %v1396_v48 = vxor.u32 2147483648, %v8182_v47  ;;  %v1399_v22 = vxor.u32 2147483648, %v8172_v41  ;;  %v2486_v38 = vsel %vm2479_vm9, %v2482_v62, %v2485_v16  ;;  %v3002_v27 = vand.u32 65535, %v2998_v11 }
 0x19f   :  { %v2765_v18 = vxor.u32 2147483648, %v2764_v9  ;;  %vm6250_vm2 = vcmp.lt.s32.totalorder %v6249_v30, 0  ;;  %v3001_v61 = vshrl.u32 %v8170_v33, 16  ;;  %v3109_v8 = vshrl.u32 %v3108_v39, 23 }
 0x1a0   :  { %v8215_v58 = vand.u32 3, %v2632_v45  ;;  %v10090_v1 = vand.u32 2147483647, %v10089_v17  ;;  %v2906_v51 = vsel %vm6250_vm2, 0, %v6249_v30  ;;  %v3005_v28 = vmul.u32 %v3003_v29, %v3000_v56 }
 0x1a1   :  { %v3025_v40 = vshrl.u32 %v2994_v20, 16  ;;  %vm10094_vm15 = vweird.f32 %v10093_v54  ;;  %v8229_v62 = vsel %vm1238_vm0, nan, %v2486_v38  ;;  %v2911_v16 = vsub.s32 4294967266, %v2906_v51 }
 0x1a2   :  { %vm8219_vm6 = vcmp.le.f32.partialorder %v10090_v1, 0.7853982  ;;  %v8225_v49 = vsel %vm10094_vm15, nan, %v2331_v10  ;;  %10096 = vst [vmem:[#allocation11_spill] sm:$0xff] %v8229_v62  ;;  %v3024_v55 = vand.u32 65535, %v2994_v20  ;;  %v8236_v19 = vsel %vm1395_vm8, %v8172_v41, %v1396_v48 }
 0x1a3   :  { %10095 = vst [vmem:[#allocation12_spill] sm:$0xff] %v8225_v49  ;;  %v1400_v57 = vsel %vm1398_vm5, %v1399_v22, %v8182_v47  ;;  %v2967_v26 = vshrl.u32 %v10047_v7, %v8108_v36  ;;  %v3004_v31 = vmul.u32 %v3002_v27, %v3000_v56  ;;  %v2766_v35 = vsel %vm2645_vm12, %v2765_v18, %v2764_v9 }
 0x1a4   :  { %v2891_v60 = vadd.s32 %v8066_v4, %v8074_v6  ;;  %v3006_v25 = vmul.u32 %v3002_v27, %v3001_v61  ;;  %v6254_v39 = vadd.s32 4294967169, %v3109_v8  ;;  %vm2638_vm0 = vcmp.eq.s32.totalorder %v8215_v58, 2 }
 0x1a5   :  { %v2988_v45 = vsel %vm2986_vm3, %v8145_v2, 2102212464  ;;  %v3007_v11 = vmul.u32 %v3003_v29, %v3001_v61  ;;  %v3008_v10 = vshll.u32 %v3005_v28, 16  ;;  %v3027_v30 = vmul.u32 %v3025_v40, %v3000_v56 }
 0x1a6   :  { %vm1394_vm14 = vcmp.lt.s32.totalorder %v7931_v15, 2  ;;  %vm2635_vm13 = vcmp.eq.s32.totalorder %v8215_v58, 0  ;;  %v2907_v36 = vsub.s32 32, %v2906_v51  ;;  %v2912_v9 = vadd.s32 127, %v2911_v16 }
 0x1a7   :  { %v3010_v20 = vshll.u32 %v3006_v25, 16  ;;  %v3028_v38 = vmul.u32 %v3024_v55, %v3001_v61  ;;  %v2987_v4 = vsel %vm2983_vm10, %v2967_v26, %v8150_v12  ;;  %vm3012_vm9 = vc.u32 %v3004_v31, %v3008_v10 }
 0x1a8   :  { %v3014_v6 = vadd.s32 %v3008_v10, %v3004_v31  ;;  %v3026_v27 = vmul.u32 %v3024_v55, %v3000_v56  ;;  %v2908_v2 = vshll.u32 %v8148_v23, %v2906_v51  ;;  %v2989_v29 = vsel %vm2985_vm7, %v8143_v43, %v2988_v45  ;;  %v8264_v51 = vld [vmem:[#allocation2 + $0x78] sm:$0xff] }
 0x1a9   :  { %v3009_v18 = vshrl.u32 %v3005_v28, 16  ;;  %v3013_v8 = vsel %vm3012_vm9, 1, %v10039_v44  ;;  %v3029_v1 = vmul.u32 %v3025_v40, %v3001_v61  ;;  %v3030_v54 = vshll.u32 %v3027_v30, 16 }
 0x1aa   :  { %v3015_v17 = vadd.s32 %v3013_v8, %v3007_v11  ;;  %vm3016_vm3 = vc.u32 %v3014_v6, %v3010_v20  ;;  %v2909_v16 = vshrl.u32 %v2891_v60, %v2907_v36  ;;  %v2913_v46 = vshll.u32 %v2912_v9, 23 }
 0x1ab   :  { %v3017_v12 = vsel %vm3016_vm3, 1, %v10039_v44  ;;  %v3032_v26 = vshll.u32 %v3028_v38, 16  ;;  %vm3034_vm10 = vc.u32 %v3026_v27, %v3030_v54  ;;  %v3036_v56 = vadd.s32 %v3030_v54, %v3026_v27 }
 0x1ac   :  { %v3019_v31 = vadd.s32 %v3017_v12, %v3015_v17  ;;  %v3115_v23 = vadd.s32 1, %v6254_v39  ;;  %vm1392_vm8 = vweird.f32 %v8264_v51  ;;  %vm2634_vm5 = vcmp.lt.s32.totalorder %v8215_v58, 2 }
 0x1ad   :  { %v8271_v43 = vsel %vm8219_vm6, %v8165_v52, %v2766_v35  ;;  %v3011_v61 = vshrl.u32 %v3006_v25, 16  ;;  %v3035_v28 = vsel %vm3034_vm10, 1, %v10039_v44  ;;  %v9940_v40 = vand.u32 2147483647, %v8158_v3 }
 0x1ae   :  { %v3020_v55 = vadd.s32 %v3019_v31, %v3009_v18  ;;  %v3031_v60 = vshrl.u32 %v3027_v30, 16  ;;  %v3037_v45 = vadd.s32 %v3035_v28, %v3029_v1  ;;  %vm3038_vm7 = vc.u32 %v3036_v56, %v3032_v26 }
 0x1af   :  { %v2910_v39 = vor.u32 %v2909_v16, %v2908_v2  ;;  %v2990_v11 = vsel %vm2984_vm4, %v2987_v4, %v2989_v29  ;;  %v3039_v10 = vsel %vm3038_vm7, 1, %v10039_v44  ;;  %vm3116_vm1 = vcmp.gt.s32.totalorder %v3115_v23, 0 }
 0x1b0   :  { %v2914_v36 = vor.u32 4788187, %v2913_v46  ;;  %v3033_v9 = vshrl.u32 %v3028_v38, 16  ;;  %v3041_v35 = vadd.s32 %v3039_v10, %v3037_v45  ;;  %v3117_v20 = vsel %vm3116_vm1, %v3115_v23, 0 }
 0x1b1   :  { %v2640_v25 = vsel %vm2638_vm0, %v1399_v22, %v8182_v47  ;;  %v8283_v30 = vadd.s32 %v3020_v55, %v3011_v61  ;;  %v8285_v6 = vadd.s32 %v3036_v56, %v3032_v26  ;;  %v3119_v27 = vand.u32 31, %v3117_v20 }
 0x1b2   :  { %v1401_v34 = vsel %vm1394_vm14, %v8236_v19, %v1400_v57  ;;  %v2637_v46 = vsel %vm2635_vm13, %v8172_v41, %v1396_v48  ;;  %v2767_v38 = vsub.s32 4, %v7979_v59  ;;  %v3042_v4 = vadd.s32 %v3041_v35, %v3031_v60 }
 0x1b3   :  { %v8298_v22 = vmul.f32 %v8271_v43, %v8271_v43  ;;  %v3044_v2 = vmul.u32 %v8170_v33, %v2990_v11  ;;  %v3112_v29 = vand.u32 8388607, %v9940_v40  ;;  %v8303_v15 = vsub.s32 32, %v3119_v27 }
 0x1b4   :  { %v2915_v19 = vand.u32 2147483647, %v2914_v36  ;;  %v2917_v47 = vcvt.s32.f32 %v2910_v39  ;;  %v3043_v57 = vadd.s32 %v3042_v4, %v3033_v9  ;;  %v8305_v18 = vshrl.u32 %v3117_v20, 5 }
 0x1b5   :  { %vm3046_vm4 = vc.u32 %v8283_v30, %v8285_v6  ;;  %v3122_v41 = vshll.u32 %v10047_v7, %v3119_v27  ;;  %v3125_v48 = vshll.u32 %v10050_v63, %v3119_v27  ;;  %v3131_v8 = vshll.u32 %v10048_v13, %v3119_v27 }
 0x1b6   :  { %v3047_v33 = vadd.s32 1, %v3043_v57  ;;  %v3123_v17 = vshrl.u32 %v10050_v63, %v8303_v15  ;;  %v3132_v1 = vshrl.u32 %v10049_v50, %v8303_v15  ;;  %v3134_v54 = vshll.u32 %v10049_v50, %v3119_v27 }
 0x1b7   :  { %v3126_v16 = vshrl.u32 %v10051_v21, %v8303_v15  ;;  %v3128_v12 = vshll.u32 %v10051_v21, %v3119_v27  ;;  %v3129_v26 = vshrl.u32 %v10048_v13, %v8303_v15  ;;  %v3135_v31 = vshrl.u32 %v10052_v53, %v8303_v15 }
 0x1b8   :  { %v8326_v56 = vsel %vm1392_vm8, nan, %v1401_v34  ;;  %v8330_v23 = vsel %vm2634_vm5, %v2637_v46, %v2640_v25  ;;  %v2918_v61 = vmul.f32 %v2917_v47, %v2915_v19  ;;  %v3048_v28 = vsel %vm3046_vm4, %v3047_v33, %v3043_v57  ;;  %v8340_v25 = vld [vmem:[#allocation4 + $0x60] sm:$0xff] }
 0x1b9   :  { %10097 = vst [vmem:[#allocation19_spill] sm:$0xff] %v8326_v56  ;;  %v2768_v55 = vsel %vm2645_vm12, %v2767_v38, %v7979_v59  ;;  %v2772_v60 = vmul.f32 -0.001358992, %v8298_v22  ;;  %v2779_v45 = vmul.f32 -0.00019511016, %v8298_v22  ;;  %v3049_v39 = vadd.s32 %v3048_v28, %v3044_v2 }
 0x1ba   :  { %v3113_v11 = vor.u32 8388608, %v3112_v29  ;;  %v3124_v10 = vor.u32 %v3123_v17, %v3122_v41  ;;  %v3133_v36 = vor.u32 %v3132_v1, %v3131_v8  ;;  %v3136_v9 = vor.u32 %v3135_v31, %v3134_v54 }
 0x1bb   :  { %v3050_v35 = vadd.s32 536870912, %v3049_v39  ;;  %v8337_v20 = vor.u32 %v3126_v16, %v3125_v48  ;;  %v3130_v58 = vor.u32 %v3129_v26, %v3128_v12  ;;  %vm3140_vm11 = vcmp.lt.s32.totalorder %v8305_v18, 4 }
 0x1bc   :  { %v10098_v27 = vand.u32 2147483647, %v7777_v37  ;;  %vm2799_vm2 = vcmp.lt.s32.totalorder %v7777_v37, 0  ;;  %v2919_v34 = vxor.u32 2147483648, %v2918_v61  ;;  %vm3137_vm15 = vcmp.lt.s32.totalorder %v8305_v18, 1 }
 0x1bd   :  { %v2773_v46 = vadd.f32 0.041655596, %v2772_v60  ;;  %v2780_v38 = vadd.f32 0.008332121, %v2779_v45  ;;  %v8350_v4 = vshrl.u32 %v3050_v35, 30  ;;  %vm3139_vm0 = vcmp.lt.s32.totalorder %v8305_v18, 3 }
 0x1be   :  { %vm8344_vm12 = vcmp.le.f32.partialorder %v10098_v27, 0.7853982  ;;  %v8355_v2 = vsel %vm8219_vm6, 0, %v2768_v55  ;;  %v3146_v29 = vsel %vm3140_vm11, %v3133_v36, 920167782  ;;  %v8361_v47 = vshll.u32 %v3113_v11, 8 }
 0x1bf   :  { %v3150_v19 = vsel %vm3140_vm11, %v3136_v9, 1326507024  ;;  %v3052_v57 = vshll.u32 %v8350_v4, 30  ;;  %vm3138_vm14 = vcmp.lt.s32.totalorder %v8305_v18, 2  ;;  %v3145_v41 = vsel %vm3137_vm15, %v3124_v10, %v8337_v20 }
 0x1c0   :  { %v3149_v42 = vsel %vm3137_vm15, %v8337_v20, %v3130_v58  ;;  %v2920_v48 = vsel %vm2799_vm2, %v2919_v34, %v2918_v61  ;;  %v3147_v8 = vsel %vm3139_vm0, %v3130_v58, %v3146_v29  ;;  %v3151_v33 = vsel %vm3139_vm0, %v3133_v36, %v3150_v19 }
 0x1c1   :  { %v3262_v17 = vand.u32 2139095040, %v8340_v25  ;;  %v2774_v1 = vmul.f32 %v2773_v46, %v8298_v22  ;;  %v2781_v54 = vmul.f32 %v2780_v38, %v8298_v22  ;;  %v8381_v16 = vand.u32 3, %v8355_v2 }
 0x1c2   :  { %v3053_v12 = vsub.s32 %v3049_v39, %v3052_v57  ;;  %v3148_v31 = vsel %vm3138_vm14, %v3145_v41, %v3147_v8  ;;  %v3152_v61 = vsel %vm3138_vm14, %v3149_v42, %v3151_v33  ;;  %v3154_v28 = vand.u32 65535, %v8361_v47 }
 0x1c3   :  { %v8392_v55 = vsel %vm8344_vm12, %v7777_v37, %v2920_v48  ;;  %v3155_v45 = vshrl.u32 %v8361_v47, 16  ;;  %v3156_v39 = vand.u32 65535, %v3152_v61  ;;  %v3157_v11 = vshrl.u32 %v3152_v61, 16 }
 0x1c4   :  { %vm3054_vm6 = vcmp.lt.s32.totalorder %v3053_v12, 0  ;;  %v3055_v60 = vsub.s32 0, %v3053_v12  ;;  %v3179_v36 = vshrl.u32 %v3148_v31, 16  ;;  %v3263_v9 = vshrl.u32 %v3262_v17, 23 }
 0x1c5   :  { %v8395_v35 = vadd.f32 -0.4999988, %v2774_v1  ;;  %v8397_v27 = vadd.f32 -0.16666654, %v2781_v54  ;;  %v3121_v46 = vshrl.u32 %v10047_v7, %v8303_v15  ;;  %v3158_v29 = vmul.u32 %v3156_v39, %v3154_v28 }
 0x1c6   :  { %v3056_v34 = vsel %vm3054_vm6, %v3055_v60, %v3053_v12  ;;  %v3159_v19 = vmul.u32 %v3157_v11, %v3154_v28  ;;  %v3178_v57 = vand.u32 65535, %v3148_v31  ;;  %v8403_v41 = vmul.f32 %v8392_v55, %v8392_v55 }
 0x1c7   :  { %v3057_v38 = vclz %v3056_v34  ;;  %v3045_v42 = vadd.s32 %v8285_v6, %v8283_v30  ;;  %v3160_v48 = vmul.u32 %v3156_v39, %v3155_v45  ;;  %v3181_v1 = vmul.u32 %v3179_v36, %v3154_v28 }
 0x1c8   :  { %v3162_v17 = vshll.u32 %v3159_v19, 16  ;;  %v6257_v54 = vadd.s32 4294967169, %v3263_v9  ;;  %v3141_v15 = vsel %vm3137_vm15, %v3121_v46, %v3124_v10  ;;  %v3142_v31 = vsel %vm3140_vm11, %v3130_v58, 2102212464 }
 0x1c9   :  { %v6252_v33 = vadd.s32 4294967294, %v3057_v38  ;;  %v3161_v61 = vmul.u32 %v3157_v11, %v3155_v45  ;;  %v3164_v60 = vshll.u32 %v3160_v48, 16  ;;  %v3180_v34 = vmul.u32 %v3178_v57, %v3154_v28 }
 0x1ca   :  { %vm3166_vm9 = vc.u32 %v3158_v29, %v3162_v17  ;;  %v3182_v40 = vmul.u32 %v3178_v57, %v3155_v45  ;;  %v3168_v39 = vadd.s32 %v3162_v17, %v3158_v29  ;;  %v3184_v38 = vshll.u32 %v3181_v1, 16 }
 0x1cb   :  { %vm6253_vm13 = vcmp.lt.s32.totalorder %v6252_v33, 0  ;;  %v3167_v6 = vsel %vm3166_vm9, 1, %v10039_v44  ;;  %v3163_v9 = vshrl.u32 %v3159_v19, 16  ;;  %v3269_v56 = vadd.s32 1, %v6257_v54 }
 0x1cc   :  { %v3060_v30 = vsel %vm6253_vm13, 0, %v6252_v33  ;;  %v3169_v10 = vadd.s32 %v3167_v6, %v3161_v61  ;;  %vm3170_vm3 = vc.u32 %v3168_v39, %v3164_v60  ;;  %v3183_v46 = vmul.u32 %v3179_v36, %v3155_v45 }
 0x1cd   :  { %v3061_v26 = vsub.s32 32, %v3060_v30  ;;  %v3065_v8 = vsub.s32 4294967266, %v3060_v30  ;;  %v3062_v62 = vshll.u32 %v3053_v12, %v3060_v30  ;;  %v3143_v28 = vsel %vm3139_vm0, %v8337_v20, %v3142_v31 }
 0x1ce   :  { %v3171_v57 = vsel %vm3170_vm3, 1, %v10039_v44  ;;  %v3165_v33 = vshrl.u32 %v3160_v48, 16  ;;  %v3186_v29 = vshll.u32 %v3182_v40, 16  ;;  %vm3188_vm10 = vc.u32 %v3180_v34, %v3184_v38 }
 0x1cf   :  { %v3063_v58 = vshrl.u32 %v3045_v42, %v3061_v26  ;;  %v3066_v11 = vadd.s32 127, %v3065_v8  ;;  %v3173_v49 = vadd.s32 %v3171_v57, %v3169_v10  ;;  %v2933_v17 = vmul.f32 -0.00019511016, %v8403_v41 }
 0x1d0   :  { %v3189_v12 = vsel %vm3188_vm10, 1, %v10039_v44  ;;  %v3190_v54 = vadd.s32 %v3184_v38, %v3180_v34  ;;  %vm3270_vm5 = vcmp.gt.s32.totalorder %v3269_v56, 0  ;;  %v3144_v20 = vsel %vm3138_vm14, %v3141_v15, %v3143_v28 }
 0x1d1   :  { %v3067_v19 = vshll.u32 %v3066_v11, 23  ;;  %v3064_v61 = vor.u32 %v3063_v58, %v3062_v62  ;;  %v3174_v45 = vadd.s32 %v3173_v49, %v3163_v9  ;;  %v3191_v26 = vadd.s32 %v3189_v12, %v3183_v46 }
 0x1d2   :  { %v3185_v42 = vshrl.u32 %v3181_v1, 16  ;;  %vm3192_vm7 = vc.u32 %v3190_v54, %v3186_v29  ;;  %v8424_v31 = vadd.s32 %v3190_v54, %v3186_v29  ;;  %v3271_v60 = vsel %vm3270_vm5, %v3269_v56, 0 }
 0x1d3   :  { %v3068_v36 = vor.u32 4788187, %v3067_v19  ;;  %v8421_v48 = vadd.s32 %v3174_v45, %v3165_v33  ;;  %v3193_v8 = vsel %vm3192_vm7, 1, %v10039_v44  ;;  %v2926_v30 = vmul.f32 -0.001358992, %v8403_v41 }
 0x1d4   :  { %v3187_v34 = vshrl.u32 %v3182_v40, 16  ;;  %v3195_v62 = vadd.s32 %v3193_v8, %v3191_v26  ;;  %v3273_v49 = vand.u32 31, %v3271_v60  ;;  %v2934_v6 = vadd.f32 0.008332121, %v2933_v17 }
 0x1d5   :  { %v3071_v39 = vcvt.s32.f32 %v3064_v61  ;;  %v3198_v38 = vmul.u32 %v8361_v47, %v3144_v20  ;;  %v10101_v18 = vand.u32 2147483647, %v8340_v25  ;;  %v3069_v15 = vand.u32 2147483647, %v3068_v36 }
 0x1d6   :  { %v3196_v9 = vadd.s32 %v3195_v62, %v3185_v42  ;;  %v8430_v10 = vshrl.u32 %v3271_v60, 5  ;;  %v8432_v46 = vsub.s32 32, %v3273_v49  ;;  %vm2953_vm1 = vcmp.lt.s32.totalorder %v8032_v0, 0 }
 0x1d7   :  { %v3266_v1 = vand.u32 8388607, %v10101_v18  ;;  %vm3200_vm4 = vc.u32 %v8421_v48, %v8424_v31  ;;  %v3276_v40 = vshll.u32 %v10047_v7, %v3273_v49  ;;  %v3279_v56 = vshll.u32 %v10050_v63, %v3273_v49 }
 0x1d8   :  { %v3285_v47 = vshll.u32 %v10048_v13, %v3273_v49  ;;  %v3197_v58 = vadd.s32 %v3196_v9, %v3187_v34  ;;  %v3277_v11 = vshrl.u32 %v10050_v63, %v8432_v46  ;;  %v3282_v28 = vshll.u32 %v10051_v21, %v3273_v49 }
 0x1d9   :  { %v3288_v57 = vshll.u32 %v10049_v50, %v3273_v49  ;;  %v3280_v33 = vshrl.u32 %v10051_v21, %v8432_v46  ;;  %v3283_v29 = vshrl.u32 %v10048_v13, %v8432_v46  ;;  %v3286_v17 = vshrl.u32 %v10049_v50, %v8432_v46 }
 0x1da   :  { %v3289_v19 = vshrl.u32 %v10052_v53, %v8432_v46  ;;  %v2783_v12 = vmul.f32 %v8397_v27, %v8298_v22  ;;  %v10102_v54 = vand.u32 2147483647, %v8032_v0  ;;  %v3072_v45 = vmul.f32 %v3071_v39, %v3069_v15 }
 0x1db   :  { %v3201_v26 = vadd.s32 1, %v3197_v58  ;;  %v3267_v36 = vor.u32 8388608, %v3266_v1  ;;  %v2776_v20 = vmul.f32 %v8395_v35, %v8298_v22  ;;  %v2927_v42 = vadd.f32 0.041655596, %v2926_v30 }
 0x1dc   :  { %vm8456_vm11 = vcmp.le.f32.partialorder %v10102_v54, 0.7853982  ;;  %v2935_v8 = vmul.f32 %v2934_v6, %v8403_v41  ;;  %v3287_v60 = vor.u32 %v3286_v17, %v3285_v47  ;;  %v8466_v34 = vor.u32 %v3277_v11, %v3276_v40 }
 0x1dd   :  { %v3202_v27 = vsel %vm3200_vm4, %v3201_v26, %v3197_v58  ;;  %v8468_v62 = vor.u32 %v3280_v33, %v3279_v56  ;;  %vm3291_vm15 = vcmp.lt.s32.totalorder %v8430_v10, 1  ;;  %v8471_v39 = vor.u32 %v3283_v29, %v3282_v28 }
 0x1de   :  { %v3203_v49 = vadd.s32 %v3202_v27, %v3198_v38  ;;  %v3290_v18 = vor.u32 %v3289_v19, %v3288_v57  ;;  %vm3294_vm0 = vcmp.lt.s32.totalorder %v8430_v10, 4  ;;  %v2784_v22 = vadd.f32 1.0, %v2783_v12 }
 0x1df   :  { %v3073_v35 = vxor.u32 2147483648, %v3072_v45  ;;  %vm3293_vm14 = vcmp.lt.s32.totalorder %v8430_v10, 3  ;;  %v8475_v30 = vshll.u32 %v3267_v36, 8  ;;  %v8477_v6 = vadd.f32 1.0, %v2776_v20 }
 0x1e0   :  { %v10105_v1 = vsub.s32 4, %v8127_v32  ;;  %v3204_v38 = vadd.s32 536870912, %v3203_v49  ;;  %v3300_v9 = vsel %vm3294_vm0, %v3287_v60, 920167782  ;;  %vm2789_vm6 = vcmp.eq.s32.totalorder %v8381_v16, 0 }
 0x1e1   :  { %v2928_v40 = vmul.f32 %v2927_v42, %v8403_v41  ;;  %v2936_v56 = vadd.f32 -0.16666654, %v2935_v8  ;;  %vm3292_vm13 = vcmp.lt.s32.totalorder %v8430_v10, 2  ;;  %v3299_v47 = vsel %vm3291_vm15, %v8466_v34, %v8468_v62 }
 0x1e2   :  { %v2922_v15 = vsel %vm2799_vm2, %v10105_v1, %v8127_v32  ;;  %v8493_v58 = vshrl.u32 %v3204_v38, 30  ;;  %v3301_v37 = vsel %vm3293_vm14, %v8471_v39, %v3300_v9  ;;  %v3303_v32 = vsel %vm3291_vm15, %v8468_v62, %v8471_v39 }
 0x1e3   :  { %v3304_v11 = vsel %vm3294_vm0, %v3290_v18, 1326507024  ;;  %v8505_v28 = vmul.f32 %v2784_v22, %v8271_v43  ;;  %v3074_v57 = vsel %vm2953_vm1, %v3073_v35, %v3072_v45  ;;  %v3308_v29 = vand.u32 65535, %v8475_v30 }
 0x1e4   :  { %v3305_v33 = vsel %vm3293_vm14, %v3287_v60, %v3304_v11  ;;  %v3206_v17 = vshll.u32 %v8493_v58, 30  ;;  %v3302_v19 = vsel %vm3292_vm13, %v3299_v47, %v3301_v37  ;;  %v3309_v54 = vshrl.u32 %v8475_v30, 16 }
 0x1e5   :  { %v3306_v12 = vsel %vm3292_vm13, %v3303_v32, %v3305_v33  ;;  %v2929_v43 = vadd.f32 -0.4999988, %v2928_v40  ;;  %v2937_v26 = vmul.f32 %v2936_v56, %v8403_v41  ;;  %vm2792_vm2 = vcmp.eq.s32.totalorder %v8381_v16, 2 }
 0x1e6   :  { %v3310_v36 = vand.u32 65535, %v3306_v12  ;;  %v3311_v45 = vshrl.u32 %v3306_v12, 16  ;;  %v8522_v20 = vsel %vm8344_vm12, 0, %v2922_v15  ;;  %v8527_v42 = vsel %vm8456_vm11, %v8032_v0, %v3074_v57 }
 0x1e7   :  { %v8529_v8 = vsub.s32 %v3203_v49, %v3206_v17  ;;  %v9947_v60 = vxor.u32 2147483648, %v8505_v28  ;;  %v9944_v27 = vxor.u32 2147483648, %v8477_v6  ;;  %v3333_v22 = vshrl.u32 %v3302_v19, 16 }
 0x1e8   :  { %v3312_v18 = vmul.u32 %v3310_v36, %v3308_v29  ;;  %v3313_v59 = vmul.u32 %v3311_v45, %v3308_v29  ;;  %v8535_v1 = vmul.u32 %v3310_v36, %v3309_v54  ;;  %v2930_v15 = vmul.f32 %v2929_v43, %v8403_v41 }
 0x1e9   :  { %vm3208_vm9 = vcmp.lt.s32.totalorder %v8529_v8, 0  ;;  %v3209_v35 = vsub.s32 0, %v8529_v8  ;;  %v2938_v38 = vadd.f32 1.0, %v2937_v26  ;;  %v8540_v49 = vmul.f32 %v8527_v42, %v8527_v42 }
 0x1ea   :  { %v3332_v9 = vand.u32 65535, %v3302_v19  ;;  %v3315_v56 = vmul.u32 %v3311_v45, %v3309_v54  ;;  %v3316_v47 = vshll.u32 %v3313_v59, 16  ;;  %v3318_v37 = vshll.u32 %v8535_v1, 16 }
 0x1eb   :  { %v3210_v40 = vsel %vm3208_vm9, %v3209_v35, %v8529_v8  ;;  %v8547_v32 = vsel %vm1392_vm8, nan, %v8330_v23  ;;  %v8550_v11 = vand.u32 3, %v8522_v20  ;;  %v8552_v57 = vmul.u32 %v3333_v22, %v3308_v29 }
 0x1ec   :  { %10106 = vst [vmem:[#allocation23_spill] sm:$0xff] %v8547_v32  ;;  %v3211_v41 = vclz %v3210_v40  ;;  %v8559_v33 = vsel %vm2789_vm6, %v8477_v6, %v9947_v60  ;;  %v8566_v51 = vsel %vm2792_vm2, %v9944_v27, %v8505_v28  ;;  %vm3320_vm8 = vc.u32 %v3312_v18, %v3316_v47 }
 0x1ed   :  { %v3322_v23 = vadd.s32 %v3316_v47, %v3312_v18  ;;  %v8568_v17 = vadd.f32 1.0, %v2930_v15  ;;  %v8571_v19 = vmul.f32 %v2938_v38, %v8392_v55  ;;  %v3321_v43 = vsel %vm3320_vm8, 1, %v10039_v44 }
 0x1ee   :  { %v6255_v12 = vadd.s32 4294967294, %v3211_v41  ;;  %v3087_v26 = vmul.f32 -0.00019511016, %v8540_v49  ;;  %v3323_v36 = vadd.s32 %v3321_v43, %v3315_v56  ;;  %v3336_v45 = vmul.u32 %v3332_v9, %v3309_v54 }
 0x1ef   :  { %vm3324_vm12 = vc.u32 %v3322_v23, %v3318_v37  ;;  %v3199_v35 = vadd.s32 %v8424_v31, %v8421_v48  ;;  %v3334_v40 = vmul.u32 %v3332_v9, %v3308_v29  ;;  %v3338_v18 = vshll.u32 %v8552_v57, 16 }
 0x1f0   :  { %vm6256_vm3 = vcmp.lt.s32.totalorder %v6255_v12, 0  ;;  %v3275_v55 = vshrl.u32 %v10047_v7, %v8432_v46  ;;  %v3296_v38 = vsel %vm3294_vm0, %v8471_v39, 2102212464  ;;  %v3325_v47 = vsel %vm3324_vm12, 1, %v10039_v44  ;;  %v8587_v46 = vld [vmem:[#allocation4 + $0x68] sm:$0xff] }
 0x1f1   :  { %v3214_v15 = vsel %vm6256_vm3, 0, %v6255_v12  ;;  %vm2788_vm10 = vcmp.lt.s32.totalorder %v8381_v16, 2  ;;  %v3317_v41 = vshrl.u32 %v3313_v59, 16  ;;  %v3337_v48 = vmul.u32 %v3333_v22, %v3309_v54 }
 0x1f2   :  { %v3215_v56 = vsub.s32 32, %v3214_v15  ;;  %v3219_v37 = vsub.s32 4294967266, %v3214_v15  ;;  %vm2946_vm5 = vcmp.eq.s32.totalorder %v8550_v11, 2  ;;  %v3080_v31 = vmul.f32 -0.001358992, %v8540_v49 }
 0x1f3   :  { %v3088_v29 = vadd.f32 0.008332121, %v3087_v26  ;;  %v3327_v9 = vadd.s32 %v3325_v47, %v3323_v36  ;;  %v3340_v23 = vshll.u32 %v3336_v45, 16  ;;  %v3216_v12 = vshll.u32 %v8529_v8, %v3214_v15 }
 0x1f4   :  { %v3217_v39 = vshrl.u32 %v3199_v35, %v3215_v56  ;;  %v3220_v43 = vadd.s32 127, %v3219_v37  ;;  %vm3342_vm7 = vc.u32 %v3334_v40, %v3338_v18  ;;  %v3295_v27 = vsel %vm3291_vm15, %v3275_v55, %v8466_v34 }
 0x1f5   :  { %v3297_v54 = vsel %vm3293_vm14, %v8468_v62, %v3296_v38  ;;  %v3343_v22 = vsel %vm3342_vm7, 1, %v10039_v44  ;;  %v3344_v59 = vadd.s32 %v3338_v18, %v3334_v40  ;;  %vm2786_vm4 = vweird.f32 %v8165_v52 }
 0x1f6   :  { %v3221_v26 = vshll.u32 %v3220_v43, 23  ;;  %v3319_v36 = vshrl.u32 %v8535_v1, 16  ;;  %v3328_v8 = vadd.s32 %v3327_v9, %v3317_v41  ;;  %v3345_v35 = vadd.s32 %v3343_v22, %v3337_v48 }
 0x1f7   :  { %v3081_v15 = vadd.f32 0.041655596, %v3080_v31  ;;  %v3339_v47 = vshrl.u32 %v8552_v57, 16  ;;  %vm3346_vm0 = vc.u32 %v3344_v59, %v3340_v23  ;;  %v3416_v34 = vand.u32 2139095040, %v8587_v46 }
 0x1f8   :  { %v3089_v55 = vmul.f32 %v3088_v29, %v8540_v49  ;;  %v3218_v56 = vor.u32 %v3217_v39, %v3216_v12  ;;  %v3222_v62 = vor.u32 4788187, %v3221_v26  ;;  %v3347_v38 = vsel %vm3346_vm0, 1, %v10039_v44 }
 0x1f9   :  { %v3075_v40 = vsub.s32 4, %v8350_v4  ;;  %v3341_v18 = vshrl.u32 %v3336_v45, 16  ;;  %v3349_v37 = vadd.s32 %v3347_v38, %v3345_v35  ;;  %v3417_v43 = vshrl.u32 %v3416_v34, 23 }
 0x1fa   :  { %v9946_v1 = vxor.u32 2147483648, %v8571_v19  ;;  %v9945_v41 = vxor.u32 2147483648, %v8568_v17  ;;  %v8606_v48 = vadd.s32 %v3328_v8, %v3319_v36  ;;  %v8608_v57 = vadd.s32 %v3344_v59, %v3340_v23 }
 0x1fb   :  { %v3082_v31 = vmul.f32 %v3081_v15, %v8540_v49  ;;  %v3298_v29 = vsel %vm3292_vm13, %v3295_v27, %v3297_v54  ;;  %v3350_v9 = vadd.s32 %v3349_v37, %v3339_v47  ;;  %v6260_v12 = vadd.s32 4294967169, %v3417_v43  ;;  %v8640_v47 = vld [vmem:[#allocation4 + $0x70] sm:$0xff] }
 0x1fc   :  { %vm2943_vm15 = vcmp.eq.s32.totalorder %v8550_v11, 0  ;;  %v3090_v45 = vadd.f32 -0.16666654, %v3089_v55  ;;  %v3223_v39 = vand.u32 2147483647, %v3222_v62  ;;  %v3225_v22 = vcvt.s32.f32 %v3218_v56 }
 0x1fd   :  { %v2795_v26 = vsel %vm2788_vm10, %v8559_v33, %v8566_v51  ;;  %vm2942_vm14 = vcmp.lt.s32.totalorder %v8550_v11, 2  ;;  %v3351_v23 = vadd.s32 %v3350_v9, %v3341_v18  ;;  %v3423_v59 = vadd.s32 1, %v6260_v12 }
 0x1fe   :  { %v2948_v10 = vsel %vm2946_vm5, %v9945_v41, %v8571_v19  ;;  %v3076_v27 = vsel %vm2953_vm1, %v3075_v40, %v8350_v4  ;;  %v3352_v54 = vmul.u32 %v8475_v30, %v3298_v29  ;;  %vm3354_vm6 = vc.u32 %v8606_v48, %v8608_v57 }
 0x1ff   :  { %v2945_v16 = vsel %vm2943_vm15, %v8568_v17, %v9946_v1  ;;  %v3083_v33 = vadd.f32 -0.4999988, %v3082_v31  ;;  %v3355_v51 = vadd.s32 1, %v3351_v23  ;;  %vm3424_vm13 = vcmp.gt.s32.totalorder %v3423_v59, 0 }
 0x200   :  { %v3091_v36 = vmul.f32 %v3090_v45, %v8540_v49  ;;  %v3226_v8 = vmul.f32 %v3225_v22, %v3223_v39  ;;  %v9949_v35 = vand.u32 2147483647, %v8587_v46  ;;  %v3425_v15 = vsel %vm3424_vm13, %v3423_v59, 0 }
 0x201   :  { %v8637_v0 = vsel %vm2786_vm4, nan, %v2795_v26  ;;  %vm3107_vm1 = vcmp.lt.s32.totalorder %v8158_v3, 0  ;;  %v3356_v4 = vsel %vm3354_vm6, %v3355_v51, %v3351_v23  ;;  %v3427_v30 = vand.u32 31, %v3425_v15 }
 0x202   :  { %10107 = vst [vmem:[#allocation25_spill] sm:$0xff] %v8637_v0  ;;  %v8644_v34 = vsel %vm2942_vm14, %v2945_v16, %v2948_v10  ;;  %v8648_v55 = vsel %vm8456_vm11, 0, %v3076_v27  ;;  %v10108_v56 = vand.u32 2147483647, %v8158_v3  ;;  %v3357_v38 = vadd.s32 %v3356_v4, %v3352_v54 }
 0x203   :  { %v3084_v40 = vmul.f32 %v3083_v33, %v8540_v49  ;;  %v8658_v18 = vand.u32 3, %v8648_v55  ;;  %v3229_v11 = vsub.s32 4, %v8493_v58  ;;  %v3428_v37 = vsub.s32 32, %v3427_v30 }
 0x204   :  { %vm8652_vm2 = vcmp.le.f32.partialorder %v10108_v56, 0.7853982  ;;  %v3092_v43 = vadd.f32 1.0, %v3091_v36  ;;  %v3227_v31 = vxor.u32 2147483648, %v3226_v8  ;;  %v3358_v61 = vadd.s32 536870912, %v3357_v38 }
 0x205   :  { %v3420_v29 = vand.u32 8388607, %v9949_v35  ;;  %v3430_v9 = vshll.u32 %v10047_v7, %v3427_v30  ;;  %v3433_v12 = vshll.u32 %v10050_v63, %v3427_v30  ;;  %v3439_v45 = vshll.u32 %v10048_v13, %v3427_v30 }
 0x206   :  { %v3570_v49 = vand.u32 2139095040, %v8640_v47  ;;  %v8667_v39 = vshrl.u32 %v3358_v61, 30  ;;  %v3431_v22 = vshrl.u32 %v10050_v63, %v3428_v37  ;;  %v3434_v26 = vshrl.u32 %v10051_v21, %v3428_v37 }
 0x207   :  { %v3440_v23 = vshrl.u32 %v10049_v50, %v3428_v37  ;;  %v8675_v59 = vsel %vm3107_vm1, %v3229_v11, %v8493_v58  ;;  %v8677_v10 = vshrl.u32 %v3425_v15, 5  ;;  %v3436_v27 = vshll.u32 %v10051_v21, %v3427_v30 }
 0x208   :  { %v3437_v54 = vshrl.u32 %v10048_v13, %v3428_v37  ;;  %v8681_v16 = vadd.f32 1.0, %v3084_v40  ;;  %v3228_v33 = vsel %vm3107_vm1, %v3227_v31, %v3226_v8  ;;  %v3360_v51 = vshll.u32 %v8667_v39, 30 }
 0x209   :  { %v3442_v36 = vshll.u32 %v10049_v50, %v3427_v30  ;;  %v3421_v4 = vor.u32 8388608, %v3420_v29  ;;  %v3441_v56 = vor.u32 %v3440_v23, %v3439_v45  ;;  %v3443_v58 = vshrl.u32 %v10052_v53, %v3428_v37 }
 0x20a   :  { %v3571_v11 = vshrl.u32 %v3570_v49, 23  ;;  %v8689_v15 = vmul.f32 %v3092_v43, %v8527_v42  ;;  %v3361_v61 = vsub.s32 %v3357_v38, %v3360_v51  ;;  %v3432_v41 = vor.u32 %v3431_v22, %v3430_v9 }
 0x20b   :  { %v8691_v1 = vor.u32 %v3434_v26, %v3433_v12  ;;  %v8696_v8 = vsel %vm8652_vm2, %v8158_v3, %v3228_v33  ;;  %v3438_v40 = vor.u32 %v3437_v54, %v3436_v27  ;;  %vm3445_vm11 = vcmp.lt.s32.totalorder %v8677_v10, 1 }
 0x20c   :  { %vm3448_vm9 = vcmp.lt.s32.totalorder %v8677_v10, 4  ;;  %vm3362_vm8 = vcmp.lt.s32.totalorder %v3361_v61, 0  ;;  %v3363_v30 = vsub.s32 0, %v3361_v61  ;;  %v3444_v31 = vor.u32 %v3443_v58, %v3442_v36 }
 0x20d   :  { %vm3447_vm12 = vcmp.lt.s32.totalorder %v8677_v10, 3  ;;  %v3454_v42 = vsel %vm3448_vm9, %v3441_v56, 920167782  ;;  %v8703_v38 = vshll.u32 %v3421_v4, 8  ;;  %v9948_v43 = vand.u32 2147483647, %v8640_v47 }
 0x20e   :  { %v6263_v29 = vadd.s32 4294967169, %v3571_v11  ;;  %v8708_v3 = vmul.f32 %v8696_v8, %v8696_v8  ;;  %v3364_v9 = vsel %vm3362_vm8, %v3363_v30, %v3361_v61  ;;  %vm3446_vm3 = vcmp.lt.s32.totalorder %v8677_v10, 2 }
 0x20f   :  { %v3453_v12 = vsel %vm3445_vm11, %v3432_v41, %v8691_v1  ;;  %v3365_v49 = vclz %v3364_v9  ;;  %v3455_v22 = vsel %vm3447_vm12, %v3438_v40, %v3454_v42  ;;  %v3457_v26 = vsel %vm3445_vm11, %v8691_v1, %v3438_v40 }
 0x210   :  { %v3234_v27 = vmul.f32 -0.001358992, %v8708_v3  ;;  %v3353_v54 = vadd.s32 %v8608_v57, %v8606_v48  ;;  %v3458_v33 = vsel %vm3448_vm9, %v3444_v31, 1326507024  ;;  %v3456_v36 = vsel %vm3446_vm3, %v3453_v12, %v3455_v22 }
 0x211   :  { %v6258_v51 = vadd.s32 4294967294, %v3365_v49  ;;  %v3459_v4 = vsel %vm3447_vm12, %v3441_v56, %v3458_v33  ;;  %v8732_v58 = vand.u32 8388607, %v9948_v43  ;;  %v3241_v11 = vmul.f32 -0.00019511016, %v8708_v3 }
 0x212   :  { %v3460_v30 = vsel %vm3446_vm3, %v3457_v26, %v3459_v4  ;;  %v3462_v48 = vand.u32 65535, %v8703_v38  ;;  %v3577_v57 = vadd.s32 1, %v6263_v29  ;;  %v3429_v31 = vshrl.u32 %v10047_v7, %v3428_v37 }
 0x213   :  { %vm6259_vm10 = vcmp.lt.s32.totalorder %v6258_v51, 0  ;;  %v3463_v42 = vshrl.u32 %v8703_v38, 16  ;;  %v3464_v9 = vand.u32 65535, %v3460_v30  ;;  %v3235_v12 = vadd.f32 0.041655596, %v3234_v27 }
 0x214   :  { %v3368_v56 = vsel %vm6259_vm10, 0, %v6258_v51  ;;  %v3465_v49 = vshrl.u32 %v3460_v30, 16  ;;  %v3487_v22 = vshrl.u32 %v3456_v36, 16  ;;  %v3242_v45 = vadd.f32 0.008332121, %v3241_v11 }
 0x215   :  { %v3369_v33 = vsub.s32 32, %v3368_v56  ;;  %v3370_v60 = vshll.u32 %v3361_v61, %v3368_v56  ;;  %v3373_v43 = vsub.s32 4294967266, %v3368_v56  ;;  %v3450_v26 = vsel %vm3448_vm9, %v3438_v40, 2102212464 }
 0x216   :  { %v3486_v29 = vand.u32 65535, %v3456_v36  ;;  %vm3578_vm5 = vcmp.gt.s32.totalorder %v3577_v57, 0  ;;  %v3466_v23 = vmul.u32 %v3464_v9, %v3462_v48  ;;  %v3467_v32 = vmul.u32 %v3465_v49, %v3462_v48 }
 0x217   :  { %v3371_v4 = vshrl.u32 %v3353_v54, %v3369_v33  ;;  %v3374_v37 = vadd.s32 127, %v3373_v43  ;;  %v3236_v27 = vmul.f32 %v3235_v12, %v8708_v3  ;;  %vm3261_vm7 = vcmp.lt.s32.totalorder %v8340_v25, 0 }
 0x218   :  { %v3449_v61 = vsel %vm3445_vm11, %v3429_v31, %v3432_v41  ;;  %v3468_v51 = vmul.u32 %v3464_v9, %v3463_v42  ;;  %v3489_v30 = vmul.u32 %v3487_v22, %v3462_v48  ;;  %v10111_v11 = vand.u32 2147483647, %v8340_v25 }
 0x219   :  { %v3372_v40 = vor.u32 %v3371_v4, %v3370_v60  ;;  %v3375_v54 = vshll.u32 %v3374_v37, 23  ;;  %v3469_v43 = vmul.u32 %v3465_v49, %v3463_v42  ;;  %v3470_v36 = vshll.u32 %v3467_v32, 16 }
 0x21a   :  { %vm8749_vm0 = vcmp.le.f32.partialorder %v10111_v11, 0.7853982  ;;  %v3451_v12 = vsel %vm3447_vm12, %v8691_v1, %v3450_v26  ;;  %v3472_v33 = vshll.u32 %v3468_v51, 16  ;;  %v3488_v35 = vmul.u32 %v3486_v29, %v3462_v48 }
 0x21b   :  { %v3490_v5 = vmul.u32 %v3486_v29, %v3463_v42  ;;  %v3376_v41 = vor.u32 4788187, %v3375_v54  ;;  %v3379_v31 = vcvt.s32.f32 %v3372_v40  ;;  %vm3474_vm15 = vc.u32 %v3466_v23, %v3470_v36 }
 0x21c   :  { %v3476_v9 = vadd.s32 %v3470_v36, %v3466_v23  ;;  %v3475_v11 = vsel %vm3474_vm15, 1, %v10039_v44  ;;  %v3491_v14 = vmul.u32 %v3487_v22, %v3463_v42  ;;  %v3492_v24 = vshll.u32 %v3489_v30, 16 }
 0x21d   :  { %v3494_v0 = vshll.u32 %v3490_v5, 16  ;;  %v3377_v60 = vand.u32 2147483647, %v3376_v41  ;;  %v3471_v4 = vshrl.u32 %v3467_v32, 16  ;;  %v3477_v49 = vadd.s32 %v3475_v11, %v3469_v43 }
 0x21e   :  { %vm3478_vm14 = vc.u32 %v3476_v9, %v3472_v33  ;;  %v3473_v37 = vshrl.u32 %v3468_v51, 16  ;;  %vm3496_vm6 = vc.u32 %v3488_v35, %v3492_v24  ;;  %v3498_v1 = vadd.s32 %v3492_v24, %v3488_v35 }
 0x21f   :  { %v3479_v52 = vsel %vm3478_vm14, 1, %v10039_v44  ;;  %v3380_v48 = vmul.f32 %v3379_v31, %v3377_v60  ;;  %v3497_v29 = vsel %vm3496_vm6, 1, %v10039_v44  ;;  %v3579_v23 = vsel %vm3578_vm5, %v3577_v57, 0 }
 0x220   :  { %v3481_v26 = vadd.s32 %v3479_v52, %v3477_v49  ;;  %v3243_v40 = vmul.f32 %v3242_v45, %v8708_v3  ;;  %v3493_v42 = vshrl.u32 %v3489_v30, 16  ;;  %v3499_v22 = vadd.s32 %v3497_v29, %v3491_v14 }
 0x221   :  { %vm3500_vm13 = vc.u32 %v3498_v1, %v3494_v0  ;;  %v3381_v54 = vxor.u32 2147483648, %v3380_v48  ;;  %v3581_v51 = vand.u32 31, %v3579_v23  ;;  %v3237_v36 = vadd.f32 -0.4999988, %v3236_v27 }
 0x222   :  { %v3482_v32 = vadd.s32 %v3481_v26, %v3471_v4  ;;  %v3501_v43 = vsel %vm3500_vm13, 1, %v10039_v44  ;;  %v3452_v24 = vsel %vm3446_vm3, %v3449_v61, %v3451_v12  ;;  %v3495_v35 = vshrl.u32 %v3490_v5, 16 }
 0x223   :  { %v3503_v52 = vadd.s32 %v3501_v43, %v3499_v22  ;;  %vm3097_vm1 = vcmp.eq.s32.totalorder %v8658_v18, 0  ;;  %vm3100_vm11 = vcmp.eq.s32.totalorder %v8658_v18, 2  ;;  %v3382_v45 = vsel %vm3261_vm7, %v3381_v54, %v3380_v48 }
 0x224   :  { %v8768_v14 = vadd.s32 %v3482_v32, %v3473_v37  ;;  %v8770_v57 = vadd.s32 %v3498_v1, %v3494_v0  ;;  %v8772_v30 = vsub.s32 32, %v3581_v51  ;;  %v8777_v10 = vsel %vm8749_vm0, %v8340_v25, %v3382_v45 }
 0x225   :  { %v3504_v5 = vadd.s32 %v3503_v52, %v3493_v42  ;;  %v3584_v27 = vshll.u32 %v10047_v7, %v3581_v51  ;;  %v3587_v61 = vshll.u32 %v10050_v63, %v3581_v51  ;;  %v3244_v12 = vadd.f32 -0.16666654, %v3243_v40 }
 0x226   :  { %v8783_v33 = vmul.f32 %v8777_v10, %v8777_v10  ;;  %v8785_v41 = vshrl.u32 %v3579_v23, 5  ;;  %v3590_v0 = vshll.u32 %v10051_v21, %v3581_v51  ;;  %v3585_v9 = vshrl.u32 %v10050_v63, %v8772_v30 }
 0x227   :  { %v3505_v31 = vadd.s32 %v3504_v5, %v3495_v35  ;;  %v3588_v11 = vshrl.u32 %v10051_v21, %v8772_v30  ;;  %v3591_v60 = vshrl.u32 %v10048_v13, %v8772_v30  ;;  %v3506_v4 = vmul.u32 %v8703_v38, %v3452_v24 }
 0x228   :  { %vm3508_vm9 = vc.u32 %v8768_v14, %v8770_v57  ;;  %v3593_v49 = vshll.u32 %v10048_v13, %v3581_v51  ;;  %v3594_v37 = vshrl.u32 %v10049_v50, %v8772_v30  ;;  %v3383_v1 = vsub.s32 4, %v8667_v39 }
 0x229   :  { %v3509_v48 = vadd.s32 1, %v3505_v31  ;;  %v8801_v26 = vor.u32 %v3585_v9, %v3584_v27  ;;  %v8803_v29 = vor.u32 %v3588_v11, %v3587_v61  ;;  %v3395_v23 = vmul.f32 -0.00019511016, %v8783_v33 }
 0x22a   :  { %v3595_v40 = vor.u32 %v3594_v37, %v3593_v49  ;;  %v3596_v38 = vshll.u32 %v10049_v50, %v3581_v51  ;;  %vm3599_vm8 = vcmp.lt.s32.totalorder %v8785_v41, 1  ;;  %v3592_v22 = vor.u32 %v3591_v60, %v3590_v0 }
 0x22b   :  { %v3510_v42 = vsel %vm3508_vm9, %v3509_v48, %v3505_v31  ;;  %v3597_v54 = vshrl.u32 %v10052_v53, %v8772_v30  ;;  %vm3602_vm12 = vcmp.lt.s32.totalorder %v8785_v41, 4  ;;  %v3238_v32 = vmul.f32 %v3237_v36, %v8708_v3 }
 0x22c   :  { %v3245_v43 = vmul.f32 %v3244_v12, %v8708_v3  ;;  %v3511_v24 = vadd.s32 %v3510_v42, %v3506_v4  ;;  %vm3601_vm3 = vcmp.lt.s32.totalorder %v8785_v41, 3  ;;  %vm3600_vm10 = vcmp.lt.s32.totalorder %v8785_v41, 2 }
 0x22d   :  { %v3598_v35 = vor.u32 %v3597_v54, %v3596_v38  ;;  %v3607_v51 = vsel %vm3599_vm8, %v8801_v26, %v8803_v29  ;;  %v3608_v52 = vsel %vm3602_vm12, %v3595_v40, 920167782  ;;  %vm3096_vm5 = vcmp.lt.s32.totalorder %v8658_v18, 2 }
 0x22e   :  { %v8825_v3 = vsel %vm8652_vm2, 0, %v8675_v59  ;;  %v3388_v36 = vmul.f32 -0.001358992, %v8783_v33  ;;  %v3512_v45 = vadd.s32 536870912, %v3511_v24  ;;  %v10114_v5 = vxor.u32 2147483648, %v8689_v15 }
 0x22f   :  { %v10115_v61 = vxor.u32 2147483648, %v8681_v16  ;;  %v3396_v0 = vadd.f32 0.008332121, %v3395_v23  ;;  %v3609_v62 = vsel %vm3601_vm3, %v3592_v22, %v3608_v52  ;;  %v3246_v59 = vadd.f32 1.0, %v3245_v43 }
 0x230   :  { %v3099_v27 = vsel %vm3097_vm1, %v8681_v16, %v10114_v5  ;;  %v3384_v31 = vsel %vm3261_vm7, %v3383_v1, %v8667_v39  ;;  %v8843_v9 = vshrl.u32 %v3512_v45, 30  ;;  %v3610_v11 = vsel %vm3600_vm10, %v3607_v51, %v3609_v62 }
 0x231   :  { %v3102_v12 = vsel %vm3100_vm11, %v10115_v61, %v8689_v15  ;;  %v8847_v60 = vadd.f32 1.0, %v3238_v32  ;;  %v3612_v4 = vsel %vm3602_vm12, %v3598_v35, 1326507024  ;;  %v10117_v49 = vor.u32 8388608, %v8732_v58 }
 0x232   :  { %v3641_v48 = vshrl.u32 %v3610_v11, 16  ;;  %v8856_v23 = vand.u32 3, %v8825_v3  ;;  %v3389_v25 = vadd.f32 0.041655596, %v3388_v36  ;;  %v3514_v39 = vshll.u32 %v8843_v9, 30 }
 0x233   :  { %10116 = vst [vmem:[#allocation26_spill] sm:$0xff] %v8847_v60  ;;  %v8853_v37 = vshll.u32 %v10117_v49, 8  ;;  %v3611_v1 = vsel %vm3599_vm8, %v8803_v29, %v3592_v22  ;;  %v8864_v38 = vsel %vm3096_vm5, %v3099_v27, %v3102_v12  ;;  %v3397_v42 = vmul.f32 %v3396_v0, %v8783_v33 }
 0x234   :  { %v3613_v58 = vsel %vm3601_vm3, %v3595_v40, %v3612_v4  ;;  %v8871_v32 = vmul.f32 %v3246_v59, %v8696_v8  ;;  %v8875_v43 = vsel %vm8749_vm0, 0, %v3384_v31  ;;  %v3515_v35 = vsub.s32 %v3511_v24, %v3514_v39 }
 0x235   :  { %v3616_v54 = vand.u32 65535, %v8853_v37  ;;  %v3640_v51 = vand.u32 65535, %v3610_v11  ;;  %v3614_v52 = vsel %vm3600_vm10, %v3611_v1, %v3613_v58  ;;  %v3617_v36 = vshrl.u32 %v8853_v37, 16 }
 0x236   :  { %v3390_v40 = vmul.f32 %v3389_v25, %v8783_v33  ;;  %vm3516_vm2 = vcmp.lt.s32.totalorder %v3515_v35, 0  ;;  %v3517_v8 = vsub.s32 0, %v3515_v35  ;;  %v3583_v56 = vshrl.u32 %v10047_v7, %v8772_v30 }
 0x237   :  { %v8881_v45 = vmul.u32 %v3641_v48, %v3616_v54  ;;  %v3398_v5 = vadd.f32 -0.16666654, %v3397_v42  ;;  %v3604_v24 = vsel %vm3602_vm12, %v3592_v22, 2102212464  ;;  %v3618_v27 = vand.u32 65535, %v3614_v52 }
 0x238   :  { %v3619_v61 = vshrl.u32 %v3614_v52, 16  ;;  %v3518_v0 = vsel %vm3516_vm2, %v3517_v8, %v3515_v35  ;;  %v3642_v62 = vmul.u32 %v3640_v51, %v3616_v54  ;;  %v8890_v49 = vmul.u32 %v3640_v51, %v3617_v36 }
 0x239   :  { %v3646_v59 = vshll.u32 %v8881_v45, 16  ;;  %v3519_v31 = vclz %v3518_v0  ;;  %v3620_v11 = vmul.u32 %v3618_v27, %v3616_v54  ;;  %v3507_v30 = vadd.s32 %v8770_v57, %v8768_v14 }
 0x23a   :  { %v3621_v4 = vmul.u32 %v3619_v61, %v3616_v54  ;;  %v3603_v22 = vsel %vm3599_vm8, %v3583_v56, %v8801_v26  ;;  %v3605_v25 = vsel %vm3601_vm3, %v8803_v29, %v3604_v24  ;;  %v3622_v39 = vmul.u32 %v3618_v27, %v3617_v36  ;;  %v8907_v27 = vld [vmem:[#allocation4 + $0x78] sm:$0xff] }
 0x23b   :  { %v3391_v1 = vadd.f32 -0.4999988, %v3390_v40  ;;  %v3399_v42 = vmul.f32 %v3398_v5, %v8783_v33  ;;  %v6261_v58 = vadd.s32 4294967294, %v3519_v31  ;;  %v3623_v54 = vmul.u32 %v3619_v61, %v3617_v36 }
 0x23c   :  { %v3624_v52 = vshll.u32 %v3621_v4, 16  ;;  %v3626_v51 = vshll.u32 %v3622_v39, 16  ;;  %v3645_v8 = vmul.u32 %v3641_v48, %v3617_v36  ;;  %vm3650_vm7 = vc.u32 %v3642_v62, %v3646_v59 }
 0x23d   :  { %vm3254_vm0 = vcmp.eq.s32.totalorder %v8856_v23, 2  ;;  %vm6262_vm15 = vcmp.lt.s32.totalorder %v6261_v58, 0  ;;  %v3648_v14 = vshll.u32 %v8890_v49, 16  ;;  %v3652_v57 = vadd.s32 %v3646_v59, %v3642_v62 }
 0x23e   :  { %vm3628_vm14 = vc.u32 %v3620_v11, %v3624_v52  ;;  %v3522_v26 = vsel %vm6262_vm15, 0, %v6261_v58  ;;  %v3630_v56 = vadd.s32 %v3624_v52, %v3620_v11  ;;  %v3651_v40 = vsel %vm3650_vm7, 1, %v10039_v44 }
 0x23f   :  { %v3629_v29 = vsel %vm3628_vm14, 1, %v10039_v44  ;;  %vm3251_vm6 = vcmp.eq.s32.totalorder %v8856_v23, 0  ;;  %v3392_v5 = vmul.f32 %v3391_v1, %v8783_v33  ;;  %v3523_v24 = vsub.s32 32, %v3522_v26 }
 0x240   :  { %v3524_v48 = vshll.u32 %v3515_v35, %v3522_v26  ;;  %v3527_v36 = vsub.s32 4294967266, %v3522_v26  ;;  %v3400_v61 = vadd.f32 1.0, %v3399_v42  ;;  %v3625_v0 = vshrl.u32 %v3621_v4, 16  ;;  %v8913_v42 = vld [vmem:[#allocation4 + $0x28] sm:$0xff]  ;;  %v8916_v4 = vld [vmem:[#allocation4 + $0x30] sm:$0xff] }
 0x241   :  { %v3631_v31 = vadd.s32 %v3629_v29, %v3623_v54  ;;  %vm3632_vm13 = vc.u32 %v3630_v56, %v3626_v51  ;;  %v3525_v62 = vshrl.u32 %v3507_v30, %v3523_v24  ;;  %v3653_v11 = vadd.s32 %v3651_v40, %v3645_v8  ;;  %10118 = vst [vmem:[#allocation27_spill] sm:$0xff] %v8916_v4 }
 0x242   :  { %v3528_v59 = vadd.s32 127, %v3527_v36  ;;  %v3633_v58 = vsel %vm3632_vm13, 1, %v10039_v44  ;;  %v3627_v52 = vshrl.u32 %v3622_v39, 16  ;;  %v3647_v18 = vshrl.u32 %v8881_v45, 16 }
 0x243   :  { %v3635_v12 = vadd.s32 %v3633_v58, %v3631_v31  ;;  %vm3654_vm1 = vc.u32 %v3652_v57, %v3648_v14  ;;  %v3526_v33 = vor.u32 %v3525_v62, %v3524_v48  ;;  %v3724_v26 = vand.u32 2139095040, %v8907_v27 }
 0x244   :  { %v3529_v1 = vshll.u32 %v3528_v59, 23  ;;  %v3655_v35 = vsel %vm3654_vm1, 1, %v10039_v44  ;;  %vm2940_vm11 = vweird.f32 %v8913_v42  ;;  %vm9971_vm9 = vweird.f32 %v8916_v4 }
 0x245   :  { %v3606_v30 = vsel %vm3600_vm10, %v3603_v22, %v3605_v25  ;;  %v3636_v39 = vadd.s32 %v3635_v12, %v3625_v0  ;;  %v3649_v45 = vshrl.u32 %v8890_v49, 16  ;;  %v3657_v54 = vadd.s32 %v3655_v35, %v3653_v11 }
 0x246   :  { %vm3250_vm8 = vcmp.lt.s32.totalorder %v8856_v23, 2  ;;  %v3530_v51 = vor.u32 4788187, %v3529_v1  ;;  %v3533_v8 = vcvt.s32.f32 %v3526_v33  ;;  %v8923_v29 = vadd.s32 %v3652_v57, %v3648_v14 }
 0x247   :  { %v3725_v56 = vshrl.u32 %v3724_v26, 23  ;;  %v8925_v40 = vadd.f32 1.0, %v3392_v5  ;;  %v8928_v24 = vmul.f32 %v3400_v61, %v8777_v10  ;;  %v8930_v48 = vadd.s32 %v3636_v39, %v3627_v52 }
 0x248   :  { %v3658_v41 = vadd.s32 %v3657_v54, %v3647_v18  ;;  %v3403_v12 = vand.u32 3, %v8875_v43  ;;  %vm3415_vm12 = vcmp.lt.s32.totalorder %v8587_v46, 0  ;;  %v3531_v49 = vand.u32 2147483647, %v3530_v51 }
 0x249   :  { %10119 = vst [vmem:[#allocation28_spill] sm:$0xff] %v8925_v40  ;;  %v6266_v22 = vadd.s32 4294967169, %v3725_v56  ;;  %v10121_v25 = vxor.u32 2147483648, %v8847_v60  ;;  %v10122_v57 = vand.u32 2147483647, %v8587_v46  ;;  %v3537_v18 = vsub.s32 4, %v8843_v9 }
 0x24a   :  { %10120 = vst [vmem:[#allocation29_spill] sm:$0xff] %v8928_v24  ;;  %v3659_v5 = vadd.s32 %v3658_v41, %v3649_v45  ;;  %v3534_v36 = vmul.f32 %v3533_v8, %v3531_v49  ;;  %v3660_v61 = vmul.u32 %v8853_v37, %v3606_v30  ;;  %vm3662_vm10 = vc.u32 %v8930_v48, %v8923_v29  ;;  %v8959_v37 = vld [vmem:[%s9865_s1] sm:$0x3] }
 0x24b   :  { %v3256_v14 = vsel %vm3254_vm0, %v10121_v25, %v8871_v32  ;;  %vm8941_vm3 = vcmp.le.f32.partialorder %v10122_v57, 0.7853982  ;;  %v3731_v0 = vadd.s32 1, %v6266_v22  ;;  %v10125_v31 = vxor.u32 2147483648, %v8871_v32  ;;  %10126 = vst [vmem:[#allocation30_spill] sm:$0xff] %v8959_v37 }
 0x24c   :  { %v9957_v59 = vxor.u32 2147483648, %v8928_v24  ;;  %v9956_v58 = vxor.u32 2147483648, %v8925_v40  ;;  %v3663_v11 = vadd.s32 1, %v3659_v5  ;;  %vm3405_vm5 = vcmp.eq.s32.totalorder %v3403_v12, 0 }
 0x24d   :  { %v3253_v62 = vsel %vm3251_vm6, %v8847_v60, %v10125_v31  ;;  %vm3408_vm2 = vcmp.eq.s32.totalorder %v3403_v12, 2  ;;  %v3535_v52 = vxor.u32 2147483648, %v3534_v36  ;;  %vm3732_vm7 = vcmp.gt.s32.totalorder %v3731_v0, 0 }
 0x24e   :  { %vm3404_vm0 = vcmp.lt.s32.totalorder %v3403_v12, 2  ;;  %v3664_v33 = vsel %vm3662_vm10, %v3663_v11, %v3659_v5  ;;  %v9958_v1 = vand.u32 2147483647, %v8907_v27  ;;  %v3733_v35 = vsel %vm3732_vm7, %v3731_v0, 0 }
 0x24f   :  { %v3536_v26 = vsel %vm3415_vm12, %v3535_v52, %v3534_v36  ;;  %v3538_v30 = vsel %vm3415_vm12, %v3537_v18, %v8843_v9  ;;  %v3665_v39 = vadd.s32 %v3664_v33, %v3660_v61  ;;  %v3735_v45 = vand.u32 31, %v3733_v35 }
 0x250   :  { %v3407_v54 = vsel %vm3405_vm5, %v8925_v40, %v9957_v59  ;;  %v3410_v51 = vsel %vm3408_vm2, %v9956_v58, %v8928_v24  ;;  %v8976_v8 = vsel %vm8941_vm3, %v8587_v46, %v3536_v26  ;;  %v5443_v56 = vand.u32 2139095040, %v8959_v37 }
 0x251   :  { %v8982_v9 = vsel %vm2940_vm11, nan, %v8644_v34  ;;  %v8987_v41 = vsel %vm9971_vm9, nan, %v8864_v38  ;;  %v3541_v49 = vmul.f32 %v8976_v8, %v8976_v8  ;;  %v3666_v22 = vadd.s32 536870912, %v3665_v39 }
 0x252   :  { %10127 = vst [vmem:[#allocation31_spill] sm:$0xff] %v8982_v9  ;;  %v8993_v46 = vsel %vm3250_vm8, %v3253_v62, %v3256_v14  ;;  %v8997_v25 = vsel %vm8941_vm3, 0, %v3538_v30  ;;  %v3728_v34 = vand.u32 8388607, %v9958_v1  ;;  %v9001_v57 = vsub.s32 32, %v3735_v45 }
 0x253   :  { %10128 = vst [vmem:[#allocation32_spill] sm:$0xff] %v8987_v41  ;;  %v9004_v38 = vsel %vm3404_vm0, %v3407_v54, %v3410_v51  ;;  %v3542_v18 = vmul.f32 -0.001358992, %v3541_v49  ;;  %v3549_v5 = vmul.f32 -0.00019511016, %v3541_v49  ;;  %v9006_v36 = vshrl.u32 %v3666_v22, 30 }
 0x254   :  { %v9009_v23 = vand.u32 3, %v8997_v25  ;;  %v3741_v14 = vshll.u32 %v10050_v63, %v3735_v45  ;;  %v3744_v10 = vshll.u32 %v10051_v21, %v3735_v45  ;;  %v5444_v61 = vshrl.u32 %v5443_v56, 23 }
 0x255   :  { %v3543_v0 = vadd.f32 0.041655596, %v3542_v18  ;;  %v3550_v31 = vadd.f32 0.008332121, %v3549_v5  ;;  %v3668_v62 = vshll.u32 %v9006_v36, 30  ;;  %v3747_v12 = vshll.u32 %v10048_v13, %v3735_v45 }
 0x256   :  { %v3742_v11 = vshrl.u32 %v10051_v21, %v9001_v57  ;;  %v3745_v52 = vshrl.u32 %v10048_v13, %v9001_v57  ;;  %v3748_v33 = vshrl.u32 %v10049_v50, %v9001_v57  ;;  %v3750_v26 = vshll.u32 %v10049_v50, %v3735_v45 }
 0x257   :  { %v3551_v30 = vmul.f32 %v3550_v31, %v3541_v49  ;;  %v9022_v54 = vsub.s32 %v3665_v39, %v3668_v62  ;;  %v3729_v51 = vor.u32 8388608, %v3728_v34  ;;  %v9024_v56 = vshrl.u32 %v3733_v35, 5 }
 0x258   :  { %v3544_v22 = vmul.f32 %v3543_v0, %v3541_v49  ;;  %v3738_v18 = vshll.u32 %v10047_v7, %v3735_v45  ;;  %v3739_v5 = vshrl.u32 %v10050_v63, %v9001_v57  ;;  %v3751_v58 = vshrl.u32 %v10052_v53, %v9001_v57 }
 0x259   :  { %v3552_v59 = vadd.f32 -0.16666654, %v3551_v30  ;;  %vm3670_vm15 = vcmp.lt.s32.totalorder %v9022_v54, 0  ;;  %v3671_v1 = vsub.s32 0, %v9022_v54  ;;  %v6294_v31 = vadd.s32 4294967169, %v5444_v61 }
 0x25a   :  { %vm3569_vm14 = vcmp.lt.s32.totalorder %v8640_v47, 0  ;;  %v3743_v39 = vor.u32 %v3742_v11, %v3741_v14  ;;  %v3746_v35 = vor.u32 %v3745_v52, %v3744_v10  ;;  %v3749_v34 = vor.u32 %v3748_v33, %v3747_v12 }
 0x25b   :  { %v3752_v0 = vor.u32 %v3751_v58, %v3750_v26  ;;  %v3672_v45 = vsel %vm3670_vm15, %v3671_v1, %v9022_v54  ;;  %vm3753_vm6 = vcmp.lt.s32.totalorder %v9024_v56, 1  ;;  %vm3756_vm13 = vcmp.lt.s32.totalorder %v9024_v56, 4 }
 0x25c   :  { %v9037_v62 = vshll.u32 %v3729_v51, 8  ;;  %v3545_v30 = vadd.f32 -0.4999988, %v3544_v22  ;;  %v3673_v41 = vclz %v3672_v45  ;;  %v3740_v9 = vor.u32 %v3739_v5, %v3738_v18 }
 0x25d   :  { %vm3755_vm1 = vcmp.lt.s32.totalorder %v9024_v56, 3  ;;  %v3553_v61 = vmul.f32 %v3552_v59, %v3541_v49  ;;  %vm3754_vm8 = vcmp.lt.s32.totalorder %v9024_v56, 2  ;;  %v9042_v10 = vadd.s32 1, %v6294_v31 }
 0x25e   :  { %v6264_v58 = vadd.s32 4294967294, %v3673_v41  ;;  %v3762_v1 = vsel %vm3756_vm13, %v3749_v34, 920167782  ;;  %v3765_v12 = vsel %vm3753_vm6, %v3743_v39, %v3746_v35  ;;  %v3766_v11 = vsel %vm3756_vm13, %v3752_v0, 1326507024 }
 0x25f   :  { %v3661_v52 = vadd.s32 %v8923_v29, %v8930_v48  ;;  %v3691_v59 = vsub.s32 4, %v9006_v36  ;;  %v3767_v33 = vsel %vm3755_vm1, %v3749_v34, %v3766_v11  ;;  %v3770_v26 = vand.u32 65535, %v9037_v62 }
 0x260   :  { %v3546_v41 = vmul.f32 %v3545_v30, %v3541_v49  ;;  %vm6265_vm12 = vcmp.lt.s32.totalorder %v6264_v58, 0  ;;  %v3761_v51 = vsel %vm3753_vm6, %v3740_v9, %v3743_v39  ;;  %v3771_v22 = vshrl.u32 %v9037_v62, 16 }
 0x261   :  { %v3554_v18 = vadd.f32 1.0, %v3553_v61  ;;  %v3676_v5 = vsel %vm6265_vm12, 0, %v6264_v58  ;;  %v3763_v31 = vsel %vm3755_vm1, %v3746_v35, %v3762_v1  ;;  %v3768_v29 = vsel %vm3754_vm8, %v3765_v12, %v3767_v33 }
 0x262   :  { %v3677_v48 = vsub.s32 32, %v3676_v5  ;;  %v3678_v34 = vshll.u32 %v9022_v54, %v3676_v5  ;;  %v3681_v0 = vsub.s32 4294967266, %v3676_v5  ;;  %vm5451_vm3 = vcmp.gt.s32.totalorder %v9042_v10, 0 }
 0x263   :  { %v9068_v49 = vsel %vm3569_vm14, %v3691_v59, %v9006_v36  ;;  %v3737_v45 = vshrl.u32 %v10047_v7, %v9001_v57  ;;  %v3758_v30 = vsel %vm3756_vm13, %v3746_v35, 2102212464  ;;  %v3772_v61 = vand.u32 65535, %v3768_v29 }
 0x264   :  { %vm3562_vm10 = vcmp.eq.s32.totalorder %v9009_v23, 2  ;;  %v3679_v58 = vshrl.u32 %v3661_v52, %v3677_v48  ;;  %v3682_v1 = vadd.s32 127, %v3681_v0  ;;  %v3764_v54 = vsel %vm3754_vm8, %v3761_v51, %v3763_v31 }
 0x265   :  { %v3773_v12 = vshrl.u32 %v3768_v29, 16  ;;  %v9077_v11 = vadd.f32 1.0, %v3546_v41  ;;  %v9080_v36 = vmul.f32 %v3554_v18, %v8976_v8  ;;  %v3776_v59 = vmul.u32 %v3772_v61, %v3771_v22 }
 0x266   :  { %v3794_v33 = vand.u32 65535, %v3764_v54  ;;  %vm3559_vm5 = vcmp.eq.s32.totalorder %v9009_v23, 0  ;;  %v10129_v57 = vand.u32 2147483647, %v8640_v47  ;;  %v3680_v52 = vor.u32 %v3679_v58, %v3678_v34 }
 0x267   :  { %v3683_v5 = vshll.u32 %v3682_v1, 23  ;;  %v3774_v48 = vmul.u32 %v3772_v61, %v3770_v26  ;;  %v3775_v51 = vmul.u32 %v3773_v12, %v3770_v26  ;;  %v3757_v41 = vsel %vm3753_vm6, %v3737_v45, %v3740_v9  ;;  %v9095_v1 = vld [vmem:[#allocation4 + $0x38] sm:$0xff]  ;;  %v9098_v9 = vld [vmem:[#allocation4 + $0x60] sm:$0xff] }
 0x268   :  { %vm9085_vm2 = vcmp.le.f32.partialorder %v10129_v57, 0.7853982  ;;  %v3759_v8 = vsel %vm3755_vm1, %v3743_v39, %v3758_v30  ;;  %v3777_v18 = vmul.u32 %v3773_v12, %v3771_v22  ;;  %v3795_v31 = vshrl.u32 %v3764_v54, 16 }
 0x269   :  { %v3684_v29 = vor.u32 4788187, %v3683_v5  ;;  %v3687_v0 = vcvt.s32.f32 %v3680_v52  ;;  %v3778_v14 = vshll.u32 %v3775_v51, 16  ;;  %v3780_v4 = vshll.u32 %v3776_v59, 16 }
 0x26a   :  { %vm3558_vm7 = vcmp.lt.s32.totalorder %v9009_v23, 2  ;;  %v3796_v34 = vmul.u32 %v3794_v33, %v3770_v26  ;;  %v3797_v58 = vmul.u32 %v3795_v31, %v3770_v26  ;;  %v3798_v61 = vmul.u32 %v3794_v33, %v3771_v22 }
 0x26b   :  { %vm9970_vm0 = vweird.f32 %v9095_v1  ;;  %vm9969_vm15 = vweird.f32 %v9098_v9  ;;  %v3685_v45 = vand.u32 2147483647, %v3684_v29  ;;  %vm3782_vm6 = vc.u32 %v3774_v48, %v3778_v14 }
 0x26c   :  { %v3784_v30 = vadd.s32 %v3778_v14, %v3774_v48  ;;  %v3783_v54 = vsel %vm3782_vm6, 1, %v10039_v44  ;;  %v3799_v12 = vmul.u32 %v3795_v31, %v3771_v22  ;;  %v3800_v52 = vshll.u32 %v3797_v58, 16 }
 0x26d   :  { %v3802_v5 = vshll.u32 %v3798_v61, 16  ;;  %v3688_v26 = vmul.f32 %v3687_v0, %v3685_v45  ;;  %v3779_v33 = vshrl.u32 %v3775_v51, 16  ;;  %v3785_v57 = vadd.s32 %v3783_v54, %v3777_v18 }
 0x26e   :  { %vm3786_vm13 = vc.u32 %v3784_v30, %v3780_v4  ;;  %vm3804_vm1 = vc.u32 %v3796_v34, %v3800_v52  ;;  %v3806_v24 = vadd.s32 %v3800_v52, %v3796_v34  ;;  %v5452_v39 = vsel %vm5451_vm3, %v9042_v10, 0  ;;  %v9126_v30 = vld [vmem:[#allocation4 + $0x68] sm:$0xff] }
 0x26f   :  { %v3787_v40 = vsel %vm3786_vm13, 1, %v10039_v44  ;;  %v3689_v29 = vxor.u32 2147483648, %v3688_v26  ;;  %v3781_v60 = vshrl.u32 %v3776_v59, 16  ;;  %v3805_v48 = vsel %vm3804_vm1, 1, %v10039_v44 }
 0x270   :  { %v3789_v14 = vadd.s32 %v3787_v40, %v3785_v57  ;;  %v10132_v22 = vxor.u32 2147483648, %v9077_v11  ;;  %v3801_v4 = vshrl.u32 %v3797_v58, 16  ;;  %v3807_v18 = vadd.s32 %v3805_v48, %v3799_v12 }
 0x271   :  { %vm3808_vm12 = vc.u32 %v3806_v24, %v3802_v5  ;;  %v3690_v31 = vsel %vm3569_vm14, %v3689_v29, %v3688_v26  ;;  %v5454_v34 = vand.u32 31, %v5452_v39  ;;  %v10133_v40 = vxor.u32 2147483648, %v9080_v36 }
 0x272   :  { %v3564_v51 = vsel %vm3562_vm10, %v10132_v22, %v9080_v36  ;;  %v3790_v0 = vadd.s32 %v3789_v14, %v3779_v33  ;;  %v3809_v10 = vsel %vm3808_vm12, 1, %v10039_v44  ;;  %v9124_v57 = vsel %vm9085_vm2, %v8640_v47, %v3690_v31 }
 0x273   :  { %v3561_v59 = vsel %vm3559_vm5, %v9077_v11, %v10133_v40  ;;  %v3803_v58 = vshrl.u32 %v3798_v61, 16  ;;  %v3811_v45 = vadd.s32 %v3809_v10, %v3807_v18  ;;  %vm9968_vm14 = vweird.f32 %v9126_v30 }
 0x274   :  { %v3695_v54 = vmul.f32 %v9124_v57, %v9124_v57  ;;  %v9131_v12 = vadd.s32 %v3790_v0, %v3781_v60  ;;  %v9133_v52 = vadd.s32 %v3806_v24, %v3802_v5  ;;  %v9138_v26 = vsel %vm9085_vm2, 0, %v9068_v49 }
 0x275   :  { %v3760_v47 = vsel %vm3754_vm8, %v3757_v41, %v3759_v8  ;;  %v3812_v61 = vadd.s32 %v3811_v45, %v3801_v4  ;;  %v10134_v33 = vand.u32 2147483647, %v8959_v37  ;;  %v3565_v14 = vsel %vm3558_vm7, %v3561_v59, %v3564_v51 }
 0x276   :  { %v3696_v60 = vmul.f32 -0.001358992, %v3695_v54  ;;  %v3703_v48 = vmul.f32 -0.00019511016, %v3695_v54  ;;  %v5455_v24 = vsub.s32 32, %v5454_v34  ;;  %v9151_v35 = vsel %vm9970_vm0, nan, %v8993_v46 }
 0x277   :  { %v9144_v29 = vand.u32 8388607, %v10134_v33  ;;  %v9156_v56 = vsel %vm9969_vm15, nan, %v9004_v38  ;;  %v9159_v49 = vand.u32 3, %v9138_v26  ;;  %v3813_v41 = vadd.s32 %v3812_v61, %v3803_v58 }
 0x278   :  { %v3697_v8 = vadd.f32 0.041655596, %v3696_v60  ;;  %v3704_v23 = vadd.f32 0.008332121, %v3703_v48  ;;  %v3814_v5 = vmul.u32 %v9037_v62, %v3760_v47  ;;  %vm3816_vm8 = vc.u32 %v9131_v12, %v9133_v52 }
 0x279   :  { %v9166_v46 = vsel %vm9968_vm14, nan, %v3565_v14  ;;  %v3817_v22 = vadd.s32 1, %v3813_v41  ;;  %v9169_v38 = vshrl.u32 %v5452_v39, 5  ;;  %v5466_v31 = vshll.u32 %v10048_v13, %v5454_v34 }
 0x27a   :  { %v3698_v4 = vmul.f32 %v3697_v8, %v3695_v54  ;;  %v3705_v18 = vmul.f32 %v3704_v23, %v3695_v54  ;;  %v5467_v0 = vshrl.u32 %v10049_v50, %v5455_v24  ;;  %v5457_v62 = vshll.u32 %v10047_v7, %v5454_v34 }
 0x27b   :  { %v3818_v10 = vsel %vm3816_vm8, %v3817_v22, %v3813_v41  ;;  %v5458_v40 = vshrl.u32 %v10050_v63, %v5455_v24  ;;  %v5460_v59 = vshll.u32 %v10050_v63, %v5454_v34  ;;  %vm3716_vm3 = vcmp.eq.s32.totalorder %v9159_v49, 2 }
 0x27c   :  { %v3699_v58 = vadd.f32 -0.4999988, %v3698_v4  ;;  %v3706_v45 = vadd.f32 -0.16666654, %v3705_v18  ;;  %v3819_v47 = vadd.s32 %v3818_v10, %v3814_v5  ;;  %v5461_v39 = vshrl.u32 %v10051_v21, %v5455_v24 }
 0x27d   :  { %vm3713_vm10 = vcmp.eq.s32.totalorder %v9159_v49, 0  ;;  %v5463_v61 = vshll.u32 %v10051_v21, %v5454_v34  ;;  %v5464_v33 = vshrl.u32 %v10048_v13, %v5455_v24  ;;  %v5469_v14 = vshll.u32 %v10049_v50, %v5454_v34 }
 0x27e   :  { %v5470_v60 = vshrl.u32 %v10052_v53, %v5455_v24  ;;  %v3700_v48 = vmul.f32 %v3699_v58, %v3695_v54  ;;  %v3707_v41 = vmul.f32 %v3706_v45, %v3695_v54  ;;  %vm3723_vm5 = vcmp.lt.s32.totalorder %v8907_v27, 0 }
 0x27f   :  { %v3820_v8 = vadd.s32 536870912, %v3819_v47  ;;  %v5468_v23 = vor.u32 %v5467_v0, %v5466_v31  ;;  %v9185_v5 = vshrl.u32 %v10047_v7, %v5455_v24  ;;  %v9187_v22 = vor.u32 %v5458_v40, %v5457_v62 }
 0x280   :  { %vm9972_vm2 = vcmp.lt.s32.totalorder %v9169_v38, 1  ;;  %vm9973_vm7 = vcmp.lt.s32.totalorder %v9169_v38, 4  ;;  %v9191_v4 = vadd.f32 1.0, %v3700_v48  ;;  %v3708_v34 = vadd.f32 1.0, %v3707_v41 }
 0x281   :  { %v3821_v18 = vshrl.u32 %v3820_v8, 30  ;;  %v4019_v10 = vadd.s32 3, %v8355_v2  ;;  %vm3712_vm6 = vcmp.lt.s32.totalorder %v9159_v49, 2  ;;  %v4174_v54 = vadd.s32 3, %v8522_v20 }
 0x282   :  { %v9196_v31 = vor.u32 %v5461_v39, %v5460_v59  ;;  %v9198_v24 = vor.u32 %v5464_v33, %v5463_v61  ;;  %vm5474_vm13 = vcmp.lt.s32.totalorder %v9169_v38, 3  ;;  %v9202_v0 = vmul.f32 %v3708_v34, %v9124_v57 }
 0x283   :  { %v3822_v62 = vshll.u32 %v3821_v18, 30  ;;  %v5471_v40 = vor.u32 %v5470_v60, %v5469_v14  ;;  %v5481_v58 = vsel %vm9973_vm7, %v5468_v23, 920167782  ;;  %v9974_v2 = vxor.u32 2147483648, %v9191_v4  ;;  %v9217_v60 = vld [vmem:[#allocation4 + $0x70] sm:$0xff] }
 0x284   :  { %v10135_v45 = vand.u32 2147483647, %v8907_v27  ;;  %v3845_v59 = vsub.s32 4, %v3821_v18  ;;  %v4020_v39 = vand.u32 3, %v4019_v10  ;;  %v4175_v61 = vand.u32 3, %v4174_v54 }
 0x285   :  { %v9975_v33 = vxor.u32 2147483648, %v9202_v0  ;;  %v3815_v57 = vadd.s32 %v9133_v52, %v9131_v12  ;;  %v3823_v14 = vsub.s32 %v3819_v47, %v3822_v62  ;;  %vm5473_vm12 = vcmp.lt.s32.totalorder %v9169_v38, 2 }
 0x286   :  { %vm9209_vm1 = vcmp.le.f32.partialorder %v10135_v45, 0.7853982  ;;  %vm3710_vm8 = vweird.f32 %v9217_v60  ;;  %vm4022_vm14 = vcmp.eq.s32.totalorder %v4020_v39, 0  ;;  %v4329_v48 = vadd.s32 3, %v8648_v55 }
 0x287   :  { %v5480_v41 = vsel %vm9972_vm2, %v9187_v22, %v9196_v31  ;;  %v9229_v12 = vsel %vm9972_vm2, %v9196_v31, %v9198_v24  ;;  %vm3824_vm15 = vcmp.lt.s32.totalorder %v3823_v14, 0  ;;  %v3825_v52 = vsub.s32 0, %v3823_v14 }
 0x288   :  { %vm4025_vm0 = vcmp.eq.s32.totalorder %v4020_v39, 2  ;;  %v5482_v47 = vsel %vm5474_vm13, %v9198_v24, %v5481_v58  ;;  %v3718_v55 = vsel %vm3716_vm3, %v9974_v2, %v9202_v0  ;;  %v3846_v8 = vsel %vm3723_vm5, %v3845_v59, %v3821_v18 }
 0x289   :  { %vm4177_vm9 = vcmp.eq.s32.totalorder %v4175_v61, 0  ;;  %v5485_v34 = vsel %vm9973_vm7, %v5471_v40, 1326507024  ;;  %v3715_v10 = vsel %vm3713_vm10, %v9191_v4, %v9975_v33  ;;  %v3826_v54 = vsel %vm3824_vm15, %v3825_v52, %v3823_v14 }
 0x28a   :  { %vm4021_vm2 = vcmp.lt.s32.totalorder %v4020_v39, 2  ;;  %v10138_v62 = vxor.u32 2147483648, %v8505_v28  ;;  %v3827_v45 = vclz %v3826_v54  ;;  %v10139_v18 = vxor.u32 2147483648, %v8477_v6 }
 0x28b   :  { %vm4180_vm3 = vcmp.eq.s32.totalorder %v4175_v61, 2  ;;  %v4330_v51 = vand.u32 3, %v4329_v48  ;;  %vm4176_vm7 = vcmp.lt.s32.totalorder %v4175_v61, 2  ;;  %v10140_v40 = vxor.u32 2147483648, %v8571_v19 }
 0x28c   :  { %v4024_v58 = vsel %vm4022_vm14, %v8477_v6, %v10138_v62  ;;  %v4027_v59 = vsel %vm4025_vm0, %v10139_v18, %v8505_v28  ;;  %v10141_v52 = vxor.u32 2147483648, %v8568_v17  ;;  %v4484_v37 = vadd.s32 3, %v8825_v3  ;;  %v10149_v18 = vld [vmem:[#allocation26_spill] sm:$0xff] }
 0x28d   :  { %v4179_v2 = vsel %vm4177_vm9, %v8568_v17, %v10140_v40  ;;  %v6267_v53 = vadd.s32 4294967294, %v3827_v45  ;;  %vm4332_vm15 = vcmp.eq.s32.totalorder %v4330_v51, 0  ;;  %v9263_v54 = vsel %vm5473_vm12, %v5480_v41, %v5482_v47 }
 0x28e   :  { %v4182_v33 = vsel %vm4180_vm3, %v10141_v52, %v8571_v19  ;;  %v9267_v6 = vsel %vm5474_vm13, %v5468_v23, %v5485_v34  ;;  %v3719_v28 = vsel %vm3712_vm6, %v3715_v10, %v3718_v55  ;;  %v9273_v61 = vsel %vm9209_vm1, 0, %v3846_v8 }
 0x28f   :  { %vm4335_vm9 = vcmp.eq.s32.totalorder %v4330_v51, 2  ;;  %v4485_v17 = vand.u32 3, %v4484_v37  ;;  %vm6268_vm0 = vcmp.lt.s32.totalorder %v6267_v53, 0  ;;  %v4028_v19 = vsel %vm4021_vm2, %v4024_v58, %v4027_v59 }
 0x290   :  { %v4183_v3 = vsel %vm4176_vm7, %v4179_v2, %v4182_v33  ;;  %v4639_v48 = vadd.s32 3, %v8875_v43  ;;  %v3830_v41 = vsel %vm6268_vm0, 0, %v6267_v53  ;;  %vm4331_vm14 = vcmp.lt.s32.totalorder %v4330_v51, 2  ;;  %v10157_v43 = vld [vmem:[#allocation27_spill] sm:$0xff] }
 0x291   :  { %v10142_v23 = vxor.u32 2147483648, %v8689_v15  ;;  %v4794_v49 = vadd.s32 3, %v8997_v25  ;;  %v3831_v55 = vsub.s32 32, %v3830_v41  ;;  %v3832_v34 = vshll.u32 %v3823_v14, %v3830_v41 }
 0x292   :  { %v3835_v8 = vsub.s32 4294967266, %v3830_v41  ;;  %v10143_v37 = vxor.u32 2147483648, %v8681_v16  ;;  %v9286_v2 = vsel %vm3710_vm8, nan, %v3719_v28  ;;  %v9290_v53 = vsel %vm2786_vm4, nan, %v4028_v19  ;;  %v10151_v28 = vld [vmem:[#allocation29_spill] sm:$0xff]  ;;  %v10153_v19 = vld [vmem:[#allocation28_spill] sm:$0xff] }
 0x293   :  { %v4334_v47 = vsel %vm4332_vm15, %v8681_v16, %v10142_v23  ;;  %10144 = vst [vmem:[#allocation33_spill] sm:$0xff] %v9286_v2  ;;  %v9294_v51 = vsel %vm2940_vm11, nan, %v4183_v3  ;;  %vm4487_vm10 = vcmp.eq.s32.totalorder %v4485_v17, 0  ;;  %v3833_v25 = vshrl.u32 %v3815_v57, %v3831_v55 }
 0x294   :  { %v4337_v10 = vsel %vm4335_vm9, %v10143_v37, %v8689_v15  ;;  %10146 = vst [vmem:[#allocation9_spill] sm:$0xff] %v9290_v53  ;;  %v3836_v39 = vadd.s32 127, %v3835_v8  ;;  %vm4490_vm2 = vcmp.eq.s32.totalorder %v4485_v17, 2  ;;  %v4640_v33 = vand.u32 3, %v4639_v48 }
 0x295   :  { %10147 = vst [vmem:[#allocation34_spill] sm:$0xff] %v9294_v51  ;;  %v4338_v14 = vsel %vm4331_vm14, %v4334_v47, %v4337_v10  ;;  %vm4486_vm7 = vcmp.lt.s32.totalorder %v4485_v17, 2  ;;  %v4795_v16 = vand.u32 3, %v4794_v49  ;;  %v4949_v15 = vadd.s32 3, %v9138_v26 }
 0x296   :  { %v3834_v62 = vor.u32 %v3833_v25, %v3832_v34  ;;  %v3837_v58 = vshll.u32 %v3836_v39, 23  ;;  %v10148_v45 = vxor.u32 2147483648, %v8871_v32  ;;  %v10150_v42 = vxor.u32 2147483648, %v10149_v18 }
 0x297   :  { %vm4641_vm4 = vcmp.lt.s32.totalorder %v4640_v33, 2  ;;  %vm4642_vm11 = vcmp.eq.s32.totalorder %v4640_v33, 0  ;;  %vm4645_vm6 = vcmp.eq.s32.totalorder %v4640_v33, 2  ;;  %vm4796_vm3 = vcmp.lt.s32.totalorder %v4795_v16, 2 }
 0x298   :  { %v4489_v59 = vsel %vm4487_vm10, %v10149_v18, %v10148_v45  ;;  %v4492_v40 = vsel %vm4490_vm2, %v10150_v42, %v8871_v32  ;;  %v3838_v57 = vor.u32 4788187, %v3837_v58  ;;  %v3841_v52 = vcvt.s32.f32 %v3834_v62  ;;  %v10168_v18 = vld [vmem:[#allocation14_spill] sm:$0xff]  ;;  %v10171_v42 = vld [vmem:[#allocation31_spill] sm:$0xff] }
 0x299   :  { %v10152_v17 = vxor.u32 2147483648, %v10151_v28  ;;  %v10154_v3 = vxor.u32 2147483648, %v10153_v19  ;;  %v4493_v41 = vsel %vm4486_vm7, %v4489_v59, %v4492_v40  ;;  %vm4797_vm15 = vcmp.eq.s32.totalorder %v4795_v16, 0  ;;  %v10169_v59 = vld [vmem:[#allocation25_spill] sm:$0xff] }
 0x29a   :  { %vm4800_vm9 = vcmp.eq.s32.totalorder %v4795_v16, 2  ;;  %v4950_v23 = vand.u32 3, %v4949_v15  ;;  %v3839_v47 = vand.u32 2147483647, %v3838_v57  ;;  %v10155_v49 = vxor.u32 2147483648, %v9080_v36  ;;  %v10174_v57 = vld [vmem:[#allocation32_spill] sm:$0xff] }
 0x29b   :  { %v4644_v26 = vsel %vm4642_vm11, %v10153_v19, %v10152_v17  ;;  %v4647_v48 = vsel %vm4645_vm6, %v10154_v3, %v10151_v28  ;;  %v10156_v34 = vxor.u32 2147483648, %v9077_v11  ;;  %vm10158_vm2 = vweird.f32 %v10157_v43  ;;  %v10175_v28 = vld [vmem:[#allocation21_spill] sm:$0xff]  ;;  %v10176_v19 = vld [vmem:[#allocation22_spill] sm:$0xff]  ;;  %v10177_v3 = vld [vmem:[#allocation24_spill] sm:$0xff] }
 0x29c   :  { %v4648_v32 = vsel %vm4641_vm4, %v4644_v26, %v4647_v48  ;;  %v4799_v55 = vsel %vm4797_vm15, %v9077_v11, %v10155_v49  ;;  %vm4951_vm0 = vcmp.lt.s32.totalorder %v4950_v23, 2  ;;  %vm4952_vm14 = vcmp.eq.s32.totalorder %v4950_v23, 0  ;;  %v10180_v49 = vld [vmem:[#allocation13_spill] sm:$0xff] }
 0x29d   :  { %v4802_v8 = vsel %vm4800_vm9, %v10156_v34, %v9080_v36  ;;  %vm4955_vm10 = vcmp.eq.s32.totalorder %v4950_v23, 2  ;;  %v3842_v10 = vmul.f32 %v3841_v52, %v3839_v47  ;;  %v9317_v25 = vsel %vm10158_vm2, nan, %v4338_v14  ;;  %v10179_v23 = vld [vmem:[#allocation16_spill] sm:$0xff]  ;;  %v10181_v34 = vld [vmem:[#allocation18_spill] sm:$0xff] }
 0x29e   :  { %v4803_v37 = vsel %vm4796_vm3, %v4799_v55, %v4802_v8  ;;  %10159 = vst [vmem:[#allocation26_spill] sm:$0xff] %v9317_v25  ;;  %v10160_v39 = vxor.u32 2147483648, %v9202_v0  ;;  %v10161_v16 = vxor.u32 2147483648, %v9191_v4  ;;  %vm10162_vm7 = vweird.f32 %v9095_v1 }
 0x29f   :  { %v9327_v11 = vsel %vm10162_vm7, nan, %v4493_v41  ;;  %vm10164_vm4 = vweird.f32 %v9098_v9  ;;  %v5104_v14 = vadd.s32 3, %v9273_v61  ;;  %v3843_v58 = vxor.u32 2147483648, %v3842_v10  ;;  %v10173_v9 = vld [vmem:[#allocation20_spill] sm:$0xff] }
 0x2a0   :  { %v4954_v33 = vsel %vm4952_vm14, %v9191_v4, %v10160_v39  ;;  %v4957_v15 = vsel %vm4955_vm10, %v10161_v16, %v9202_v0  ;;  %10163 = vst [vmem:[#allocation29_spill] sm:$0xff] %v9327_v11  ;;  %v9331_v36 = vsel %vm10164_vm4, nan, %v4648_v32  ;;  %vm10166_vm11 = vweird.f32 %v9126_v30  ;;  %v10170_v0 = vld [vmem:[#allocation17_spill] sm:$0xff]  ;;  %v10178_v41 = vld [vmem:[#allocation8_spill] sm:$0xff]  ;;  %v10183_v39 = vld [vmem:[#allocation15_spill] sm:$0xff] }
 0x2a1   :  { %10165 = vst [vmem:[#allocation28_spill] sm:$0xff] %v9331_v36  ;;  %v4958_v62 = vsel %vm4951_vm0, %v4954_v33, %v4957_v15  ;;  %v9336_v45 = vsel %vm10166_vm11, nan, %v4803_v37  ;;  %v5115_v4 = vmul.f32 %v10169_v59, %v10168_v18  ;;  %v5116_v1 = vmul.f32 %v10171_v42, %v10170_v0  ;;  %v10182_v37 = vld [vmem:[#allocation10_spill] sm:$0xff]  ;;  %v10184_v16 = vld [vmem:[#allocation12_spill] sm:$0xff]  ;;  %v10185_v15 = vld [vmem:[#allocation11_spill] sm:$0xff] }
 0x2a2   :  { %10167 = vst [vmem:[#allocation27_spill] sm:$0xff] %v9336_v45  ;;  %v9344_v40 = vsel %vm3710_vm8, nan, %v4958_v62  ;;  %v5117_v52 = vmul.f32 %v10174_v57, %v10173_v9  ;;  %v5118_v17 = vmul.f32 %v9151_v35, %v10175_v28  ;;  %v5119_v30 = vmul.f32 %v9156_v56, %v10176_v19 }
 0x2a3   :  { %10172 = vst [vmem:[#allocation14_spill] sm:$0xff] %v9344_v40  ;;  %v3844_v26 = vsel %vm3723_vm5, %v3843_v58, %v3842_v10  ;;  %v5120_v48 = vmul.f32 %v9166_v46, %v10177_v3  ;;  %v5121_v60 = vmul.f32 %v9286_v2, %v10178_v41  ;;  %v5123_v47 = vmul.f32 %v9290_v53, %v10179_v23 }
 0x2a4   :  { %v9363_v32 = vsel %vm9209_vm1, %v8907_v27, %v3844_v26  ;;  %v5124_v55 = vmul.f32 %v9294_v51, %v10180_v49  ;;  %v5125_v8 = vmul.f32 %v9317_v25, %v10181_v34  ;;  %v5126_v10 = vmul.f32 %v9327_v11, %v10182_v37 }
 0x2a5   :  { %v3849_v43 = vmul.f32 %v9363_v32, %v9363_v32  ;;  %v5127_v33 = vmul.f32 %v9331_v36, %v10183_v39  ;;  %v5128_v20 = vmul.f32 %v9336_v45, %v10184_v16  ;;  %v5129_v62 = vmul.f32 %v9344_v40, %v10185_v15 }
 0x2a6   :  { %v5131_v58 = vadd.f32 %v5123_v47, %v5115_v4  ;;  %v5132_v26 = vadd.f32 %v5124_v55, %v5116_v1  ;;  %v5133_v51 = vadd.f32 %v5125_v8, %v5117_v52  ;;  %v5134_v53 = vadd.f32 %v5126_v10, %v5118_v17 }
 0x2a7   :  { %v3850_v25 = vmul.f32 -0.001358992, %v3849_v43  ;;  %v3857_v34 = vmul.f32 -0.00019511016, %v3849_v43  ;;  %v9380_v11 = vand.u32 3, %v9273_v61  ;;  %v5135_v37 = vadd.f32 %v5127_v33, %v5119_v30 }
 0x2a8   :  { %v9382_v49 = vand.u32 3, %v5104_v14  ;;  %v5139_v23 = vsub.f32 1.0, %v5131_v58  ;;  %v5140_v36 = vsub.f32 1.0, %v5132_v26  ;;  %v5141_v39 = vsub.f32 1.0, %v5133_v51 }
 0x2a9   :  { %v3851_v2 = vadd.f32 0.041655596, %v3850_v25  ;;  %v3858_v45 = vadd.f32 0.008332121, %v3857_v34  ;;  %v5136_v16 = vadd.f32 %v5128_v20, %v5120_v48  ;;  %v5142_v41 = vsub.f32 1.0, %v5134_v53 }
 0x2aa   :  { %v5137_v40 = vadd.f32 %v5129_v62, %v5121_v60  ;;  %v5143_v4 = vsub.f32 1.0, %v5135_v37  ;;  %vm10186_vm5 = vcmask 130048   ;;  %vm3867_vm6 = vcmp.eq.s32.totalorder %v9380_v11, 0 }
 0x2ab   :  { %v5147_v1 = vsel %vm10186_vm5, %v5139_v23, 0.0  ;;  %vm10187_vm1 = vmmov %vm10186_vm5  ;;  %v3852_v17 = vmul.f32 %v3851_v2, %v3849_v43  ;;  %v3859_v47 = vmul.f32 %v3858_v45, %v3849_v43  ;;  %vm3870_vm3 = vcmp.eq.s32.totalorder %v9380_v11, 2 }
 0x2ac   :  { %v5148_v52 = vsel %vm10187_vm1, %v5140_v36, 0.0  ;;  %vm10188_vm8 = vmmov %vm10187_vm1  ;;  %vm5107_vm15 = vcmp.eq.s32.totalorder %v9382_v49, 0  ;;  %vm5110_vm9 = vcmp.eq.s32.totalorder %v9382_v49, 2  ;;  %vm3866_vm14 = vcmp.lt.s32.totalorder %v9380_v11, 2 }
 0x2ad   :  { %v5149_v61 = vadd.f32 %v5148_v52, %v5147_v1  ;;  %v5150_v30 = vsel %vm10188_vm8, %v5141_v39, 0.0  ;;  %vm10189_vm0 = vmmov %vm10187_vm1  ;;  %v3853_v51 = vadd.f32 -0.4999988, %v3852_v17  ;;  %v3860_v25 = vadd.f32 -0.16666654, %v3859_v47 }
 0x2ae   :  { %v5152_v53 = vsel %vm10189_vm0, %v5142_v41, 0.0  ;;  %vm5106_vm10 = vcmp.lt.s32.totalorder %v9382_v49, 2  ;;  %v5144_v2 = vsub.f32 1.0, %v5136_v16  ;;  %vm3864_vm2 = vweird.f32 %v8907_v27  ;;  %vm10190_vm7 = vmmov %vm10189_vm0 }
 0x2af   :  { %v5151_v36 = vadd.f32 %v5150_v30, %v5149_v61  ;;  %v5145_v14 = vsub.f32 1.0, %v5137_v40  ;;  %v5154_v45 = vsel %vm10190_vm7, %v5143_v4, 0.0  ;;  %v5487_v48 = vsel %vm5473_vm12, %v9229_v12, %v9267_v6  ;;  %vm10192_vm4 = vmmov %vm10189_vm0 }
 0x2b0   :  { %v10191_v41 = vor.u32 8388608, %v9144_v29  ;;  %v3854_v23 = vmul.f32 %v3853_v51, %v3849_v43  ;;  %v3861_v55 = vmul.f32 %v3860_v25, %v3849_v43  ;;  %v5491_v8 = vand.u32 65535, %v5487_v48  ;;  %vm10193_vm11 = vmmov %vm10189_vm0 }
 0x2b1   :  { %v5153_v34 = vadd.f32 %v5152_v53, %v5151_v36  ;;  %v5492_v40 = vshrl.u32 %v5487_v48, 16  ;;  %v5513_v39 = vand.u32 65535, %v9263_v54  ;;  %v5156_v12 = vsel %vm10192_vm4, %v5144_v2, 0.0 }
 0x2b2   :  { %v9402_v60 = vshll.u32 %v10191_v41, 8  ;;  %v3855_v33 = vadd.f32 1.0, %v3854_v23  ;;  %v3862_v16 = vadd.f32 1.0, %v3861_v55  ;;  %v5514_v58 = vshrl.u32 %v9263_v54, 16 }
 0x2b3   :  { %v5155_v20 = vadd.f32 %v5154_v45, %v5153_v34  ;;  %v5158_v4 = vsel %vm10193_vm11, %v5145_v14, 0.0  ;;  %vm10196_vm8 = vcmp.lt.s32.totalorder %v9169_v38, 4 }
 0x2b4   :  { %v5489_v37 = vand.u32 65535, %v9402_v60  ;;  %v5490_v10 = vshrl.u32 %v9402_v60, 16  ;;  %v3863_v43 = vmul.f32 %v3862_v16, %v9363_v32  ;;  %v3871_v26 = vxor.u32 2147483648, %v3855_v33 }
 0x2b5   :  { %v5157_v52 = vadd.f32 %v5156_v12, %v5155_v20  ;;  %v5477_v27 = vsel %vm10196_vm8, %v9198_v24, 2102212464 }
 0x2b6   :  { %v5493_v6 = vmul.u32 %v5491_v8, %v5489_v37  ;;  %v5494_v29 = vmul.u32 %v5492_v40, %v5489_v37  ;;  %v5495_v62 = vmul.u32 %v5491_v8, %v5490_v10  ;;  %v5496_v1 = vmul.u32 %v5492_v40, %v5490_v10 }
 0x2b7   :  { %v5515_v61 = vmul.u32 %v5513_v39, %v5489_v37  ;;  %v3868_v30 = vxor.u32 2147483648, %v3863_v43  ;;  %v3872_v53 = vsel %vm3870_vm3, %v3871_v26, %v3863_v43  ;;  %v5112_v51 = vsel %vm5110_vm9, %v3871_v26, %v3863_v43  ;;  %vm10198_vm9 = vmmov %vm10189_vm0 }
 0x2b8   :  { %v5497_v17 = vshll.u32 %v5494_v29, 16  ;;  %v5499_v47 = vshll.u32 %v5495_v62, 16  ;;  %v5498_v25 = vshrl.u32 %v5494_v29, 16  ;;  %v5516_v2 = vmul.u32 %v5514_v58, %v5489_v37 }
 0x2b9   :  { %v5517_v32 = vmul.u32 %v5513_v39, %v5490_v10  ;;  %v3869_v36 = vsel %vm3867_vm6, %v3855_v33, %v3868_v30  ;;  %v5109_v14 = vsel %vm5107_vm15, %v3855_v33, %v3868_v30  ;;  %v5518_v48 = vmul.u32 %v5514_v58, %v5490_v10  ;;  %v10194_v10 = vld [vmem:[#allocation19_spill] sm:$0xff] }
 0x2ba   :  { %vm5501_vm5 = vc.u32 %v5493_v6, %v5497_v17  ;;  %v5503_v54 = vadd.s32 %v5497_v17, %v5493_v6  ;;  %v3873_v41 = vsel %vm3866_vm14, %v3869_v36, %v3872_v53  ;;  %v5113_v23 = vsel %vm5106_vm10, %v5109_v14, %v5112_v51  ;;  %v10195_v39 = vld [vmem:[#allocation23_spill] sm:$0xff] }
 0x2bb   :  { %v5502_v45 = vsel %vm5501_vm5, 1, %v10039_v44  ;;  %v9426_v34 = vsel %vm3864_vm2, nan, %v3873_v41  ;;  %v9430_v8 = vsel %vm3864_vm2, nan, %v5113_v23  ;;  %v5519_v40 = vshll.u32 %v5516_v2, 16  ;;  %v9440_v33 = vld [vmem:[%s9867_s3] sm:$0x3] }
 0x2bc   :  { %v5504_v55 = vadd.s32 %v5502_v45, %v5496_v1  ;;  %vm5505_vm1 = vc.u32 %v5503_v54, %v5499_v47  ;;  %v5122_v11 = vmul.f32 %v9426_v34, %v10194_v10  ;;  %v5130_v49 = vmul.f32 %v9430_v8, %v10195_v39 }
 0x2bd   :  { %v5506_v37 = vsel %vm5505_vm1, 1, %v10039_v44  ;;  %v5500_v20 = vshrl.u32 %v5495_v62, 16  ;;  %v5521_v12 = vshll.u32 %v5517_v32, 16  ;;  %vm5523_vm6 = vc.u32 %v5515_v61, %v5519_v40 }
 0x2be   :  { %v5508_v16 = vadd.s32 %v5506_v37, %v5504_v55  ;;  %v5525_v6 = vadd.s32 %v5519_v40, %v5515_v61  ;;  %v5138_v29 = vadd.f32 %v5130_v49, %v5122_v11  ;;  %v5159_v58 = vadd.f32 %v5158_v4, %v5157_v52 }
 0x2bf   :  { %v5524_v26 = vsel %vm5523_vm6, 1, %v10039_v44  ;;  %v5520_v1 = vshrl.u32 %v5516_v2, 16  ;;  %v5752_v47 = vand.u32 2139095040, %v9440_v33  ;;  %vm10197_vm15 = vcmp.lt.s32.totalorder %v9169_v38, 1 }
 0x2c0   :  { %v5509_v43 = vadd.s32 %v5508_v16, %v5498_v25  ;;  %v5526_v17 = vadd.s32 %v5524_v26, %v5518_v48  ;;  %vm5527_vm3 = vc.u32 %v5525_v6, %v5521_v12  ;;  %v5146_v30 = vsub.f32 1.0, %v5138_v29 }
 0x2c1   :  { %v5476_v24 = vsel %vm10197_vm15, %v9185_v5, %v9187_v22  ;;  %v5478_v62 = vsel %vm5474_vm13, %v9196_v31, %v5477_v27  ;;  %v5528_v4 = vsel %vm5527_vm3, 1, %v10039_v44  ;;  %v5522_v52 = vshrl.u32 %v5517_v32, 16 }
 0x2c2   :  { %v5530_v61 = vadd.s32 %v5528_v4, %v5526_v17  ;;  %v5753_v53 = vshrl.u32 %v5752_v47, 23  ;;  %v5160_v51 = vsel %vm10198_vm9, %v5146_v30, 0.0  ;;  %v9456_v25 = vadd.s32 %v5509_v43, %v5500_v20 }
 0x2c3   :  { %v9458_v54 = vadd.s32 %v5525_v6, %v5521_v12  ;;  %v5161_v2 = vadd.f32 %v5160_v51, %v5159_v58  ;;  %v5479_v36 = vsel %vm5473_vm12, %v5476_v24, %v5478_v62  ;;  %v5749_v31 = vand.u32 2147483647, %v9440_v33 }
 0x2c4   :  { %v5531_v5 = vadd.s32 %v5530_v61, %v5520_v1  ;;  %v6300_v22 = vadd.s32 4294967169, %v5753_v53  ;;  %v5533_v32 = vmul.u32 %v9402_v60, %v5479_v36  ;;  %v10199_v17 = vmov 1326507024  }
 0x2c5   :  { %5162 = vadd.xlane.f32.xlu0 %v5161_v2  ;;  %vm5535_vm13 = vc.u32 %v9456_v25, %v9458_v54  ;;  %v5756_v38 = vand.u32 8388607, %v5749_v31 }
 0x2c6   :  { %v5532_v14 = vadd.s32 %v5531_v5, %v5522_v52  ;;  %v5759_v45 = vadd.s32 1, %v6300_v22 }
 0x2c7   :  { %v5757_v6 = vor.u32 8388608, %v5756_v38 }
 0x2c8   :  { %v5536_v48 = vadd.s32 1, %v5532_v14  ;;  %vm5760_vm0 = vcmp.gt.s32.totalorder %v5759_v45, 0 }
 0x2c9   :  { %v5761_v41 = vsel %vm5760_vm0, %v5759_v45, 0  ;;  %vm5751_vm0 = vcmp.lt.s32.totalorder %v9440_v33, 0 }
 0x2ca   :  { %v5537_v23 = vsel %vm5535_vm13, %v5536_v48, %v5532_v14  ;;  %v5763_v55 = vand.u32 31, %v5761_v41  ;;  %v9468_v40 = vshrl.u32 %v5761_v41, 5 }
 0x2cb   :  { %v5538_v37 = vadd.s32 %v5537_v23, %v5533_v32 }
 0x2cc   :  { %v9470_v11 = vsub.s32 32, %v5763_v55  ;;  %v5766_v49 = vshll.u32 %v10047_v7, %v5763_v55  ;;  %v5769_v60 = vshll.u32 %v10050_v63, %v5763_v55  ;;  %v5772_v27 = vshll.u32 %v10051_v21, %v5763_v55 }
 0x2cd   :  { %v5539_v16 = vadd.s32 536870912, %v5538_v37  ;;  %v5775_v20 = vshll.u32 %v10048_v13, %v5763_v55  ;;  %v5778_v12 = vshll.u32 %v10049_v50, %v5763_v55  ;;  %vm5781_vm12 = vcmp.lt.s32.totalorder %v9468_v40, 1 }
 0x2ce   :  { %v5767_v29 = vshrl.u32 %v10050_v63, %v9470_v11  ;;  %v5770_v58 = vshrl.u32 %v10051_v21, %v9470_v11  ;;  %v5773_v43 = vshrl.u32 %v10048_v13, %v9470_v11  ;;  %v5776_v1 = vshrl.u32 %v10049_v50, %v9470_v11 }
 0x2cf   :  { %v9483_v26 = vshrl.u32 %v5539_v16, 30  ;;  %v5779_v47 = vshrl.u32 %v10199_v17, %v9470_v11  ;;  %vm5783_vm14 = vcmp.lt.s32.totalorder %v9468_v40, 3  ;;  %vm5784_vm10 = vcmp.lt.s32.totalorder %v9468_v40, 4 }
 0x2d0   :  { %v9489_v30 = vor.u32 %v5767_v29, %v5766_v49  ;;  %v9491_v24 = vor.u32 %v5770_v58, %v5769_v60  ;;  %v9493_v62 = vor.u32 %v5773_v43, %v5772_v27  ;;  %v5777_v21 = vor.u32 %v5776_v1, %v5775_v20 }
 0x2d1   :  { %v5541_v63 = vshll.u32 %v9483_v26, 30  ;;  %v5780_v13 = vor.u32 %v5779_v47, %v5778_v12  ;;  %v9499_v50 = vshll.u32 %v5757_v6, 8  ;;  %vm5782_vm2 = vcmp.lt.s32.totalorder %v9468_v40, 2 }
 0x2d2   :  { %v5789_v52 = vsel %vm5781_vm12, %v9489_v30, %v9491_v24  ;;  %v5790_v61 = vsel %vm5784_vm10, %v5777_v21, 920167782  ;;  %v5793_v51 = vsel %vm5781_vm12, %v9491_v24, %v9493_v62  ;;  %v5534_v16 = vadd.s32 %v9458_v54, %v9456_v25 }
 0x2d3   :  { %v5542_v4 = vsub.s32 %v5538_v37, %v5541_v63  ;;  %v5791_v53 = vsel %vm5783_vm14, %v9493_v62, %v5790_v61  ;;  %v5794_v2 = vsel %vm5784_vm10, %v5780_v13, 1326507024  ;;  %v5798_v14 = vand.u32 65535, %v9499_v50 }
 0x2d4   :  { %v5792_v5 = vsel %vm5782_vm2, %v5789_v52, %v5791_v53  ;;  %v5795_v22 = vsel %vm5783_vm14, %v5777_v21, %v5794_v2  ;;  %v5799_v48 = vshrl.u32 %v9499_v50, 16  ;;  %v5564_v61 = vsub.s32 4, %v9483_v26 }
 0x2d5   :  { %vm5543_vm7 = vcmp.lt.s32.totalorder %v5542_v4, 0  ;;  %v5544_v36 = vsub.s32 0, %v5542_v4  ;;  %v5796_v32 = vsel %vm5782_vm2, %v5793_v51, %v5795_v22  ;;  %v5823_v55 = vshrl.u32 %v5792_v5, 16 }
 0x2d6   :  { %v5800_v23 = vand.u32 65535, %v5796_v32  ;;  %v5801_v38 = vshrl.u32 %v5796_v32, 16  ;;  %v5822_v27 = vand.u32 65535, %v5792_v5  ;;  %v5765_v53 = vshrl.u32 %v10047_v7, %v9470_v11 }
 0x2d7   :  { %v5545_v45 = vsel %vm5543_vm7, %v5544_v36, %v5542_v4  ;;  %v5825_v29 = vmul.u32 %v5823_v55, %v5798_v14  ;;  %v5827_v54 = vmul.u32 %v5823_v55, %v5799_v48  ;;  %v5786_v7 = vsel %vm5784_vm10, %v9493_v62, 2102212464 }
 0x2d8   :  { %v5546_v41 = vclz %v5545_v45  ;;  %v5803_v49 = vmul.u32 %v5801_v38, %v5798_v14  ;;  %v5804_v60 = vmul.u32 %v5800_v23, %v5799_v48  ;;  %v5802_v12 = vmul.u32 %v5800_v23, %v5798_v14 }
 0x2d9   :  { %v5805_v17 = vmul.u32 %v5801_v38, %v5799_v48  ;;  %v5824_v63 = vmul.u32 %v5822_v27, %v5798_v14  ;;  %v5826_v21 = vmul.u32 %v5822_v27, %v5799_v48  ;;  %v5828_v51 = vshll.u32 %v5825_v29, 16 }
 0x2da   :  { %v6295_v37 = vadd.s32 4294967294, %v5546_v41  ;;  %v5806_v6 = vshll.u32 %v5803_v49, 16  ;;  %v5808_v47 = vshll.u32 %v5804_v60, 16  ;;  %v5807_v5 = vshrl.u32 %v5803_v49, 16  ;;  %v9539_v49 = vld [vmem:[%s9865_s1] sm:$0x3] }
 0x2db   :  { %v5830_v14 = vshll.u32 %v5826_v21, 16  ;;  %vm5832_vm1 = vc.u32 %v5824_v63, %v5828_v51  ;;  %v5834_v48 = vadd.s32 %v5828_v51, %v5824_v63  ;;  %vm5442_vm8 = vcmp.lt.s32.totalorder %v9539_v49, 0  ;;  %v6403_v51 = vld [vmem:[#allocation2 + $0x8] sm:$0xff] }
 0x2dc   :  { %vm6296_vm4 = vcmp.lt.s32.totalorder %v6295_v37, 0  ;;  %vm5810_vm11 = vc.u32 %v5802_v12, %v5806_v6  ;;  %v5812_v25 = vadd.s32 %v5806_v6, %v5802_v12  ;;  %v5833_v23 = vsel %vm5832_vm1, 1, %v10039_v44 }
 0x2dd   :  { %v5549_v20 = vsel %vm6296_vm4, 0, %v6295_v37  ;;  %v5835_v38 = vadd.s32 %v5833_v23, %v5827_v54  ;;  %v5809_v37 = vshrl.u32 %v5804_v60, 16  ;;  %vm5836_vm6 = vc.u32 %v5834_v48, %v5830_v14 }
 0x2de   :  { %v5550_v58 = vsub.s32 32, %v5549_v20  ;;  %v5551_v43 = vshll.u32 %v5542_v4, %v5549_v20  ;;  %v5554_v1 = vsub.s32 4294967266, %v5549_v20  ;;  %v5811_v4 = vsel %vm5810_vm11, 1, %v10039_v44 }
 0x2df   :  { %v5813_v22 = vadd.s32 %v5811_v4, %v5805_v17  ;;  %vm5814_vm5 = vc.u32 %v5812_v25, %v5808_v47  ;;  %v5785_v62 = vsel %vm5781_vm12, %v5765_v53, %v9489_v30  ;;  %v5787_v12 = vsel %vm5783_vm14, %v9491_v24, %v5786_v7  ;;  %v6402_v53 = vld [vmem:[#allocation2] sm:$0xff]  ;;  %v6404_v4 = vld [vmem:[#allocation2 + $0x10] sm:$0xff] }
 0x2e0   :  { %v5552_v13 = vshrl.u32 %v5534_v16, %v5550_v58  ;;  %v5555_v52 = vadd.s32 127, %v5554_v1  ;;  %v5815_v41 = vsel %vm5814_vm5, 1, %v10039_v44  ;;  %v5829_v16 = vshrl.u32 %v5825_v29, 16  ;;  %v10200_v1 = vld [vmem:[#allocation30_spill] sm:$0xff] }
 0x2e1   :  { %v5817_v11 = vadd.s32 %v5815_v41, %v5813_v22  ;;  %v5837_v60 = vsel %vm5836_vm6, 1, %v10039_v44  ;;  %v5565_v6 = vsel %vm5442_vm8, %v5564_v61, %v9483_v26  ;;  %v5831_v58 = vshrl.u32 %v5826_v21, 16 }
 0x2e2   :  { %v5553_v2 = vor.u32 %v5552_v13, %v5551_v43  ;;  %v5556_v36 = vshll.u32 %v5555_v52, 23  ;;  %v5839_v43 = vadd.s32 %v5837_v60, %v5835_v38  ;;  %v10201_v29 = vand.u32 2147483647, %v10200_v1  ;;  %v6406_v38 = vld [vmem:[#allocation2 + $0x40] sm:$0xff] }
 0x2e3   :  { %v5818_v27 = vadd.s32 %v5817_v11, %v5807_v5  ;;  %v9556_v63 = vadd.s32 %v5834_v48, %v5830_v14  ;;  %v5788_v30 = vsel %vm5782_vm2, %v5785_v62, %v5787_v12  ;;  %v5171_v40 = vmul.f32 0.23025851, %v6402_v53  ;;  %v6407_v12 = vld [vmem:[#allocation2 + $0x48] sm:$0xff] }
 0x2e4   :  { %v5557_v45 = vor.u32 4788187, %v5556_v36  ;;  %v5560_v32 = vcvt.s32.f32 %v5553_v2  ;;  %vm5441_vm3 = vcmp.le.f32.partialorder %v10201_v29, 0.7853982  ;;  %v5840_v24 = vadd.s32 %v5839_v43, %v5829_v16 }
 0x2e5   :  { %v9554_v47 = vadd.s32 %v5818_v27, %v5809_v37  ;;  %v5567_v13 = vsel %vm5441_vm3, 0, %v5565_v6  ;;  %v5842_v61 = vmul.u32 %v9499_v50, %v5788_v30  ;;  %v5172_v2 = vmul.f32 0.23025851, %v6403_v51  ;;  %v6409_v30 = vld [vmem:[#allocation2 + $0x50] sm:$0xff] }
 0x2e6   :  { %v5558_v55 = vand.u32 2147483647, %v5557_v45  ;;  %v5841_v21 = vadd.s32 %v5840_v24, %v5831_v58  ;;  %v5738_v25 = vadd.s32 3, %v5567_v13  ;;  %v5173_v22 = vmul.f32 0.23025851, %v6404_v4  ;;  %v6405_v45 = vld [vmem:[#allocation2 + $0x18] sm:$0xff] }
 0x2e7   :  { %vm5844_vm15 = vc.u32 %v9554_v47, %v9556_v63  ;;  %v5179_v50 = vmul.f32 1.442695, %v5171_v40  ;;  %v9570_v11 = vand.u32 3, %v5567_v13  ;;  %v5181_v37 = vmul.f32 1.442695, %v5172_v2  ;;  %v6408_v58 = vld [vmem:[#allocation4] sm:$0xff] }
 0x2e8   :  { %v5561_v20 = vmul.f32 %v5560_v32, %v5558_v55  ;;  %v5845_v54 = vadd.s32 1, %v5841_v21  ;;  %v5174_v32 = vmul.f32 0.23025851, %v6405_v45  ;;  %v9572_v48 = vand.u32 3, %v5738_v25  ;;  %v6410_v13 = vld [vmem:[#allocation4 + $0x8] sm:$0xff]  ;;  %v6412_v2 = vld [vmem:[#allocation4 + $0x18] sm:$0xff] }
 0x2e9   :  { %v5175_v55 = vmul.f32 0.23025851, %v6406_v38  ;;  %v5183_v62 = vmul.f32 1.442695, %v5173_v22  ;;  %v5176_v60 = vmul.f32 0.23025851, %v6407_v12  ;;  %6331 = vpow2.f32 %v5179_v50 }
 0x2ea   :  { %v5562_v17 = vxor.u32 2147483648, %v5561_v20  ;;  %v5846_v14 = vsel %vm5844_vm15, %v5845_v54, %v5841_v21  ;;  %v5185_v6 = vmul.f32 1.442695, %v5174_v32  ;;  %v5195_v43 = vmul.f32 0.23025851, %v6408_v58  ;;  %v6411_v54 = vld [vmem:[#allocation4 + $0x10] sm:$0xff] }
 0x2eb   :  { %v5847_v7 = vadd.s32 %v5846_v14, %v5842_v61  ;;  %v5177_v24 = vmul.f32 0.23025851, %v6409_v30  ;;  %6333 = vpow2.f32 %v5181_v37  ;;  %v5196_v21 = vmul.f32 0.23025851, %v6410_v13  ;;  %v6413_v45 = vld [vmem:[#allocation4 + $0x40] sm:$0xff] }
 0x2ec   :  { %v5563_v44 = vsel %vm5442_vm8, %v5562_v17, %v5561_v20  ;;  %vm5586_vm9 = vcmp.eq.s32.totalorder %v9570_v11, 0  ;;  %vm5589_vm13 = vcmp.eq.s32.totalorder %v9570_v11, 2  ;;  %6335 = vpow2.f32 %v5183_v62 }
 0x2ed   :  { %v9563_v26 = vsel %vm5441_vm3, %v9539_v49, %v5563_v44  ;;  %v5848_v20 = vadd.s32 536870912, %v5847_v7  ;;  %v5187_v44 = vmul.f32 1.442695, %v5175_v55  ;;  %6337 = vpow2.f32 %v5185_v6 }
 0x2ee   :  { %v5568_v52 = vmul.f32 %v9563_v26, %v9563_v26  ;;  %v5189_v25 = vmul.f32 1.442695, %v5176_v60  ;;  %v5197_v51 = vmul.f32 0.23025851, %v6411_v54  ;;  %vm5741_vm12 = vcmp.eq.s32.totalorder %v9572_v48, 0 }
 0x2ef   :  { %v9574_v17 = vshrl.u32 %v5848_v20, 30  ;;  %v5191_v22 = vmul.f32 1.442695, %v5177_v24  ;;  %vm5585_vm14 = vcmp.lt.s32.totalorder %v9570_v11, 2  ;;  %6339 = vpow2.f32 %v5187_v44  ;;  %v9585_v50 = vpop.eup %6331  ;;  %v6416_v24 = vld [vmem:[#allocation4 + $0x50] sm:$0xff] }
 0x2f0   :  { %v5569_v36 = vmul.f32 -0.001358992, %v5568_v52  ;;  %v5576_v5 = vmul.f32 -0.00019511016, %v5568_v52  ;;  %v5199_v32 = vmul.f32 0.23025851, %v6413_v45  ;;  %6341 = vpow2.f32 %v5189_v25 }
 0x2f1   :  { %v5850_v40 = vshll.u32 %v9574_v17, 30  ;;  %v5873_v14 = vsub.s32 4, %v9574_v17  ;;  %vm9594_vm2 = vcmp.le.f32.partialorder %v5749_v31, 0.7853982  ;;  %v5203_v20 = vmul.f32 1.442695, %v5195_v43 }
 0x2f2   :  { %v5570_v41 = vadd.f32 0.041655596, %v5569_v36  ;;  %v5577_v23 = vadd.f32 0.008332121, %v5576_v5  ;;  %v5198_v36 = vmul.f32 0.23025851, %v6412_v2  ;;  %6343 = vpow2.f32 %v5191_v22 }
 0x2f3   :  { %v5205_v62 = vmul.f32 1.442695, %v5196_v21  ;;  %v5207_v12 = vmul.f32 1.442695, %v5197_v51  ;;  %6345 = vpow2.f32 %v5203_v20  ;;  %v5211_v31 = vmul.f32 1.442695, %v5199_v32 }
 0x2f4   :  { %v5571_v27 = vmul.f32 %v5570_v41, %v5568_v52  ;;  %v5578_v16 = vmul.f32 %v5577_v23, %v5568_v52  ;;  %v6414_v41 = vld [vmem:[#allocation4 + $0x48] sm:$0xff]  ;;  %v5209_v30 = vmul.f32 1.442695, %v5198_v36  ;;  %vm5744_vm7 = vcmp.eq.s32.totalorder %v9572_v48, 2  ;;  %v6417_v25 = vld [vmem:[#allocation4 + $0x58] sm:$0xff] }
 0x2f5   :  { %v5200_v23 = vmul.f32 0.23025851, %v6414_v41  ;;  %v5201_v44 = vmul.f32 0.23025851, %v6416_v24  ;;  %6347 = vpow2.f32 %v5205_v62  ;;  %vm5740_vm4 = vcmp.lt.s32.totalorder %v9572_v48, 2 }
 0x2f6   :  { %v5572_v1 = vadd.f32 -0.4999988, %v5571_v27  ;;  %v5579_v29 = vadd.f32 -0.16666654, %v5578_v16  ;;  %v9590_v27 = vpop.eup %6333  ;;  %v5843_v21 = vadd.s32 %v9556_v63, %v9554_v47  ;;  %6349 = vpow2.f32 %v5207_v12 }
 0x2f7   :  { %v9598_v60 = vpop.eup %6335  ;;  %v5213_v43 = vmul.f32 1.442695, %v5200_v23  ;;  %v5202_v54 = vmul.f32 0.23025851, %v6417_v25  ;;  %6351 = vpow2.f32 %v5209_v30  ;;  %vm5583_vm5 = vweird.f32 %v9539_v49 }
 0x2f8   :  { %v5573_v61 = vmul.f32 %v5572_v1, %v5568_v52  ;;  %v5580_v53 = vmul.f32 %v5579_v29, %v5568_v52  ;;  %v9581_v52 = vsub.s32 %v5847_v7, %v5850_v40  ;;  %v6415_v7 = vld [vmem:[#allocation2 + $0x58] sm:$0xff]  ;;  %v9601_v1 = vpop.eup %6337  ;;  %6353 = vpow2.f32 %v5211_v31 }
 0x2f9   :  { %v5178_v37 = vmul.f32 0.23025851, %v6415_v7  ;;  %v9604_v13 = vpop.eup %6339  ;;  %6355 = vpow2.f32 %v5213_v43  ;;  %v5219_v30 = vmul.f32 %v9585_v50, %v10168_v18  ;;  %v5220_v31 = vmul.f32 %v9590_v27, %v10170_v0 }
 0x2fa   :  { %v5574_v5 = vadd.f32 1.0, %v5573_v61  ;;  %v5581_v4 = vadd.f32 1.0, %v5580_v53  ;;  %vm5852_vm10 = vcmp.lt.s32.totalorder %v9581_v52, 0  ;;  %v5853_v55 = vsub.s32 0, %v9581_v52  ;;  %v9612_v51 = vpop.eup %6341 }
 0x2fb   :  { %v5874_v53 = vsel %vm5751_vm0, %v5873_v14, %v9574_v17  ;;  %v5193_v40 = vmul.f32 1.442695, %v5178_v37  ;;  %v9618_v47 = vpop.eup %6343  ;;  %v5221_v48 = vmul.f32 %v9598_v60, %v10173_v9  ;;  %v5222_v24 = vmul.f32 %v9601_v1, %v10175_v28 }
 0x2fc   :  { %v5582_v38 = vmul.f32 %v5581_v4, %v9563_v26  ;;  %v5590_v6 = vxor.u32 2147483648, %v5574_v5  ;;  %v5854_v58 = vsel %vm5852_vm10, %v5853_v55, %v9581_v52  ;;  %v5215_v4 = vmul.f32 1.442695, %v5201_v44  ;;  %v6346_v22 = vpop.eup %6345 }
 0x2fd   :  { %v5855_v29 = vclz %v5854_v58  ;;  %v6348_v23 = vpop.eup %6347  ;;  %6357 = vpow2.f32 %v5193_v40  ;;  %v5224_v28 = vmul.f32 %v9612_v51, %v10177_v3  ;;  %vm5892_vm1 = vweird.f32 %v9440_v33 }
 0x2fe   :  { %v5587_v26 = vxor.u32 2147483648, %v5582_v38  ;;  %v5591_v36 = vsel %vm5589_vm13, %v5590_v6, %v5582_v38  ;;  %v5746_v63 = vsel %vm5744_vm7, %v5590_v6, %v5582_v38  ;;  %v5876_v38 = vsel %vm9594_vm2, 0, %v5874_v53  ;;  %v6350_v7 = vpop.eup %6349 }
 0x2ff   :  { %v6301_v61 = vadd.s32 4294967294, %v5855_v29  ;;  %6359 = vpow2.f32 %v5215_v4  ;;  %v6352_v62 = vpop.eup %6351  ;;  %v6047_v58 = vadd.s32 3, %v5876_v38  ;;  %v5228_v18 = vmul.f32 %v6348_v23, %v10171_v42 }
 0x300   :  { %v5588_v2 = vsel %vm5586_vm9, %v5574_v5, %v5587_v26  ;;  %v5743_v14 = vsel %vm5741_vm12, %v5574_v5, %v5587_v26  ;;  %v6354_v12 = vpop.eup %6353  ;;  %v5229_v40 = vmul.f32 %v6350_v7, %v10174_v57  ;;  %v5230_v0 = vmul.f32 %v6352_v62, %v9151_v35  ;;  %v10204_v57 = vld [vmem:[#allocation8_spill] sm:$0xff] }
 0x301   :  { %vm6302_vm11 = vcmp.lt.s32.totalorder %v6301_v61, 0  ;;  %v5592_v55 = vsel %vm5585_vm14, %v5588_v2, %v5591_v36  ;;  %v5747_v5 = vsel %vm5740_vm4, %v5743_v14, %v5746_v63  ;;  %v6356_v29 = vpop.eup %6355  ;;  %v9660_v42 = vand.u32 3, %v6047_v58 }
 0x302   :  { %v5858_v17 = vsel %vm6302_vm11, 0, %v6301_v61  ;;  %v9634_v26 = vsel %vm5583_vm5, nan, %v5592_v55  ;;  %v5227_v61 = vmul.f32 %v6346_v22, %v10169_v59  ;;  %v5232_v2 = vmul.f32 %v6356_v29, %v9166_v46 }
 0x303   :  { %v5859_v45 = vsub.s32 32, %v5858_v17  ;;  %v5860_v32 = vshll.u32 %v9581_v52, %v5858_v17  ;;  %v5863_v41 = vsub.s32 4294967266, %v5858_v17  ;;  %v5217_v52 = vmul.f32 1.442695, %v5202_v54  ;;  %v6358_v53 = vpop.eup %6357  ;;  %v10205_v17 = vld [vmem:[#allocation33_spill] sm:$0xff] }
 0x304   :  { %v5231_v54 = vmul.f32 %v6354_v12, %v9156_v56  ;;  %v9656_v59 = vsel %vm5583_vm5, nan, %v5747_v5  ;;  %v5225_v35 = vmul.f32 %v9618_v47, %v10204_v57  ;;  %v5226_v63 = vmul.f32 %v6358_v53, %v10194_v10  ;;  %v10208_v5 = vld [vmem:[#allocation18_spill] sm:$0xff]  ;;  %v10209_v10 = vld [vmem:[#allocation9_spill] sm:$0xff] }
 0x305   :  { %v5861_v37 = vshrl.u32 %v5843_v21, %v5859_v45  ;;  %v5864_v20 = vadd.s32 127, %v5863_v41  ;;  %v5223_v21 = vmul.f32 %v9604_v13, %v10176_v19  ;;  %6361 = vpow2.f32 %v5217_v52  ;;  %v6360_v25 = vpop.eup %6359  ;;  %v10206_v45 = vld [vmem:[#allocation16_spill] sm:$0xff] }
 0x306   :  { %v9658_v19 = vand.u32 3, %v5876_v38  ;;  %v5233_v3 = vmul.f32 %v6360_v25, %v10205_v17  ;;  %v5235_v4 = vsub.f32 %v5219_v30, %v5227_v61  ;;  %v5236_v56 = vsub.f32 %v5220_v31, %v5228_v18  ;;  %v10207_v38 = vld [vmem:[#allocation13_spill] sm:$0xff]  ;;  %v10211_v30 = vld [vmem:[#allocation26_spill] sm:$0xff]  ;;  %v10215_v61 = vld [vmem:[#allocation12_spill] sm:$0xff] }
 0x307   :  { %v5862_v11 = vor.u32 %v5861_v37, %v5860_v32  ;;  %v5865_v6 = vshll.u32 %v5864_v20, 23  ;;  %v5237_v14 = vsub.f32 %v5221_v48, %v5229_v40  ;;  %v5238_v46 = vsub.f32 %v5222_v24, %v5230_v0  ;;  %v10212_v24 = vld [vmem:[#allocation10_spill] sm:$0xff] }
 0x308   :  { %v5243_v49 = vmul.f32 %v9585_v50, %v10206_v45  ;;  %v5239_v41 = vsub.f32 %v5223_v21, %v5231_v54  ;;  %v5240_v55 = vsub.f32 %v5224_v28, %v5232_v2  ;;  %v5244_v37 = vmul.f32 %v9590_v27, %v10207_v38  ;;  %v10218_v28 = vld [vmem:[#allocation14_spill] sm:$0xff] }
 0x309   :  { %v5866_v44 = vor.u32 4788187, %v5865_v6  ;;  %v5869_v43 = vcvt.s32.f32 %v5862_v11  ;;  %v5245_v52 = vmul.f32 %v9598_v60, %v10208_v5  ;;  %v5251_v11 = vmul.f32 %v6346_v22, %v10209_v10  ;;  %v10210_v6 = vld [vmem:[#allocation34_spill] sm:$0xff]  ;;  %v10214_v60 = vld [vmem:[#allocation15_spill] sm:$0xff] }
 0x30a   :  { %v5252_v58 = vmul.f32 %v6348_v23, %v10210_v6  ;;  %v5253_v31 = vmul.f32 %v6350_v7, %v10211_v30  ;;  %v5241_v50 = vsub.f32 %v5225_v35, %v5233_v3  ;;  %v5247_v22 = vmul.f32 %v9604_v13, %v10214_v60  ;;  %v10216_v7 = vld [vmem:[#allocation28_spill] sm:$0xff] }
 0x30b   :  { %v5867_v9 = vand.u32 2147483647, %v5866_v44  ;;  %v6362_v20 = vpop.eup %6361  ;;  %v5246_v44 = vmul.f32 %v9601_v1, %v10212_v24  ;;  %v5248_v23 = vmul.f32 %v9612_v51, %v10215_v61  ;;  %v5255_v18 = vmul.f32 %v6354_v12, %v10216_v7 }
 0x30c   :  { %v5249_v0 = vmul.f32 %v9618_v47, %v10185_v15  ;;  %v5234_v54 = vmul.f32 %v6362_v20, %v9426_v34  ;;  %v5259_v16 = vsub.f32 %v5243_v49, %v5251_v11  ;;  %v5260_v2 = vsub.f32 %v5244_v37, %v5252_v58 }
 0x30d   :  { %v5870_v36 = vmul.f32 %v5869_v43, %v5867_v9  ;;  %v10213_v43 = vld [vmem:[#allocation29_spill] sm:$0xff]  ;;  %v10217_v9 = vld [vmem:[#allocation27_spill] sm:$0xff]  ;;  %v5261_v57 = vsub.f32 %v5245_v52, %v5253_v31  ;;  %v5258_v12 = vmul.f32 %v6362_v20, %v9430_v8  ;;  %v5263_v17 = vsub.f32 %v5247_v22, %v5255_v18 }
 0x30e   :  { %v5254_v21 = vmul.f32 %v6352_v62, %v10213_v43  ;;  %v5256_v1 = vmul.f32 %v6356_v29, %v10217_v9  ;;  %v5257_v62 = vmul.f32 %v6360_v25, %v10218_v28  ;;  %v5267_v3 = vmul.f32 %v5235_v4, %v5235_v4 }
 0x30f   :  { %v5871_v32 = vxor.u32 2147483648, %v5870_v36  ;;  %v5268_v45 = vmul.f32 %v5236_v56, %v5236_v56  ;;  %v5269_v25 = vmul.f32 %v5237_v14, %v5237_v14  ;;  %v5275_v38 = vmul.f32 %v5259_v16, %v5259_v16 }
 0x310   :  { %v5262_v51 = vsub.f32 %v5246_v44, %v5254_v21  ;;  %v5264_v29 = vsub.f32 %v5248_v23, %v5256_v1  ;;  %v5276_v34 = vmul.f32 %v5260_v2, %v5260_v2  ;;  %v5277_v49 = vmul.f32 %v5261_v57, %v5261_v57 }
 0x311   :  { %v5872_v48 = vsel %vm5751_vm0, %v5871_v32, %v5870_v36  ;;  %v5250_v36 = vmul.f32 %v6358_v53, %v10195_v39  ;;  %v5265_v32 = vsub.f32 %v5249_v0, %v5257_v62  ;;  %v5270_v52 = vmul.f32 %v5238_v46, %v5238_v46 }
 0x312   :  { %v5875_v27 = vsel %vm9594_vm2, %v9440_v33, %v5872_v48  ;;  %v5278_v10 = vmul.f32 %v5262_v51, %v5262_v51  ;;  %v5271_v11 = vmul.f32 %v5239_v41, %v5239_v41  ;;  %v5279_v39 = vmul.f32 %v5263_v17, %v5263_v17 }
 0x313   :  { %v5877_v40 = vmul.f32 %v5875_v27, %v5875_v27  ;;  %v9695_v53 = vadd.f32 %v5275_v38, %v5267_v3  ;;  %v9697_v8 = vadd.f32 %v5276_v34, %v5268_v45  ;;  %v5242_v20 = vsub.f32 %v5226_v63, %v5234_v54 }
 0x314   :  { %v5266_v6 = vsub.f32 %v5250_v36, %v5258_v12  ;;  %vm5894_vm8 = vcmp.lt.s32.totalorder %v9658_v19, 2  ;;  %v5272_v14 = vmul.f32 %v5240_v55, %v5240_v55  ;;  %v5280_v58 = vmul.f32 %v5264_v29, %v5264_v29 }
 0x315   :  { %v5878_v35 = vmul.f32 -0.001358992, %v5877_v40  ;;  %v5885_v13 = vmul.f32 -0.00019511016, %v5877_v40  ;;  %v9701_v30 = vadd.f32 %v5277_v49, %v5269_v25  ;;  %v9703_v41 = vadd.f32 %v5278_v10, %v5270_v52 }
 0x316   :  { %6363 = vrsqrt.f32 %v9695_v53  ;;  %v5273_v48 = vmul.f32 %v5241_v50, %v5241_v50  ;;  %v5281_v24 = vmul.f32 %v5265_v32, %v5265_v32  ;;  %v9706_v44 = vadd.f32 %v5279_v39, %v5271_v11 }
 0x317   :  { %v5879_v15 = vadd.f32 0.041655596, %v5878_v35  ;;  %v5886_v47 = vadd.f32 0.008332121, %v5885_v13  ;;  %6365 = vrsqrt.f32 %v9697_v8  ;;  %v5274_v21 = vmul.f32 %v5242_v20, %v5242_v20 }
 0x318   :  { %v5282_v60 = vmul.f32 %v5266_v6, %v5266_v6  ;;  %vm5898_vm6 = vcmp.eq.s32.totalorder %v9658_v19, 2  ;;  %vm6053_vm3 = vcmp.eq.s32.totalorder %v9660_v42, 2  ;;  %v9711_v55 = vadd.f32 %v5280_v58, %v5272_v14 }
 0x319   :  { %v5880_v37 = vmul.f32 %v5879_v15, %v5877_v40  ;;  %v5887_v5 = vmul.f32 %v5886_v47, %v5877_v40  ;;  %6367 = vrsqrt.f32 %v9701_v30  ;;  %vm5895_vm15 = vcmp.eq.s32.totalorder %v9658_v19, 0 }
 0x31a   :  { %6369 = vrsqrt.f32 %v9703_v41  ;;  %vm6049_vm9 = vcmp.lt.s32.totalorder %v9660_v42, 2  ;;  %vm6050_vm13 = vcmp.eq.s32.totalorder %v9660_v42, 0  ;;  %v9718_v61 = vadd.f32 %v5281_v24, %v5273_v48 }
 0x31b   :  { %v5881_v4 = vadd.f32 -0.4999988, %v5880_v37  ;;  %v5888_v56 = vadd.f32 -0.16666654, %v5887_v5  ;;  %6371 = vrsqrt.f32 %v9706_v44  ;;  %vm5429_vm0 = vcmask 58368  }
 0x31c   :  { %v6364_v23 = vpop.eup %6363  ;;  %v9721_v0 = vadd.f32 %v5282_v60, %v5274_v21  ;;  %v5301_v1 = vand.u32 2147483648, %v9695_v53  ;;  %v5313_v28 = vand.u32 2147483648, %v9697_v8  ;;  %6373 = vrsqrt.f32 %v9711_v55 }
 0x31d   :  { %v5882_v46 = vmul.f32 %v5881_v4, %v5877_v40  ;;  %v5889_v31 = vmul.f32 %v5888_v56, %v5877_v40  ;;  %v5292_v9 = vmul.f32 %v6364_v23, %v9695_v53  ;;  %vm5298_vm12 = vcmp.eq.f32.partialorder %v9695_v53, inf }
 0x31e   :  { %v5325_v2 = vand.u32 2147483648, %v9701_v30  ;;  %vm5310_vm14 = vcmp.eq.f32.partialorder %v9697_v8, inf  ;;  %v5337_v51 = vand.u32 2147483648, %v9703_v41  ;;  %vm5300_vm10 = vcmp.eq.f32.partialorder %v9695_v53, 0.0 }
 0x31f   :  { %v5883_v63 = vadd.f32 1.0, %v5882_v46  ;;  %v5890_v43 = vadd.f32 1.0, %v5889_v31  ;;  %v5293_v36 = vmul.f32 %v6364_v23, %v5292_v9  ;;  %vm5312_vm2 = vcmp.eq.f32.partialorder %v9697_v8, 0.0 }
 0x320   :  { %vm5322_vm7 = vcmp.eq.f32.partialorder %v9701_v30, inf  ;;  %vm5324_vm4 = vcmp.eq.f32.partialorder %v9701_v30, 0.0  ;;  %vm5334_vm11 = vcmp.eq.f32.partialorder %v9703_v41, inf  ;;  %6375 = vrsqrt.f32 %v9718_v61 }
 0x321   :  { %v5891_v22 = vmul.f32 %v5890_v43, %v5875_v27  ;;  %v5899_v50 = vxor.u32 2147483648, %v5883_v63  ;;  %v6366_v27 = vpop.eup %6365  ;;  %v5294_v29 = vmul.f32 0.5, %v5293_v36  ;;  %vm5336_vm5 = vcmp.eq.f32.partialorder %v9703_v41, 0.0 }
 0x322   :  { %v5304_v16 = vmul.f32 %v6366_v27, %v9697_v8  ;;  %v6368_v57 = vpop.eup %6367  ;;  %6377 = vrsqrt.f32 %v9721_v0 }
 0x323   :  { %v5896_v7 = vxor.u32 2147483648, %v5891_v22  ;;  %v5900_v18 = vsel %vm5898_vm6, %v5899_v50, %v5891_v22  ;;  %v6055_v40 = vsel %vm6053_vm3, %v5899_v50, %v5891_v22  ;;  %v6370_v12 = vpop.eup %6369  ;;  %v5316_v42 = vmul.f32 %v6368_v57, %v9701_v30 }
 0x324   :  { %v5305_v19 = vmul.f32 %v6366_v27, %v5304_v16  ;;  %v6372_v45 = vpop.eup %6371  ;;  %v5328_v33 = vmul.f32 %v6370_v12, %v9703_v41  ;;  %v5295_v37 = vsub.f32 1.5, %v5294_v29  ;;  %vm5358_vm6 = vcmp.eq.f32.partialorder %v9711_v55, inf }
 0x325   :  { %v5897_v62 = vsel %vm5895_vm15, %v5883_v63, %v5896_v7  ;;  %v6052_v54 = vsel %vm6050_vm13, %v5883_v63, %v5896_v7  ;;  %v5317_v25 = vmul.f32 %v6368_v57, %v5316_v42  ;;  %v5340_v38 = vmul.f32 %v6372_v45, %v9706_v44  ;;  %v6374_v34 = vpop.eup %6373 }
 0x326   :  { %v5901_v35 = vsel %vm5894_vm8, %v5897_v62, %v5900_v18  ;;  %v6056_v13 = vsel %vm6049_vm9, %v6052_v54, %v6055_v40  ;;  %v5306_v32 = vmul.f32 0.5, %v5305_v19  ;;  %v5329_v5 = vmul.f32 %v6370_v12, %v5328_v33  ;;  %v6376_v43 = vpop.eup %6375 }
 0x327   :  { %v9740_v17 = vsel %vm5892_vm1, nan, %v5901_v35  ;;  %v9744_v3 = vsel %vm5892_vm1, nan, %v6056_v13  ;;  %vm5346_vm1 = vcmp.eq.f32.partialorder %v9706_v44, inf  ;;  %v5318_v10 = vmul.f32 0.5, %v5317_v25 }
 0x328   :  { %v6058_v15 = vmul.f32 %v9740_v17, %v9634_v26  ;;  %v6059_v47 = vmul.f32 %v9744_v3, %v9656_v59  ;;  %v5307_v52 = vsub.f32 1.5, %v5306_v32  ;;  %v5341_v11 = vmul.f32 %v6372_v45, %v5340_v38 }
 0x329   :  { %v5352_v39 = vmul.f32 %v6374_v34, %v9711_v55  ;;  %v5296_v56 = vmul.f32 %v6364_v23, %v5295_v37  ;;  %v5330_v20 = vmul.f32 0.5, %v5329_v5  ;;  %vm5348_vm8 = vcmp.eq.f32.partialorder %v9706_v44, 0.0  ;;  %v6106_v37 = vld [vmem:[%s9868_s4] sm:$0xf] }
 0x32a   :  { %v6060_v49 = vadd.f32 %v6059_v47, %v6058_v15  ;;  %v5308_v6 = vmul.f32 %v6366_v27, %v5307_v52  ;;  %v5319_v14 = vsub.f32 1.5, %v5318_v10  ;;  %v5342_v58 = vmul.f32 0.5, %v5341_v11 }
 0x32b   :  { %v5353_v46 = vmul.f32 %v6374_v34, %v5352_v39  ;;  %v5297_v48 = vmul.f32 %v5296_v56, %v9695_v53  ;;  %v5331_v24 = vsub.f32 1.5, %v5330_v20  ;;  %v5349_v63 = vand.u32 2147483648, %v9706_v44 }
 0x32c   :  { %v6061_v4 = vsub.f32 1.0, %v6060_v49  ;;  %v5309_v21 = vmul.f32 %v5308_v6, %v9697_v8  ;;  %v5320_v60 = vmul.f32 %v6368_v57, %v5319_v14  ;;  %v5343_v22 = vsub.f32 1.5, %v5342_v58 }
 0x32d   :  { %v5354_v50 = vmul.f32 0.5, %v5353_v46  ;;  %v5299_v23 = vsel %vm5298_vm12, %v9695_v53, %v5297_v48  ;;  %v5332_v7 = vmul.f32 %v6370_v12, %v5331_v24  ;;  %v5364_v18 = vmul.f32 %v6376_v43, %v9718_v61 }
 0x32e   :  { %v6062_v31 = vsel %vm5429_vm0, %v6061_v4, 0.0  ;;  %v5311_v40 = vsel %vm5310_vm14, %v9697_v8, %v5309_v21  ;;  %v5321_v27 = vmul.f32 %v5320_v60, %v9701_v30  ;;  %v5344_v9 = vmul.f32 %v6372_v45, %v5343_v22  ;;  %v6378_v45 = vpop.eup %6377  ;;  %v5415_v4 = vld [vmem:[%s9864_s0] sm:$0x3] }
 0x32f   :  { %6063 = vadd.xlane.f32.xlu2 %v6062_v31  ;;  %v5302_v62 = vsel %vm5300_vm10, %v5301_v1, %v5299_v23  ;;  %v5333_v54 = vmul.f32 %v5332_v7, %v9703_v41  ;;  %v5355_v16 = vsub.f32 1.5, %v5354_v50  ;;  %v5365_v57 = vmul.f32 %v6376_v43, %v5364_v18 }
 0x330   :  { %v5314_v35 = vsel %vm5312_vm2, %v5313_v28, %v5311_v40  ;;  %v5323_v13 = vsel %vm5322_vm7, %v9701_v30, %v5321_v27  ;;  %v5345_v36 = vmul.f32 %v5344_v9, %v9706_v44  ;;  %vm5360_vm3 = vcmp.eq.f32.partialorder %v9711_v55, 0.0 }
 0x331   :  { %v5326_v53 = vsel %vm5324_vm4, %v5325_v2, %v5323_v13  ;;  %v5335_v1 = vsel %vm5334_vm11, %v9703_v41, %v5333_v54  ;;  %v5356_v12 = vmul.f32 %v6374_v34, %v5355_v16  ;;  %v5366_v8 = vmul.f32 0.5, %v5365_v57  ;;  %v9810_v2 = vld [vmem:[%s9866_s2] sm:$0x3] }
 0x332   :  { %v5338_v28 = vsel %vm5336_vm5, %v5337_v51, %v5335_v1  ;;  %v5347_v19 = vsel %vm5346_vm1, %v9706_v44, %v5345_v36  ;;  %v5361_v42 = vand.u32 2147483648, %v9711_v55  ;;  %vm10219_vm15 = vcmask 130048  }
 0x333   :  { %v5387_v30 = vsel %vm10219_vm15, %v5302_v62, 0.0  ;;  %v5357_v15 = vmul.f32 %v5356_v12, %v9711_v55  ;;  %v5367_v47 = vsub.f32 1.5, %v5366_v8  ;;  %vm5370_vm9 = vcmp.eq.f32.partialorder %v9718_v61, inf  ;;  %vm10220_vm13 = vmmov %vm10219_vm15 }
 0x334   :  { %v5388_v41 = vsel %vm10220_vm13, %v5314_v35, 0.0  ;;  %v5350_v51 = vsel %vm5348_vm8, %v5349_v63, %v5347_v19  ;;  %v5376_v29 = vmul.f32 %v6378_v45, %v9721_v0  ;;  %vm10221_vm12 = vmmov %vm10220_vm13  ;;  %v6072_v49 = vmul.f32 0.115129255, %v9810_v2 }
 0x335   :  { %v5389_v33 = vadd.f32 %v5388_v41, %v5387_v30  ;;  %v5390_v32 = vsel %vm10221_vm12, %v5326_v53, 0.0  ;;  %v5359_v25 = vsel %vm5358_vm6, %v9711_v55, %v5357_v15  ;;  %v5368_v38 = vmul.f32 %v6376_v43, %v5367_v47  ;;  %vm10222_vm14 = vmmov %vm10221_vm12 }
 0x336   :  { %v5392_v34 = vsel %vm10222_vm14, %v5338_v28, 0.0  ;;  %v5362_v44 = vsel %vm5360_vm3, %v5361_v42, %v5359_v25  ;;  %v5373_v5 = vand.u32 2147483648, %v9718_v61  ;;  %v5377_v52 = vmul.f32 %v6378_v45, %v5376_v29  ;;  %vm10223_vm2 = vmmov %vm10221_vm12 }
 0x337   :  { %v5391_v10 = vadd.f32 %v5390_v32, %v5389_v33  ;;  %v5369_v11 = vmul.f32 %v5368_v38, %v9718_v61  ;;  %vm5372_vm10 = vcmp.eq.f32.partialorder %v9718_v61, 0.0  ;;  %v5394_v39 = vsel %vm10223_vm2, %v5350_v51, 0.0  ;;  %vm10224_vm7 = vmmov %vm10223_vm2 }
 0x338   :  { %v6073_v56 = vmul.f32 1.442695, %v6072_v49  ;;  %v5378_v20 = vmul.f32 0.5, %v5377_v52  ;;  %v6107_v14 = vand.u32 2147483647, %v6106_v37  ;;  %6379 = vlog2.f32 %v5415_v4  ;;  %vm10225_vm4 = vmmov %vm10223_vm2  ;;  %v163_v49 = vpop.xlane.xlu0 %162 }
 0x339   :  { %v5393_v6 = vadd.f32 %v5392_v34, %v5391_v10  ;;  %v5371_v55 = vsel %vm5370_vm9, %v9718_v61, %v5369_v11  ;;  %v5396_v58 = vsel %vm10224_vm7, %v5362_v44, 0.0  ;;  %vm5382_vm11 = vcmp.eq.f32.partialorder %v9721_v0, inf  ;;  %vm10226_vm8 = vmmov %vm10223_vm2 }
 0x33a   :  { %6381 = vpow2.f32 %v6073_v56  ;;  %v5374_v46 = vsel %vm5372_vm10, %v5373_v5, %v5371_v55  ;;  %v5379_v31 = vsub.f32 1.5, %v5378_v20  ;;  %6109 = vst [vmem:[#allocation1] ss:$4 sm:$0xff] %v6107_v14  ;;  %v5385_v21 = vand.u32 2147483648, %v9721_v0 }
 0x33b   :  { %v5395_v48 = vadd.f32 %v5394_v39, %v5393_v6  ;;  %v5398_v43 = vsel %vm10225_vm4, %v5374_v46, 0.0  ;;  %vm5384_vm5 = vcmp.eq.f32.partialorder %v9721_v0, 0.0  ;;  %v6075_v61 = vmul.f32 %v9634_v26, %v5415_v4 }
 0x33c   :  { %v5380_v24 = vmul.f32 %v6378_v45, %v5379_v31  ;;  %v6078_v50 = vmul.f32 %v9656_v59, %v5415_v4  ;;  %vm6114_vm1 = vcmask 1041408   ;;  %v164_v44 = vrot.slane %v163_v49, 4 }
 0x33d   :  { %v5397_v63 = vadd.f32 %v5396_v58, %v5395_v48 }
 0x33e   :  { %v6380_v60 = vpop.eup %6379  ;;  %v5381_v22 = vmul.f32 %v5380_v24, %v9721_v0  ;;  %v165_v52 = vadd.f32 %v164_v44, %v163_v49 }
 0x33f   :  { %v5399_v7 = vadd.f32 %v5398_v43, %v5397_v63  ;;  %v5420_v18 = vmul.f32 0.6931472, %v6380_v60 }
 0x340   :  { %v6382_v23 = vpop.eup %6381  ;;  %v5383_v40 = vsel %vm5382_vm11, %v9721_v0, %v5381_v22  ;;  %v5163_v37 = vpop.xlane.xlu0 %5162  ;;  %v166_v11 = vrot.slane %v165_v52, 2 }
 0x341   :  { %v6076_v27 = vmul.f32 %v6382_v23, %v9740_v17  ;;  %v6079_v9 = vmul.f32 %v6382_v23, %v9744_v3  ;;  %v5386_v62 = vsel %vm5384_vm5, %v5385_v21, %v5383_v40  ;;  %v6110_v54 = vld.sshfl [vmem:[#allocation1] sm:$0xff pattern:$0x73625140]  ;;  %v6111_v16 = vld.sshfl [vmem:[#allocation1 + $0x8] sm:$0xff pattern:$0x73625140] }
 0x342   :  { %v5400_v57 = vsel %vm10226_vm8, %v5386_v62, 0.0  ;;  %v6115_v26 = vsel %vm6114_vm1, %v6110_v54, 0.0  ;;  %v6116_v59 = vsel %vm6114_vm1, %v6111_v16, 0.0  ;;  %v5421_v53 = vmul.f32 8.685889, %v5420_v18 }
 0x343   :  { %v6077_v35 = vsub.f32 %v6075_v61, %v6076_v27  ;;  %v6080_v13 = vsub.f32 %v6078_v50, %v6079_v9  ;;  %v5401_v36 = vadd.f32 %v5400_v57, %v5399_v7  ;;  %v6117_v8 = vadd.f32 %v6116_v59, %v6115_v26 }
 0x344   :  { %v5422_v0 = vsub.f32 %v5421_v53, %v9810_v2  ;;  %v5164_v5 = vrot.slane %v5163_v37, 4  ;;  %v167_v4 = vadd.f32 %v166_v11, %v165_v52 }
 0x345   :  { %v6081_v1 = vmul.f32 %v6077_v35, %v6077_v35  ;;  %v6082_v12 = vmul.f32 %v6080_v13, %v6080_v13  ;;  %5402 = vadd.xlane.f32.xlu1 %v5401_v36  ;;  %6118 = vadd.xlane.f32.xlu0 %v6117_v8 }
 0x346   :  { %v5423_v3 = vand.u32 2147483647, %v5422_v0  ;;  %v5425_v28 = vmul.f32 0.5, %v5422_v0  ;;  %v5165_v10 = vadd.f32 %v5164_v5, %v5163_v37  ;;  %v168_v20 = vrot.slane %v167_v4, 1 }
 0x347   :  { %v6083_v17 = vadd.f32 %v6082_v12, %v6081_v1 }
 0x348   :  { %vm5424_vm6 = vcmp.lt.f32.partialorder %v5423_v3, 1.0  ;;  %v5426_v19 = vmul.f32 %v5425_v28, %v5422_v0  ;;  %v6293_v42 = vadd.f32 -0.5, %v5423_v3  ;;  %v5166_v39 = vrot.slane %v5165_v10, 2 }
 0x349   :  { %6383 = vrsqrt.f32 %v6083_v17  ;;  %vm6091_vm3 = vcmp.eq.f32.partialorder %v6083_v17, inf  ;;  %v6094_v2 = vand.u32 2147483648, %v6083_v17  ;;  %vm6093_vm15 = vcmp.eq.f32.partialorder %v6083_v17, 0.0 }
 0x34a   :  { %v5428_v30 = vsel %vm5424_vm6, %v5426_v19, %v6293_v42  ;;  %v5167_v56 = vadd.f32 %v5166_v39, %v5165_v10  ;;  %v169_v14 = vadd.f32 %v168_v20, %v167_v4  ;;  %v6127_v19 = vlaneseq }
 0x34b   :  { %v5430_v45 = vsel %vm5429_vm0, %v5428_v30, 0.0 }
 0x34c   :  { %v5168_v6 = vrot.slane %v5167_v56, 1  ;;  %6306 = vpush %v169_v14  ;;  %v6128_v42 = vshrl.u32 %v6127_v19, 7  ;;  %v6130_v30 = vand.u32 127, %v6127_v19 }
 0x34d   :  { %5431 = vadd.xlane.f32.xlu1 %v5430_v45 }
 0x34e   :  { %v5169_v55 = vadd.f32 %v5168_v6, %v5167_v56  ;;  %vm6132_vm9 = vcmp.eq.s32.totalorder %v6130_v30, 0  ;;  %vm6136_vm12 = vcmp.eq.s32.totalorder %v6130_v30, 1  ;;  %vm6140_vm14 = vcmp.eq.s32.totalorder %v6130_v30, 2 }
 0x34f   :  { %v6384_v15 = vpop.eup %6383  ;;  %vm6144_vm10 = vcmp.eq.s32.totalorder %v6130_v30, 3  ;;  %vm6148_vm11 = vcmp.eq.s32.totalorder %v6130_v30, 4  ;;  %vm6152_vm1 = vcmp.eq.s32.totalorder %v6130_v30, 5  ;;  %vm6156_vm8 = vcmp.eq.s32.totalorder %v6130_v30, 6 }
 0x350   :  { %v6085_v47 = vmul.f32 %v6384_v15, %v6083_v17  ;;  %6308 = vpush %v5169_v55 }
 0x352   :  { %v6086_v41 = vmul.f32 %v6384_v15, %v6085_v47 }
 0x354   :  { %v6087_v51 = vmul.f32 0.5, %v6086_v41 }
 0x356   :  { %v6088_v29 = vsub.f32 1.5, %v6087_v51 }
 0x358   :  { %v6089_v33 = vmul.f32 %v6384_v15, %v6088_v29 }
 0x35a   :  { %v6090_v32 = vmul.f32 %v6089_v33, %v6083_v17 }
 0x35c   :  { %v6092_v25 = vsel %vm6091_vm3, %v6083_v17, %v6090_v32 }
 0x35d   :  { %v6095_v38 = vsel %vm6093_vm15, %v6094_v2, %v6092_v25 }
 0x35e   :  { %v6096_v34 = vsel %vm5429_vm0, %v6095_v38, 0.0  ;;  %vm6131_vm0 = vcmp.eq.s32.totalorder %v6128_v42, 0 }
 0x35f   :  { %6097 = vadd.xlane.f32.xlu2 %v6096_v34  ;;  %vm6133_vm13 = vmand %vm6131_vm0, %vm6132_vm9 }
 0x360   :  { %vm6137_vm2 = vmand %vm6131_vm0, %vm6136_vm12 }
 0x361   :  { %vm6141_vm7 = vmand %vm6131_vm0, %vm6140_vm14 }
 0x362   :  { %vm6145_vm4 = vmand %vm6131_vm0, %vm6144_vm10 }
 0x363   :  { %vm6149_vm5 = vmand %vm6131_vm0, %vm6148_vm11 }
 0x364   :  { %vm6153_vm6 = vmand %vm6131_vm0, %vm6152_vm1 }
 0x365   :  { %vm6157_vm3 = vmand %vm6131_vm0, %vm6156_vm8 }
 0x37d   :  { %s6307_s0 = spop %6306 }
 0x37e   :  { %v6134_v45 = vstv %s6307_s0 }
 0x37f   :  { %v6135_v15 = vsel %vm6133_vm13, %v6134_v45, 0.0 }
 0x381   :  { %s6309_s4 = spop %6308 }
 0x382   :  { %v6138_v47 = vstv %s6309_s4 }
 0x383   :  { %v6139_v29 = vsel %vm6137_vm2, %v6138_v47, %v6135_v15 }
 0x3a2   :  { %v6064_v58 = vpop.xlane.xlu2 %6063 }
 0x3a3   :  { %v6065_v31 = vrot.slane %v6064_v58, 4 }
 0x3a5   :  { %v6066_v63 = vadd.f32 %v6065_v31, %v6064_v58 }
 0x3a7   :  { %v6067_v22 = vrot.slane %v6066_v63, 2 }
 0x3a9   :  { %v6068_v18 = vadd.f32 %v6067_v22, %v6066_v63 }
 0x3ab   :  { %v6069_v62 = vrot.slane %v6068_v18, 1 }
 0x3ad   :  { %v6070_v35 = vadd.f32 %v6069_v62, %v6068_v18 }
 0x3b8   :  { %v5403_v46 = vpop.xlane.xlu1 %5402  ;;  %v6119_v27 = vpop.xlane.xlu0 %6118 }
 0x3b9   :  { %v5404_v48 = vrot.slane %v5403_v46, 4  ;;  %v6120_v16 = vrot.slane %v6119_v27, 4 }
 0x3bb   :  { %v5405_v24 = vadd.f32 %v5404_v48, %v5403_v46  ;;  %v6121_v13 = vadd.f32 %v6120_v16, %v6119_v27 }
 0x3bd   :  { %v5406_v43 = vrot.slane %v5405_v24, 2  ;;  %v6122_v36 = vrot.slane %v6121_v13, 2 }
 0x3bf   :  { %v5407_v21 = vadd.f32 %v5406_v43, %v5405_v24  ;;  %v6123_v1 = vadd.f32 %v6122_v36, %v6121_v13 }
 0x3c0   :  { %v5432_v60 = vpop.xlane.xlu1 %5431 }
 0x3c1   :  { %v5408_v61 = vrot.slane %v5407_v21, 1  ;;  %v5433_v50 = vrot.slane %v5432_v60, 4  ;;  %v6124_v0 = vrot.slane %v6123_v1, 1 }
 0x3c3   :  { %v5409_v23 = vadd.f32 %v5408_v61, %v5407_v21  ;;  %v5434_v7 = vadd.f32 %v5433_v50, %v5432_v60  ;;  %v6125_v28 = vadd.f32 %v6124_v0, %v6123_v1 }
 0x3c5   :  { %6310 = vpush %v5409_v23  ;;  %v5435_v40 = vrot.slane %v5434_v7, 2 }
 0x3c7   :  { %v5436_v9 = vadd.f32 %v5435_v40, %v5434_v7 }
 0x3c9   :  { %v5437_v54 = vrot.slane %v5436_v9, 1 }
 0x3cb   :  { %v5438_v57 = vadd.f32 %v5437_v54, %v5436_v9 }
 0x3cd   :  { %6312 = vpush %v5438_v57 }
 0x3ce   :  { %6314 = vpush %v6070_v35 }
 0x3d2   :  { %v6098_v26 = vpop.xlane.xlu2 %6097 }
 0x3d3   :  { %v6099_v59 = vrot.slane %v6098_v26, 4 }
 0x3d5   :  { %v6100_v53 = vadd.f32 %v6099_v59, %v6098_v26 }
 0x3d7   :  { %v6101_v12 = vrot.slane %v6100_v53, 2 }
 0x3d9   :  { %v6102_v8 = vadd.f32 %v6101_v12, %v6100_v53 }
 0x3db   :  { %v6103_v17 = vrot.slane %v6102_v8, 1 }
 0x3dd   :  { %v6104_v3 = vadd.f32 %v6103_v17, %v6102_v8 }
 0x3df   :  { %6316 = vpush %v6104_v3 }
 0x3e0   :  { %6318 = vpush %v6125_v28 }
 0x3f6   :  { %s6311_s20 = spop %6310 }
 0x3f7   :  { %v6142_v41 = vstv %s6311_s20 }
 0x3f8   :  { %v6143_v33 = vsel %vm6141_vm7, %v6142_v41, %v6139_v29 }
 0x3fe   :  { %s6313_s21 = spop %6312 }
 0x3ff   :  { %s6315_s22 = spop %6314  ;;  %v6146_v51 = vstv %s6313_s21 }
 0x400   :  { %v6147_v2 = vsel %vm6145_vm4, %v6146_v51, %v6143_v33  ;;  %v6150_v32 = vstv %s6315_s22 }
 0x401   :  { %v6151_v25 = vsel %vm6149_vm5, %v6150_v32, %v6147_v2 }
 0x410   :  { %s6317_s23 = spop %6316 }
 0x411   :  { %s6319_s24 = spop %6318  ;;  %v6154_v38 = vstv %s6317_s23 }
 0x412   :  { %v6155_v34 = vsel %vm6153_vm6, %v6154_v38, %v6151_v25  ;;  %v6158_v49 = vstv %s6319_s24 }
 0x413   :  { %v6159_v37 = vsel %vm6157_vm3, %v6158_v49, %v6155_v34 }
 0x414   :  { %6160 = vst [vmem:[%s9871_s7] sm:$0xff] %v6159_v37 }
 0x415   :  { %6187 = vsyncpa [#allocation3], 1 }
 0x416   :  { %6188 = vsyncpa [#allocation5], 1 }

</bundles_post_ra>
